<compile_context>
chip_gen: v5e
topology: v5e:2x2
jax: 0.10.0
libtpu: 0.0.40
codegen_flags: <defaults>
</compile_context>

<pallas_src>
import jax
import jax.numpy as jnp
import numpy as np
from jax.experimental import pallas as pl
from jax.experimental.pallas import tpu as pltpu

GATE_LANE = 128                 # each LSTM gate occupies one 128-lane band
GATE_WIDTH = 4 * GATE_LANE      # padded gate dimension (i|f|g|o), 512 lanes
HIDDEN_PAD = 128                # padded layer-to-layer hidden width
OUT_PAD = 128                   # padded output width (lane-dense store)


# ---------------------------------------------------------------------------
# Fused autoencoder kernel (4 LSTM layers + output Linear, no grid)
# ---------------------------------------------------------------------------
def _make_kernel(T, B, hiddens):
    H1, H2, H3, H4 = hiddens
    GL = GATE_LANE

    def kernel(x_ref,
               w1i_ref, w1h_ref, b1_ref,
               w2i_ref, w2h_ref, b2_ref,
               w3i_ref, w3h_ref, b3_ref,
               w4i_ref, w4h_ref, b4_ref,
               wo_ref, bo_ref,
               out_ref,
               proj_ref, hs_ref):
        # Zero the hidden-state scratch once so never-written padded lanes are
        # finite zeros (they multiply zero-padded weight rows in the next layer).
        hs_ref[...] = jnp.zeros_like(hs_ref)

        def run_layer(in_all, w_ih_ref, w_hh_ref, b_ref, hidden):
            w_ih = w_ih_ref[...]                      # (In_pad, 512), loaded once
            w_hh = w_hh_ref[...]                      # (H, 512)
            b = b_ref[...]                            # (1, 512)

            # (1) Hoisted input projection: ONE matmul over all T*B rows,
            #     staged in VMEM; only h @ w_hh remains on the recurrence.
            proj_ref[...] = (jnp.dot(in_all, w_ih,
                                     preferred_element_type=jnp.float32) + b)

            h = jnp.zeros((B, hidden), jnp.float32)
            c = jnp.zeros((B, hidden), jnp.float32)
            for t in range(T):                        # static T -> fully unrolled
                gates = proj_ref[t * B:(t + 1) * B, :] + jnp.dot(
                    h, w_hh, preferred_element_type=jnp.float32)   # (B, 512)

                # (4) One wide tanh serves all three sigmoid gates:
                #     sigmoid(x) = 0.5 * (1 + tanh(x / 2)).
                th = jnp.tanh(0.5 * gates)
                # (3) Gate slices start on 128-lane boundaries (no lane rotates).
                i_g = 0.5 * (th[:, 0 * GL:0 * GL + hidden] + 1.0)
                f_g = 0.5 * (th[:, 1 * GL:1 * GL + hidden] + 1.0)
                o_g = 0.5 * (th[:, 3 * GL:3 * GL + hidden] + 1.0)
                g_g = jnp.tanh(gates[:, 2 * GL:2 * GL + hidden])

                c = f_g * c + i_g * g_g
                h = o_g * jnp.tanh(c)
                hs_ref[t * B:(t + 1) * B, :hidden] = h   # stage for next layer
            return hs_ref[...]                           # (T*B, 128)

        x_all = x_ref[...]                               # (T*B, F), ONE load
        h_all = run_layer(x_all, w1i_ref, w1h_ref, b1_ref, H1)  # enc rnn1: F  -> 2E
        h_all = run_layer(h_all, w2i_ref, w2h_ref, b2_ref, H2)  # enc rnn2: 2E -> E
        h_all = run_layer(h_all, w3i_ref, w3h_ref, b3_ref, H3)  # dec rnn1: E  -> E
        h_all = run_layer(h_all, w4i_ref, w4h_ref, b4_ref, H4)  # dec rnn2: E  -> 2E

        # (2) Output Linear batched over all T*B rows; single lane-dense store.
        out_ref[...] = (jnp.dot(h_all, wo_ref[...],
                                preferred_element_type=jnp.float32)
                        + bo_ref[...]).astype(out_ref.dtype)

    return kernel


def _vmem_spec():
    # Whole array resident in VMEM (no blocking, no grid pipeline).
    return pl.BlockSpec(memory_space=pltpu.MemorySpace.VMEM)


def _nbytes(a):
    return int(np.prod(a.shape)) * a.dtype.itemsize


@jax.jit
def recurrent_autoencoder(x_btf, packed):
    """x_btf: (B, T, F) batch-first, like the PyTorch module. Returns (B, T, F)."""
    B, T, F = x_btf.shape
    # (5) Time-major and flattened to (T*B, F): feeds the hoisted layer-1 input
    #     projection as one matmul; kernel never loads per-step x slices.
    x_flat = jnp.transpose(x_btf, (1, 0, 2)).reshape(T * B, F)

    layers = (packed["l1"], packed["l2"], packed["l3"], packed["l4"])
    hiddens = tuple(int(l[1].shape[0]) for l in layers)

    args = (x_flat,) + tuple(a for l in layers for a in l) \
           + (packed["out_w"], packed["out_b"])

    # Advisory cost estimate so XLA schedules neighbors around this
    # long-latency, low-bandwidth custom call.
    flops = 2 * T * B * HIDDEN_PAD * OUT_PAD
    trans = 0
    for (w_ih_p, w_hh_p, _b) in layers:
        flops += 2 * T * B * GATE_WIDTH * (int(w_ih_p.shape[0]) + int(w_hh_p.shape[0]))
        trans += T * B * (GATE_WIDTH + 2 * int(w_hh_p.shape[0]))
    bytes_accessed = sum(_nbytes(a) for a in args) + T * B * OUT_PAD * 4

    out_flat = pl.pallas_call(
        _make_kernel(T, B, hiddens),
        out_shape=jax.ShapeDtypeStruct((T * B, OUT_PAD), jnp.float32),
        in_specs=[_vmem_spec() for _ in args],
        out_specs=_vmem_spec(),
        scratch_shapes=[
            pltpu.VMEM((T * B, GATE_WIDTH), jnp.float32),   # staged input projection
            pltpu.VMEM((T * B, HIDDEN_PAD), jnp.float32),   # layer-to-layer hidden states
        ],
        cost_estimate=pl.CostEstimate(flops=int(flops),
                                      transcendentals=int(trans),
                                      bytes_accessed=int(bytes_accessed)),
    )(*args)

    # Un-pad the lane-dense output and return batch-first.
    y = out_flat.reshape(T, B, OUT_PAD)[:, :, :F]
    return jnp.transpose(y, (1, 0, 2))


# ---------------------------------------------------------------------------
# Parameter init (PyTorch-shaped) + kernel-layout packing (lane-aligned gates)
# ---------------------------------------------------------------------------
def init_lstm_raw(key, in_dim, hidden):
    k1, k2, k3, k4 = jax.random.split(key, 4)
    s = 1.0 / np.sqrt(hidden)
    return dict(
        w_ih=jax.random.uniform(k1, (4 * hidden, in_dim), jnp.float32, -s, s),
        w_hh=jax.random.uniform(k2, (4 * hidden, hidden), jnp.float32, -s, s),
        b_ih=jax.random.uniform(k3, (4 * hidden,), jnp.float32, -s, s),
        b_hh=jax.random.uniform(k4, (4 * hidden,), jnp.float32, -s, s),
    )


def init_params(key, n_features, embedding_dim):
    keys = jax.random.split(key, 6)
    E, H = embedding_dim, 2 * embedding_dim
    s = 1.0 / np.sqrt(H)
    return dict(
        enc_rnn1=init_lstm_raw(keys[0], n_features, H),   # F  -> 2E
        enc_rnn2=init_lstm_raw(keys[1], H, E),            # 2E -> E
        dec_rnn1=init_lstm_raw(keys[2], E, E),            # E  -> E
        dec_rnn2=init_lstm_raw(keys[3], E, H),            # E  -> 2E
        out_w=jax.random.uniform(keys[4], (n_features, H), jnp.float32, -s, s),
        out_b=jax.random.uniform(keys[5], (n_features,), jnp.float32, -s, s),
    )


def _pack_lstm(raw, in_pad):
    """PyTorch (4H, In)/(4H, H) weights -> (in_pad, 4*128)/(H, 4*128), gate k at
    lanes [k*128, k*128+H); bias zero-padded identically (b_ih + b_hh folded)."""
    hidden = raw["w_hh"].shape[1]
    in_dim = raw["w_ih"].shape[1]
    assert hidden <= GATE_LANE and in_dim <= in_pad
    w_ih = np.asarray(raw["w_ih"], np.float32)
    w_hh = np.asarray(raw["w_hh"], np.float32)
    b = np.asarray(raw["b_ih"], np.float32) + np.asarray(raw["b_hh"], np.float32)
    w_ih_p = np.zeros((in_pad, GATE_WIDTH), np.float32)
    w_hh_p = np.zeros((hidden, GATE_WIDTH), np.float32)
    b_p = np.zeros((1, GATE_WIDTH), np.float32)
    for k in range(4):                       # PyTorch gate order: i, f, g, o
        src = slice(k * hidden, (k + 1) * hidden)
        dst = slice(k * GATE_LANE, k * GATE_LANE + hidden)
        w_ih_p[:in_dim, dst] = w_ih[src, :].T
        w_hh_p[:, dst] = w_hh[src, :].T
        b_p[0, dst] = b[src]
    return jnp.asarray(w_ih_p), jnp.asarray(w_hh_p), jnp.asarray(b_p)


def pack_params(params, n_features):
    out_w = np.asarray(params["out_w"], np.float32)      # (F, 2E)
    out_b = np.asarray(params["out_b"], np.float32)      # (F,)
    hidden_out = out_w.shape[1]
    assert hidden_out <= HIDDEN_PAD and n_features <= OUT_PAD
    wo = np.zeros((HIDDEN_PAD, OUT_PAD), np.float32)
    bo = np.zeros((1, OUT_PAD), np.float32)
    wo[:hidden_out, :n_features] = out_w.T
    bo[0, :n_features] = out_b
    return dict(
        # layer 1 consumes the raw (T*B, F) input, so its input dim stays F;
        # layers 2-4 consume the 128-lane-padded hidden-state scratch.
        l1=_pack_lstm(params["enc_rnn1"], in_pad=params["enc_rnn1"]["w_ih"].shape[1]),
        l2=_pack_lstm(params["enc_rnn2"], in_pad=HIDDEN_PAD),
        l3=_pack_lstm(params["dec_rnn1"], in_pad=HIDDEN_PAD),
        l4=_pack_lstm(params["dec_rnn2"], in_pad=HIDDEN_PAD),
        out_w=jnp.asarray(wo),
        out_b=jnp.asarray(bo),
    )


# ---------------------------------------------------------------------------
# Pure-JAX reference (standard LSTM with jax.nn.sigmoid, PyTorch-shaped params)
# ---------------------------------------------------------------------------
def _lstm_ref(x_tbf, p):
    H = p["w_hh"].shape[1]
    w_ih_t = p["w_ih"].T
    w_hh_t = p["w_hh"].T
    b = (p["b_ih"] + p["b_hh"])[None, :]
    B = x_tbf.shape[1]

    def step(carry, x_t):
        h, c = carry
        g = x_t @ w_ih_t + h @ w_hh_t + b
        i = jax.nn.sigmoid(g[:, :H])
        f = jax.nn.sigmoid(g[:, H:2 * H])
        gg = jnp.tanh(g[:, 2 * H:3 * H])
        o = jax.nn.sigmoid(g[:, 3 * H:])
        c = f * c + i * gg
        h = o * jnp.tanh(c)
        return (h, c), h

    init = (jnp.zeros((B, H), jnp.float32), jnp.zeros((B, H), jnp.float32))
    _, ys = jax.lax.scan(step, init, x_tbf)
    return ys


def recurrent_autoencoder_ref(x_btf, params):
    x = jnp.transpose(x_btf, (1, 0, 2))
    x = _lstm_ref(x, params["enc_rnn1"])
    x = _lstm_ref(x, params["enc_rnn2"])
    x = _lstm_ref(x, params["dec_rnn1"])
    x = _lstm_ref(x, params["dec_rnn2"])
    y = x @ params["out_w"].T + params["out_b"][None, None, :]
    return jnp.transpose(y, (1, 0, 2))


if __name__ == "__main__":
    B, T, n_features, embedding_dim = 2, 8, 4, 16

    key = jax.random.PRNGKey(0)
    k_x, k_p = jax.random.split(key)
    x = jax.random.normal(k_x, (B, T, n_features), jnp.float32)
    params = init_params(k_p, n_features, embedding_dim)
    packed = pack_params(params, n_features)

    out = recurrent_autoencoder(x, packed)
    out = jax.block_until_ready(out)

    ref = recurrent_autoencoder_ref(x, params)
    assert out.shape == (B, T, n_features), out.shape
    np.testing.assert_allclose(np.asarray(out), np.asarray(ref), atol=1e-2, rtol=1e-2)

    print("KERNEL_OK")
</pallas_src>

<mosaic_0001>
module attributes {stable_mosaic.version = 11 : i64} {
  func.func @kernel(%arg0: memref<16x4xf32, #tpu.memory_space<vmem>>, %arg1: memref<4x512xf32, #tpu.memory_space<vmem>>, %arg2: memref<32x512xf32, #tpu.memory_space<vmem>>, %arg3: memref<1x512xf32, #tpu.memory_space<vmem>>, %arg4: memref<128x512xf32, #tpu.memory_space<vmem>>, %arg5: memref<16x512xf32, #tpu.memory_space<vmem>>, %arg6: memref<1x512xf32, #tpu.memory_space<vmem>>, %arg7: memref<128x512xf32, #tpu.memory_space<vmem>>, %arg8: memref<16x512xf32, #tpu.memory_space<vmem>>, %arg9: memref<1x512xf32, #tpu.memory_space<vmem>>, %arg10: memref<128x512xf32, #tpu.memory_space<vmem>>, %arg11: memref<32x512xf32, #tpu.memory_space<vmem>>, %arg12: memref<1x512xf32, #tpu.memory_space<vmem>>, %arg13: memref<128x128xf32, #tpu.memory_space<vmem>>, %arg14: memref<1x128xf32, #tpu.memory_space<vmem>>, %arg15: memref<16x128xf32, #tpu.memory_space<vmem>>, %arg16: memref<16x512xf32, #tpu.memory_space<vmem>>, %arg17: memref<16x128xf32, #tpu.memory_space<vmem>>) attributes {dimension_semantics = [], scalar_prefetch = 0 : i64, scratch_operands = 2 : i64, tpu.core_type = #tpu.core_type<tc>} {
    %cst = arith.constant 0.000000e+00 : f32
    %0 = vector.broadcast %cst : f32 to vector<16x128xf32>
    %c0 = arith.constant 0 : index
    %c0_0 = arith.constant 0 : index
    %1 = vector.load %arg17[%c0, %c0_0] : memref<16x128xf32, #tpu.memory_space<vmem>>, vector<16x128xf32>
    tpu.vector_store %arg17[%c0, %c0_0], %0 {strides = array<i32>} : memref<16x128xf32, #tpu.memory_space<vmem>>, vector<16x128xf32>,
    %c0_1 = arith.constant 0 : index
    %c0_2 = arith.constant 0 : index
    %2 = vector.load %arg0[%c0_1, %c0_2] : memref<16x4xf32, #tpu.memory_space<vmem>>, vector<16x4xf32>
    %c0_3 = arith.constant 0 : index
    %c0_4 = arith.constant 0 : index
    %3 = vector.load %arg1[%c0_3, %c0_4] : memref<4x512xf32, #tpu.memory_space<vmem>>, vector<4x512xf32>
    %c0_5 = arith.constant 0 : index
    %c0_6 = arith.constant 0 : index
    %4 = vector.load %arg2[%c0_5, %c0_6] : memref<32x512xf32, #tpu.memory_space<vmem>>, vector<32x512xf32>
    %c0_7 = arith.constant 0 : index
    %c0_8 = arith.constant 0 : index
    %5 = vector.load %arg3[%c0_7, %c0_8] : memref<1x512xf32, #tpu.memory_space<vmem>>, vector<1x512xf32>
    %cst_9 = arith.constant dense<0.000000e+00> : vector<16x512xf32>
    %6 = tpu.matmul %2, %3, %cst_9 {dimension_numbers = #tpu.dot_dimension_numbers<[1], [0], [0], [1], [0, 0, 1, 1], [], []>} : vector<16x4xf32>, vector<4x512xf32>, vector<16x512xf32> -> vector<16x512xf32>
    %7 = vector.broadcast %5 : vector<1x512xf32> to vector<16x512xf32>
    %8 = arith.addf %6, %7 : vector<16x512xf32>
    %c0_10 = arith.constant 0 : index
    %c0_11 = arith.constant 0 : index
    %9 = vector.load %arg16[%c0_10, %c0_11] : memref<16x512xf32, #tpu.memory_space<vmem>>, vector<16x512xf32>
    tpu.vector_store %arg16[%c0_10, %c0_11], %8 {strides = array<i32>} : memref<16x512xf32, #tpu.memory_space<vmem>>, vector<16x512xf32>,
    %cst_12 = arith.constant 0.000000e+00 : f32
    %10 = vector.broadcast %cst_12 : f32 to vector<2x32xf32>
    %cst_13 = arith.constant 0.000000e+00 : f32
    %11 = vector.broadcast %cst_13 : f32 to vector<2x32xf32>
    %c0_14 = arith.constant 0 : index
    %c0_15 = arith.constant 0 : index
    %12 = vector.load %arg16[%c0_14, %c0_15] : memref<16x512xf32, #tpu.memory_space<vmem>>, vector<2x512xf32>
    %cst_16 = arith.constant dense<0.000000e+00> : vector<2x512xf32>
    %13 = tpu.matmul %10, %4, %cst_16 {dimension_numbers = #tpu.dot_dimension_numbers<[1], [0], [0], [1], [0, 0, 1, 1], [], []>} : vector<2x32xf32>, vector<32x512xf32>, vector<2x512xf32> -> vector<2x512xf32>
    %14 = arith.addf %12, %13 : vector<2x512xf32>
    %cst_17 = arith.constant 5.000000e-01 : f32
    %15 = vector.broadcast %cst_17 : f32 to vector<2x512xf32>
    %16 = arith.mulf %15, %14 : vector<2x512xf32>
    %17 = math.tanh %16 : vector<2x512xf32>
    %18 = vector.extract_strided_slice %17 {offsets = [0, 0], sizes = [2, 32], strides = [1, 1]} : vector<2x512xf32> to vector<2x32xf32>
    %cst_18 = arith.constant 1.000000e+00 : f32
    %19 = vector.broadcast %cst_18 : f32 to vector<2x32xf32>
    %20 = arith.addf %18, %19 : vector<2x32xf32>
    %cst_19 = arith.constant 5.000000e-01 : f32
    %21 = vector.broadcast %cst_19 : f32 to vector<2x32xf32>
    %22 = arith.mulf %21, %20 : vector<2x32xf32>
    %23 = vector.extract_strided_slice %17 {offsets = [0, 128], sizes = [2, 32], strides = [1, 1]} : vector<2x512xf32> to vector<2x32xf32>
    %cst_20 = arith.constant 1.000000e+00 : f32
    %24 = vector.broadcast %cst_20 : f32 to vector<2x32xf32>
    %25 = arith.addf %23, %24 : vector<2x32xf32>
    %cst_21 = arith.constant 5.000000e-01 : f32
    %26 = vector.broadcast %cst_21 : f32 to vector<2x32xf32>
    %27 = arith.mulf %26, %25 : vector<2x32xf32>
    %28 = vector.extract_strided_slice %17 {offsets = [0, 384], sizes = [2, 32], strides = [1, 1]} : vector<2x512xf32> to vector<2x32xf32>
    %cst_22 = arith.constant 1.000000e+00 : f32
    %29 = vector.broadcast %cst_22 : f32 to vector<2x32xf32>
    %30 = arith.addf %28, %29 : vector<2x32xf32>
    %cst_23 = arith.constant 5.000000e-01 : f32
    %31 = vector.broadcast %cst_23 : f32 to vector<2x32xf32>
    %32 = arith.mulf %31, %30 : vector<2x32xf32>
    %33 = vector.extract_strided_slice %14 {offsets = [0, 256], sizes = [2, 32], strides = [1, 1]} : vector<2x512xf32> to vector<2x32xf32>
    %34 = math.tanh %33 : vector<2x32xf32>
    %35 = arith.mulf %27, %11 : vector<2x32xf32>
    %36 = arith.mulf %22, %34 : vector<2x32xf32>
    %37 = arith.addf %35, %36 : vector<2x32xf32>
    %38 = math.tanh %37 : vector<2x32xf32>
    %39 = arith.mulf %32, %38 : vector<2x32xf32>
    %c0_24 = arith.constant 0 : index
    %c0_25 = arith.constant 0 : index
    %40 = vector.load %arg17[%c0_24, %c0_25] : memref<16x128xf32, #tpu.memory_space<vmem>>, vector<2x32xf32>
    tpu.vector_store %arg17[%c0_24, %c0_25], %39 {strides = array<i32>} : memref<16x128xf32, #tpu.memory_space<vmem>>, vector<2x32xf32>,
    %c2 = arith.constant 2 : index
    %c0_26 = arith.constant 0 : index
    %41 = vector.load %arg16[%c2, %c0_26] : memref<16x512xf32, #tpu.memory_space<vmem>>, vector<2x512xf32>
    %cst_27 = arith.constant dense<0.000000e+00> : vector<2x512xf32>
    %42 = tpu.matmul %39, %4, %cst_27 {dimension_numbers = #tpu.dot_dimension_numbers<[1], [0], [0], [1], [0, 0, 1, 1], [], []>} : vector<2x32xf32>, vector<32x512xf32>, vector<2x512xf32> -> vector<2x512xf32>
    %43 = arith.addf %41, %42 : vector<2x512xf32>
    %cst_28 = arith.constant 5.000000e-01 : f32
    %44 = vector.broadcast %cst_28 : f32 to vector<2x512xf32>
    %45 = arith.mulf %44, %43 : vector<2x512xf32>
    %46 = math.tanh %45 : vector<2x512xf32>
    %47 = vector.extract_strided_slice %46 {offsets = [0, 0], sizes = [2, 32], strides = [1, 1]} : vector<2x512xf32> to vector<2x32xf32>
    %cst_29 = arith.constant 1.000000e+00 : f32
    %48 = vector.broadcast %cst_29 : f32 to vector<2x32xf32>
    %49 = arith.addf %47, %48 : vector<2x32xf32>
    %cst_30 = arith.constant 5.000000e-01 : f32
    %50 = vector.broadcast %cst_30 : f32 to vector<2x32xf32>
    %51 = arith.mulf %50, %49 : vector<2x32xf32>
    %52 = vector.extract_strided_slice %46 {offsets = [0, 128], sizes = [2, 32], strides = [1, 1]} : vector<2x512xf32> to vector<2x32xf32>
    %cst_31 = arith.constant 1.000000e+00 : f32
    %53 = vector.broadcast %cst_31 : f32 to vector<2x32xf32>
    %54 = arith.addf %52, %53 : vector<2x32xf32>
    %cst_32 = arith.constant 5.000000e-01 : f32
    %55 = vector.broadcast %cst_32 : f32 to vector<2x32xf32>
    %56 = arith.mulf %55, %54 : vector<2x32xf32>
    %57 = vector.extract_strided_slice %46 {offsets = [0, 384], sizes = [2, 32], strides = [1, 1]} : vector<2x512xf32> to vector<2x32xf32>
    %cst_33 = arith.constant 1.000000e+00 : f32
    %58 = vector.broadcast %cst_33 : f32 to vector<2x32xf32>
    %59 = arith.addf %57, %58 : vector<2x32xf32>
    %cst_34 = arith.constant 5.000000e-01 : f32
    %60 = vector.broadcast %cst_34 : f32 to vector<2x32xf32>
    %61 = arith.mulf %60, %59 : vector<2x32xf32>
    %62 = vector.extract_strided_slice %43 {offsets = [0, 256], sizes = [2, 32], strides = [1, 1]} : vector<2x512xf32> to vector<2x32xf32>
    %63 = math.tanh %62 : vector<2x32xf32>
    %64 = arith.mulf %56, %37 : vector<2x32xf32>
    %65 = arith.mulf %51, %63 : vector<2x32xf32>
    %66 = arith.addf %64, %65 : vector<2x32xf32>
    %67 = math.tanh %66 : vector<2x32xf32>
    %68 = arith.mulf %61, %67 : vector<2x32xf32>
    %c2_35 = arith.constant 2 : index
    %c0_36 = arith.constant 0 : index
    %69 = vector.load %arg17[%c2_35, %c0_36] : memref<16x128xf32, #tpu.memory_space<vmem>>, vector<2x32xf32>
    tpu.vector_store %arg17[%c2_35, %c0_36], %68 {strides = array<i32>} : memref<16x128xf32, #tpu.memory_space<vmem>>, vector<2x32xf32>,
    %c4 = arith.constant 4 : index
    %c0_37 = arith.constant 0 : index
    %70 = vector.load %arg16[%c4, %c0_37] : memref<16x512xf32, #tpu.memory_space<vmem>>, vector<2x512xf32>
    %cst_38 = arith.constant dense<0.000000e+00> : vector<2x512xf32>
    %71 = tpu.matmul %68, %4, %cst_38 {dimension_numbers = #tpu.dot_dimension_numbers<[1], [0], [0], [1], [0, 0, 1, 1], [], []>} : vector<2x32xf32>, vector<32x512xf32>, vector<2x512xf32> -> vector<2x512xf32>
    %72 = arith.addf %70, %71 : vector<2x512xf32>
    %cst_39 = arith.constant 5.000000e-01 : f32
    %73 = vector.broadcast %cst_39 : f32 to vector<2x512xf32>
    %74 = arith.mulf %73, %72 : vector<2x512xf32>
    %75 = math.tanh %74 : vector<2x512xf32>
    %76 = vector.extract_strided_slice %75 {offsets = [0, 0], sizes = [2, 32], strides = [1, 1]} : vector<2x512xf32> to vector<2x32xf32>
    %cst_40 = arith.constant 1.000000e+00 : f32
    %77 = vector.broadcast %cst_40 : f32 to vector<2x32xf32>
    %78 = arith.addf %76, %77 : vector<2x32xf32>
    %cst_41 = arith.constant 5.000000e-01 : f32
    %79 = vector.broadcast %cst_41 : f32 to vector<2x32xf32>
    %80 = arith.mulf %79, %78 : vector<2x32xf32>
    %81 = vector.extract_strided_slice %75 {offsets = [0, 128], sizes = [2, 32], strides = [1, 1]} : vector<2x512xf32> to vector<2x32xf32>
    %cst_42 = arith.constant 1.000000e+00 : f32
    %82 = vector.broadcast %cst_42 : f32 to vector<2x32xf32>
    %83 = arith.addf %81, %82 : vector<2x32xf32>
    %cst_43 = arith.constant 5.000000e-01 : f32
    %84 = vector.broadcast %cst_43 : f32 to vector<2x32xf32>
    %85 = arith.mulf %84, %83 : vector<2x32xf32>
    %86 = vector.extract_strided_slice %75 {offsets = [0, 384], sizes = [2, 32], strides = [1, 1]} : vector<2x512xf32> to vector<2x32xf32>
    %cst_44 = arith.constant 1.000000e+00 : f32
    %87 = vector.broadcast %cst_44 : f32 to vector<2x32xf32>
    %88 = arith.addf %86, %87 : vector<2x32xf32>
    %cst_45 = arith.constant 5.000000e-01 : f32
    %89 = vector.broadcast %cst_45 : f32 to vector<2x32xf32>
    %90 = arith.mulf %89, %88 : vector<2x32xf32>
    %91 = vector.extract_strided_slice %72 {offsets = [0, 256], sizes = [2, 32], strides = [1, 1]} : vector<2x512xf32> to vector<2x32xf32>
    %92 = math.tanh %91 : vector<2x32xf32>
    %93 = arith.mulf %85, %66 : vector<2x32xf32>
    %94 = arith.mulf %80, %92 : vector<2x32xf32>
    %95 = arith.addf %93, %94 : vector<2x32xf32>
    %96 = math.tanh %95 : vector<2x32xf32>
    %97 = arith.mulf %90, %96 : vector<2x32xf32>
    %c4_46 = arith.constant 4 : index
    %c0_47 = arith.constant 0 : index
    %98 = vector.load %arg17[%c4_46, %c0_47] : memref<16x128xf32, #tpu.memory_space<vmem>>, vector<2x32xf32>
    tpu.vector_store %arg17[%c4_46, %c0_47], %97 {strides = array<i32>} : memref<16x128xf32, #tpu.memory_space<vmem>>, vector<2x32xf32>,
    %c6 = arith.constant 6 : index
    %c0_48 = arith.constant 0 : index
    %99 = vector.load %arg16[%c6, %c0_48] : memref<16x512xf32, #tpu.memory_space<vmem>>, vector<2x512xf32>
    %cst_49 = arith.constant dense<0.000000e+00> : vector<2x512xf32>
    %100 = tpu.matmul %97, %4, %cst_49 {dimension_numbers = #tpu.dot_dimension_numbers<[1], [0], [0], [1], [0, 0, 1, 1], [], []>} : vector<2x32xf32>, vector<32x512xf32>, vector<2x512xf32> -> vector<2x512xf32>
    %101 = arith.addf %99, %100 : vector<2x512xf32>
    %cst_50 = arith.constant 5.000000e-01 : f32
    %102 = vector.broadcast %cst_50 : f32 to vector<2x512xf32>
    %103 = arith.mulf %102, %101 : vector<2x512xf32>
    %104 = math.tanh %103 : vector<2x512xf32>
    %105 = vector.extract_strided_slice %104 {offsets = [0, 0], sizes = [2, 32], strides = [1, 1]} : vector<2x512xf32> to vector<2x32xf32>
    %cst_51 = arith.constant 1.000000e+00 : f32
    %106 = vector.broadcast %cst_51 : f32 to vector<2x32xf32>
    %107 = arith.addf %105, %106 : vector<2x32xf32>
    %cst_52 = arith.constant 5.000000e-01 : f32
    %108 = vector.broadcast %cst_52 : f32 to vector<2x32xf32>
    %109 = arith.mulf %108, %107 : vector<2x32xf32>
    %110 = vector.extract_strided_slice %104 {offsets = [0, 128], sizes = [2, 32], strides = [1, 1]} : vector<2x512xf32> to vector<2x32xf32>
    %cst_53 = arith.constant 1.000000e+00 : f32
    %111 = vector.broadcast %cst_53 : f32 to vector<2x32xf32>
    %112 = arith.addf %110, %111 : vector<2x32xf32>
    %cst_54 = arith.constant 5.000000e-01 : f32
    %113 = vector.broadcast %cst_54 : f32 to vector<2x32xf32>
    %114 = arith.mulf %113, %112 : vector<2x32xf32>
    %115 = vector.extract_strided_slice %104 {offsets = [0, 384], sizes = [2, 32], strides = [1, 1]} : vector<2x512xf32> to vector<2x32xf32>
    %cst_55 = arith.constant 1.000000e+00 : f32
    %116 = vector.broadcast %cst_55 : f32 to vector<2x32xf32>
    %117 = arith.addf %115, %116 : vector<2x32xf32>
    %cst_56 = arith.constant 5.000000e-01 : f32
    %118 = vector.broadcast %cst_56 : f32 to vector<2x32xf32>
    %119 = arith.mulf %118, %117 : vector<2x32xf32>
    %120 = vector.extract_strided_slice %101 {offsets = [0, 256], sizes = [2, 32], strides = [1, 1]} : vector<2x512xf32> to vector<2x32xf32>
    %121 = math.tanh %120 : vector<2x32xf32>
    %122 = arith.mulf %114, %95 : vector<2x32xf32>
    %123 = arith.mulf %109, %121 : vector<2x32xf32>
    %124 = arith.addf %122, %123 : vector<2x32xf32>
    %125 = math.tanh %124 : vector<2x32xf32>
    %126 = arith.mulf %119, %125 : vector<2x32xf32>
    %c6_57 = arith.constant 6 : index
    %c0_58 = arith.constant 0 : index
    %127 = vector.load %arg17[%c6_57, %c0_58] : memref<16x128xf32, #tpu.memory_space<vmem>>, vector<2x32xf32>
    tpu.vector_store %arg17[%c6_57, %c0_58], %126 {strides = array<i32>} : memref<16x128xf32, #tpu.memory_space<vmem>>, vector<2x32xf32>,
    %c8 = arith.constant 8 : index
    %c0_59 = arith.constant 0 : index
    %128 = vector.load %arg16[%c8, %c0_59] : memref<16x512xf32, #tpu.memory_space<vmem>>, vector<2x512xf32>
    %cst_60 = arith.constant dense<0.000000e+00> : vector<2x512xf32>
    %129 = tpu.matmul %126, %4, %cst_60 {dimension_numbers = #tpu.dot_dimension_numbers<[1], [0], [0], [1], [0, 0, 1, 1], [], []>} : vector<2x32xf32>, vector<32x512xf32>, vector<2x512xf32> -> vector<2x512xf32>
    %130 = arith.addf %128, %129 : vector<2x512xf32>
    %cst_61 = arith.constant 5.000000e-01 : f32
    %131 = vector.broadcast %cst_61 : f32 to vector<2x512xf32>
    %132 = arith.mulf %131, %130 : vector<2x512xf32>
    %133 = math.tanh %132 : vector<2x512xf32>
    %134 = vector.extract_strided_slice %133 {offsets = [0, 0], sizes = [2, 32], strides = [1, 1]} : vector<2x512xf32> to vector<2x32xf32>
    %cst_62 = arith.constant 1.000000e+00 : f32
    %135 = vector.broadcast %cst_62 : f32 to vector<2x32xf32>
    %136 = arith.addf %134, %135 : vector<2x32xf32>
    %cst_63 = arith.constant 5.000000e-01 : f32
    %137 = vector.broadcast %cst_63 : f32 to vector<2x32xf32>
    %138 = arith.mulf %137, %136 : vector<2x32xf32>
    %139 = vector.extract_strided_slice %133 {offsets = [0, 128], sizes = [2, 32], strides = [1, 1]} : vector<2x512xf32> to vector<2x32xf32>
    %cst_64 = arith.constant 1.000000e+00 : f32
    %140 = vector.broadcast %cst_64 : f32 to vector<2x32xf32>
    %141 = arith.addf %139, %140 : vector<2x32xf32>
    %cst_65 = arith.constant 5.000000e-01 : f32
    %142 = vector.broadcast %cst_65 : f32 to vector<2x32xf32>
    %143 = arith.mulf %142, %141 : vector<2x32xf32>
    %144 = vector.extract_strided_slice %133 {offsets = [0, 384], sizes = [2, 32], strides = [1, 1]} : vector<2x512xf32> to vector<2x32xf32>
    %cst_66 = arith.constant 1.000000e+00 : f32
    %145 = vector.broadcast %cst_66 : f32 to vector<2x32xf32>
    %146 = arith.addf %144, %145 : vector<2x32xf32>
    %cst_67 = arith.constant 5.000000e-01 : f32
    %147 = vector.broadcast %cst_67 : f32 to vector<2x32xf32>
    %148 = arith.mulf %147, %146 : vector<2x32xf32>
    %149 = vector.extract_strided_slice %130 {offsets = [0, 256], sizes = [2, 32], strides = [1, 1]} : vector<2x512xf32> to vector<2x32xf32>
    %150 = math.tanh %149 : vector<2x32xf32>
    %151 = arith.mulf %143, %124 : vector<2x32xf32>
    %152 = arith.mulf %138, %150 : vector<2x32xf32>
    %153 = arith.addf %151, %152 : vector<2x32xf32>
    %154 = math.tanh %153 : vector<2x32xf32>
    %155 = arith.mulf %148, %154 : vector<2x32xf32>
    %c8_68 = arith.constant 8 : index
    %c0_69 = arith.constant 0 : index
    %156 = vector.load %arg17[%c8_68, %c0_69] : memref<16x128xf32, #tpu.memory_space<vmem>>, vector<2x32xf32>
    tpu.vector_store %arg17[%c8_68, %c0_69], %155 {strides = array<i32>} : memref<16x128xf32, #tpu.memory_space<vmem>>, vector<2x32xf32>,
    %c10 = arith.constant 10 : index
    %c0_70 = arith.constant 0 : index
    %157 = vector.load %arg16[%c10, %c0_70] : memref<16x512xf32, #tpu.memory_space<vmem>>, vector<2x512xf32>
    %cst_71 = arith.constant dense<0.000000e+00> : vector<2x512xf32>
    %158 = tpu.matmul %155, %4, %cst_71 {dimension_numbers = #tpu.dot_dimension_numbers<[1], [0], [0], [1], [0, 0, 1, 1], [], []>} : vector<2x32xf32>, vector<32x512xf32>, vector<2x512xf32> -> vector<2x512xf32>
    %159 = arith.addf %157, %158 : vector<2x512xf32>
    %cst_72 = arith.constant 5.000000e-01 : f32
    %160 = vector.broadcast %cst_72 : f32 to vector<2x512xf32>
    %161 = arith.mulf %160, %159 : vector<2x512xf32>
    %162 = math.tanh %161 : vector<2x512xf32>
    %163 = vector.extract_strided_slice %162 {offsets = [0, 0], sizes = [2, 32], strides = [1, 1]} : vector<2x512xf32> to vector<2x32xf32>
    %cst_73 = arith.constant 1.000000e+00 : f32
    %164 = vector.broadcast %cst_73 : f32 to vector<2x32xf32>
    %165 = arith.addf %163, %164 : vector<2x32xf32>
    %cst_74 = arith.constant 5.000000e-01 : f32
    %166 = vector.broadcast %cst_74 : f32 to vector<2x32xf32>
    %167 = arith.mulf %166, %165 : vector<2x32xf32>
    %168 = vector.extract_strided_slice %162 {offsets = [0, 128], sizes = [2, 32], strides = [1, 1]} : vector<2x512xf32> to vector<2x32xf32>
    %cst_75 = arith.constant 1.000000e+00 : f32
    %169 = vector.broadcast %cst_75 : f32 to vector<2x32xf32>
    %170 = arith.addf %168, %169 : vector<2x32xf32>
    %cst_76 = arith.constant 5.000000e-01 : f32
    %171 = vector.broadcast %cst_76 : f32 to vector<2x32xf32>
    %172 = arith.mulf %171, %170 : vector<2x32xf32>
    %173 = vector.extract_strided_slice %162 {offsets = [0, 384], sizes = [2, 32], strides = [1, 1]} : vector<2x512xf32> to vector<2x32xf32>
    %cst_77 = arith.constant 1.000000e+00 : f32
    %174 = vector.broadcast %cst_77 : f32 to vector<2x32xf32>
    %175 = arith.addf %173, %174 : vector<2x32xf32>
    %cst_78 = arith.constant 5.000000e-01 : f32
    %176 = vector.broadcast %cst_78 : f32 to vector<2x32xf32>
    %177 = arith.mulf %176, %175 : vector<2x32xf32>
    %178 = vector.extract_strided_slice %159 {offsets = [0, 256], sizes = [2, 32], strides = [1, 1]} : vector<2x512xf32> to vector<2x32xf32>
    %179 = math.tanh %178 : vector<2x32xf32>
    %180 = arith.mulf %172, %153 : vector<2x32xf32>
    %181 = arith.mulf %167, %179 : vector<2x32xf32>
    %182 = arith.addf %180, %181 : vector<2x32xf32>
    %183 = math.tanh %182 : vector<2x32xf32>
    %184 = arith.mulf %177, %183 : vector<2x32xf32>
    %c10_79 = arith.constant 10 : index
    %c0_80 = arith.constant 0 : index
    %185 = vector.load %arg17[%c10_79, %c0_80] : memref<16x128xf32, #tpu.memory_space<vmem>>, vector<2x32xf32>
    tpu.vector_store %arg17[%c10_79, %c0_80], %184 {strides = array<i32>} : memref<16x128xf32, #tpu.memory_space<vmem>>, vector<2x32xf32>,
    %c12 = arith.constant 12 : index
    %c0_81 = arith.constant 0 : index
    %186 = vector.load %arg16[%c12, %c0_81] : memref<16x512xf32, #tpu.memory_space<vmem>>, vector<2x512xf32>
    %cst_82 = arith.constant dense<0.000000e+00> : vector<2x512xf32>
    %187 = tpu.matmul %184, %4, %cst_82 {dimension_numbers = #tpu.dot_dimension_numbers<[1], [0], [0], [1], [0, 0, 1, 1], [], []>} : vector<2x32xf32>, vector<32x512xf32>, vector<2x512xf32> -> vector<2x512xf32>
    %188 = arith.addf %186, %187 : vector<2x512xf32>
    %cst_83 = arith.constant 5.000000e-01 : f32
    %189 = vector.broadcast %cst_83 : f32 to vector<2x512xf32>
    %190 = arith.mulf %189, %188 : vector<2x512xf32>
    %191 = math.tanh %190 : vector<2x512xf32>
    %192 = vector.extract_strided_slice %191 {offsets = [0, 0], sizes = [2, 32], strides = [1, 1]} : vector<2x512xf32> to vector<2x32xf32>
    %cst_84 = arith.constant 1.000000e+00 : f32
    %193 = vector.broadcast %cst_84 : f32 to vector<2x32xf32>
    %194 = arith.addf %192, %193 : vector<2x32xf32>
    %cst_85 = arith.constant 5.000000e-01 : f32
    %195 = vector.broadcast %cst_85 : f32 to vector<2x32xf32>
    %196 = arith.mulf %195, %194 : vector<2x32xf32>
    %197 = vector.extract_strided_slice %191 {offsets = [0, 128], sizes = [2, 32], strides = [1, 1]} : vector<2x512xf32> to vector<2x32xf32>
    %cst_86 = arith.constant 1.000000e+00 : f32
    %198 = vector.broadcast %cst_86 : f32 to vector<2x32xf32>
    %199 = arith.addf %197, %198 : vector<2x32xf32>
    %cst_87 = arith.constant 5.000000e-01 : f32
    %200 = vector.broadcast %cst_87 : f32 to vector<2x32xf32>
    %201 = arith.mulf %200, %199 : vector<2x32xf32>
    %202 = vector.extract_strided_slice %191 {offsets = [0, 384], sizes = [2, 32], strides = [1, 1]} : vector<2x512xf32> to vector<2x32xf32>
    %cst_88 = arith.constant 1.000000e+00 : f32
    %203 = vector.broadcast %cst_88 : f32 to vector<2x32xf32>
    %204 = arith.addf %202, %203 : vector<2x32xf32>
    %cst_89 = arith.constant 5.000000e-01 : f32
    %205 = vector.broadcast %cst_89 : f32 to vector<2x32xf32>
    %206 = arith.mulf %205, %204 : vector<2x32xf32>
    %207 = vector.extract_strided_slice %188 {offsets = [0, 256], sizes = [2, 32], strides = [1, 1]} : vector<2x512xf32> to vector<2x32xf32>
    %208 = math.tanh %207 : vector<2x32xf32>
    %209 = arith.mulf %201, %182 : vector<2x32xf32>
    %210 = arith.mulf %196, %208 : vector<2x32xf32>
    %211 = arith.addf %209, %210 : vector<2x32xf32>
    %212 = math.tanh %211 : vector<2x32xf32>
    %213 = arith.mulf %206, %212 : vector<2x32xf32>
    %c12_90 = arith.constant 12 : index
    %c0_91 = arith.constant 0 : index
    %214 = vector.load %arg17[%c12_90, %c0_91] : memref<16x128xf32, #tpu.memory_space<vmem>>, vector<2x32xf32>
    tpu.vector_store %arg17[%c12_90, %c0_91], %213 {strides = array<i32>} : memref<16x128xf32, #tpu.memory_space<vmem>>, vector<2x32xf32>,
    %c14 = arith.constant 14 : index
    %c0_92 = arith.constant 0 : index
    %215 = vector.load %arg16[%c14, %c0_92] : memref<16x512xf32, #tpu.memory_space<vmem>>, vector<2x512xf32>
    %cst_93 = arith.constant dense<0.000000e+00> : vector<2x512xf32>
    %216 = tpu.matmul %213, %4, %cst_93 {dimension_numbers = #tpu.dot_dimension_numbers<[1], [0], [0], [1], [0, 0, 1, 1], [], []>} : vector<2x32xf32>, vector<32x512xf32>, vector<2x512xf32> -> vector<2x512xf32>
    %217 = arith.addf %215, %216 : vector<2x512xf32>
    %cst_94 = arith.constant 5.000000e-01 : f32
    %218 = vector.broadcast %cst_94 : f32 to vector<2x512xf32>
    %219 = arith.mulf %218, %217 : vector<2x512xf32>
    %220 = math.tanh %219 : vector<2x512xf32>
    %221 = vector.extract_strided_slice %220 {offsets = [0, 0], sizes = [2, 32], strides = [1, 1]} : vector<2x512xf32> to vector<2x32xf32>
    %cst_95 = arith.constant 1.000000e+00 : f32
    %222 = vector.broadcast %cst_95 : f32 to vector<2x32xf32>
    %223 = arith.addf %221, %222 : vector<2x32xf32>
    %cst_96 = arith.constant 5.000000e-01 : f32
    %224 = vector.broadcast %cst_96 : f32 to vector<2x32xf32>
    %225 = arith.mulf %224, %223 : vector<2x32xf32>
    %226 = vector.extract_strided_slice %220 {offsets = [0, 128], sizes = [2, 32], strides = [1, 1]} : vector<2x512xf32> to vector<2x32xf32>
    %cst_97 = arith.constant 1.000000e+00 : f32
    %227 = vector.broadcast %cst_97 : f32 to vector<2x32xf32>
    %228 = arith.addf %226, %227 : vector<2x32xf32>
    %cst_98 = arith.constant 5.000000e-01 : f32
    %229 = vector.broadcast %cst_98 : f32 to vector<2x32xf32>
    %230 = arith.mulf %229, %228 : vector<2x32xf32>
    %231 = vector.extract_strided_slice %220 {offsets = [0, 384], sizes = [2, 32], strides = [1, 1]} : vector<2x512xf32> to vector<2x32xf32>
    %cst_99 = arith.constant 1.000000e+00 : f32
    %232 = vector.broadcast %cst_99 : f32 to vector<2x32xf32>
    %233 = arith.addf %231, %232 : vector<2x32xf32>
    %cst_100 = arith.constant 5.000000e-01 : f32
    %234 = vector.broadcast %cst_100 : f32 to vector<2x32xf32>
    %235 = arith.mulf %234, %233 : vector<2x32xf32>
    %236 = vector.extract_strided_slice %217 {offsets = [0, 256], sizes = [2, 32], strides = [1, 1]} : vector<2x512xf32> to vector<2x32xf32>
    %237 = math.tanh %236 : vector<2x32xf32>
    %238 = arith.mulf %230, %211 : vector<2x32xf32>
    %239 = arith.mulf %225, %237 : vector<2x32xf32>
    %240 = arith.addf %238, %239 : vector<2x32xf32>
    %241 = math.tanh %240 : vector<2x32xf32>
    %242 = arith.mulf %235, %241 : vector<2x32xf32>
    %c14_101 = arith.constant 14 : index
    %c0_102 = arith.constant 0 : index
    %243 = vector.load %arg17[%c14_101, %c0_102] : memref<16x128xf32, #tpu.memory_space<vmem>>, vector<2x32xf32>
    tpu.vector_store %arg17[%c14_101, %c0_102], %242 {strides = array<i32>} : memref<16x128xf32, #tpu.memory_space<vmem>>, vector<2x32xf32>,
    %c0_103 = arith.constant 0 : index
    %c0_104 = arith.constant 0 : index
    %244 = vector.load %arg17[%c0_103, %c0_104] : memref<16x128xf32, #tpu.memory_space<vmem>>, vector<16x128xf32>
    %c0_105 = arith.constant 0 : index
    %c0_106 = arith.constant 0 : index
    %245 = vector.load %arg4[%c0_105, %c0_106] : memref<128x512xf32, #tpu.memory_space<vmem>>, vector<128x512xf32>
    %c0_107 = arith.constant 0 : index
    %c0_108 = arith.constant 0 : index
    %246 = vector.load %arg5[%c0_107, %c0_108] : memref<16x512xf32, #tpu.memory_space<vmem>>, vector<16x512xf32>
    %c0_109 = arith.constant 0 : index
    %c0_110 = arith.constant 0 : index
    %247 = vector.load %arg6[%c0_109, %c0_110] : memref<1x512xf32, #tpu.memory_space<vmem>>, vector<1x512xf32>
    %cst_111 = arith.constant dense<0.000000e+00> : vector<16x512xf32>
    %248 = tpu.matmul %244, %245, %cst_111 {dimension_numbers = #tpu.dot_dimension_numbers<[1], [0], [0], [1], [0, 0, 1, 1], [], []>} : vector<16x128xf32>, vector<128x512xf32>, vector<16x512xf32> -> vector<16x512xf32>
    %249 = vector.broadcast %247 : vector<1x512xf32> to vector<16x512xf32>
    %250 = arith.addf %248, %249 : vector<16x512xf32>
    %c0_112 = arith.constant 0 : index
    %c0_113 = arith.constant 0 : index
    %251 = vector.load %arg16[%c0_112, %c0_113] : memref<16x512xf32, #tpu.memory_space<vmem>>, vector<16x512xf32>
    tpu.vector_store %arg16[%c0_112, %c0_113], %250 {strides = array<i32>} : memref<16x512xf32, #tpu.memory_space<vmem>>, vector<16x512xf32>,
    %cst_114 = arith.constant 0.000000e+00 : f32
    %252 = vector.broadcast %cst_114 : f32 to vector<2x16xf32>
    %cst_115 = arith.constant 0.000000e+00 : f32
    %253 = vector.broadcast %cst_115 : f32 to vector<2x16xf32>
    %c0_116 = arith.constant 0 : index
    %c0_117 = arith.constant 0 : index
    %254 = vector.load %arg16[%c0_116, %c0_117] : memref<16x512xf32, #tpu.memory_space<vmem>>, vector<2x512xf32>
    %cst_118 = arith.constant dense<0.000000e+00> : vector<2x512xf32>
    %255 = tpu.matmul %252, %246, %cst_118 {dimension_numbers = #tpu.dot_dimension_numbers<[1], [0], [0], [1], [0, 0, 1, 1], [], []>} : vector<2x16xf32>, vector<16x512xf32>, vector<2x512xf32> -> vector<2x512xf32>
    %256 = arith.addf %254, %255 : vector<2x512xf32>
    %cst_119 = arith.constant 5.000000e-01 : f32
    %257 = vector.broadcast %cst_119 : f32 to vector<2x512xf32>
    %258 = arith.mulf %257, %256 : vector<2x512xf32>
    %259 = math.tanh %258 : vector<2x512xf32>
    %260 = vector.extract_strided_slice %259 {offsets = [0, 0], sizes = [2, 16], strides = [1, 1]} : vector<2x512xf32> to vector<2x16xf32>
    %cst_120 = arith.constant 1.000000e+00 : f32
    %261 = vector.broadcast %cst_120 : f32 to vector<2x16xf32>
    %262 = arith.addf %260, %261 : vector<2x16xf32>
    %cst_121 = arith.constant 5.000000e-01 : f32
    %263 = vector.broadcast %cst_121 : f32 to vector<2x16xf32>
    %264 = arith.mulf %263, %262 : vector<2x16xf32>
    %265 = vector.extract_strided_slice %259 {offsets = [0, 128], sizes = [2, 16], strides = [1, 1]} : vector<2x512xf32> to vector<2x16xf32>
    %cst_122 = arith.constant 1.000000e+00 : f32
    %266 = vector.broadcast %cst_122 : f32 to vector<2x16xf32>
    %267 = arith.addf %265, %266 : vector<2x16xf32>
    %cst_123 = arith.constant 5.000000e-01 : f32
    %268 = vector.broadcast %cst_123 : f32 to vector<2x16xf32>
    %269 = arith.mulf %268, %267 : vector<2x16xf32>
    %270 = vector.extract_strided_slice %259 {offsets = [0, 384], sizes = [2, 16], strides = [1, 1]} : vector<2x512xf32> to vector<2x16xf32>
    %cst_124 = arith.constant 1.000000e+00 : f32
    %271 = vector.broadcast %cst_124 : f32 to vector<2x16xf32>
    %272 = arith.addf %270, %271 : vector<2x16xf32>
    %cst_125 = arith.constant 5.000000e-01 : f32
    %273 = vector.broadcast %cst_125 : f32 to vector<2x16xf32>
    %274 = arith.mulf %273, %272 : vector<2x16xf32>
    %275 = vector.extract_strided_slice %256 {offsets = [0, 256], sizes = [2, 16], strides = [1, 1]} : vector<2x512xf32> to vector<2x16xf32>
    %276 = math.tanh %275 : vector<2x16xf32>
    %277 = arith.mulf %269, %253 : vector<2x16xf32>
    %278 = arith.mulf %264, %276 : vector<2x16xf32>
    %279 = arith.addf %277, %278 : vector<2x16xf32>
    %280 = math.tanh %279 : vector<2x16xf32>
    %281 = arith.mulf %274, %280 : vector<2x16xf32>
    %c0_126 = arith.constant 0 : index
    %c0_127 = arith.constant 0 : index
    %282 = vector.load %arg17[%c0_126, %c0_127] : memref<16x128xf32, #tpu.memory_space<vmem>>, vector<2x16xf32>
    tpu.vector_store %arg17[%c0_126, %c0_127], %281 {strides = array<i32>} : memref<16x128xf32, #tpu.memory_space<vmem>>, vector<2x16xf32>,
    %c2_128 = arith.constant 2 : index
    %c0_129 = arith.constant 0 : index
    %283 = vector.load %arg16[%c2_128, %c0_129] : memref<16x512xf32, #tpu.memory_space<vmem>>, vector<2x512xf32>
    %cst_130 = arith.constant dense<0.000000e+00> : vector<2x512xf32>
    %284 = tpu.matmul %281, %246, %cst_130 {dimension_numbers = #tpu.dot_dimension_numbers<[1], [0], [0], [1], [0, 0, 1, 1], [], []>} : vector<2x16xf32>, vector<16x512xf32>, vector<2x512xf32> -> vector<2x512xf32>
    %285 = arith.addf %283, %284 : vector<2x512xf32>
    %cst_131 = arith.constant 5.000000e-01 : f32
    %286 = vector.broadcast %cst_131 : f32 to vector<2x512xf32>
    %287 = arith.mulf %286, %285 : vector<2x512xf32>
    %288 = math.tanh %287 : vector<2x512xf32>
    %289 = vector.extract_strided_slice %288 {offsets = [0, 0], sizes = [2, 16], strides = [1, 1]} : vector<2x512xf32> to vector<2x16xf32>
    %cst_132 = arith.constant 1.000000e+00 : f32
    %290 = vector.broadcast %cst_132 : f32 to vector<2x16xf32>
    %291 = arith.addf %289, %290 : vector<2x16xf32>
    %cst_133 = arith.constant 5.000000e-01 : f32
    %292 = vector.broadcast %cst_133 : f32 to vector<2x16xf32>
    %293 = arith.mulf %292, %291 : vector<2x16xf32>
    %294 = vector.extract_strided_slice %288 {offsets = [0, 128], sizes = [2, 16], strides = [1, 1]} : vector<2x512xf32> to vector<2x16xf32>
    %cst_134 = arith.constant 1.000000e+00 : f32
    %295 = vector.broadcast %cst_134 : f32 to vector<2x16xf32>
    %296 = arith.addf %294, %295 : vector<2x16xf32>
    %cst_135 = arith.constant 5.000000e-01 : f32
    %297 = vector.broadcast %cst_135 : f32 to vector<2x16xf32>
    %298 = arith.mulf %297, %296 : vector<2x16xf32>
    %299 = vector.extract_strided_slice %288 {offsets = [0, 384], sizes = [2, 16], strides = [1, 1]} : vector<2x512xf32> to vector<2x16xf32>
    %cst_136 = arith.constant 1.000000e+00 : f32
    %300 = vector.broadcast %cst_136 : f32 to vector<2x16xf32>
    %301 = arith.addf %299, %300 : vector<2x16xf32>
    %cst_137 = arith.constant 5.000000e-01 : f32
    %302 = vector.broadcast %cst_137 : f32 to vector<2x16xf32>
    %303 = arith.mulf %302, %301 : vector<2x16xf32>
    %304 = vector.extract_strided_slice %285 {offsets = [0, 256], sizes = [2, 16], strides = [1, 1]} : vector<2x512xf32> to vector<2x16xf32>
    %305 = math.tanh %304 : vector<2x16xf32>
    %306 = arith.mulf %298, %279 : vector<2x16xf32>
    %307 = arith.mulf %293, %305 : vector<2x16xf32>
    %308 = arith.addf %306, %307 : vector<2x16xf32>
    %309 = math.tanh %308 : vector<2x16xf32>
    %310 = arith.mulf %303, %309 : vector<2x16xf32>
    %c2_138 = arith.constant 2 : index
    %c0_139 = arith.constant 0 : index
    %311 = vector.load %arg17[%c2_138, %c0_139] : memref<16x128xf32, #tpu.memory_space<vmem>>, vector<2x16xf32>
    tpu.vector_store %arg17[%c2_138, %c0_139], %310 {strides = array<i32>} : memref<16x128xf32, #tpu.memory_space<vmem>>, vector<2x16xf32>,
    %c4_140 = arith.constant 4 : index
    %c0_141 = arith.constant 0 : index
    %312 = vector.load %arg16[%c4_140, %c0_141] : memref<16x512xf32, #tpu.memory_space<vmem>>, vector<2x512xf32>
    %cst_142 = arith.constant dense<0.000000e+00> : vector<2x512xf32>
    %313 = tpu.matmul %310, %246, %cst_142 {dimension_numbers = #tpu.dot_dimension_numbers<[1], [0], [0], [1], [0, 0, 1, 1], [], []>} : vector<2x16xf32>, vector<16x512xf32>, vector<2x512xf32> -> vector<2x512xf32>
    %314 = arith.addf %312, %313 : vector<2x512xf32>
    %cst_143 = arith.constant 5.000000e-01 : f32
    %315 = vector.broadcast %cst_143 : f32 to vector<2x512xf32>
    %316 = arith.mulf %315, %314 : vector<2x512xf32>
    %317 = math.tanh %316 : vector<2x512xf32>
    %318 = vector.extract_strided_slice %317 {offsets = [0, 0], sizes = [2, 16], strides = [1, 1]} : vector<2x512xf32> to vector<2x16xf32>
    %cst_144 = arith.constant 1.000000e+00 : f32
    %319 = vector.broadcast %cst_144 : f32 to vector<2x16xf32>
    %320 = arith.addf %318, %319 : vector<2x16xf32>
    %cst_145 = arith.constant 5.000000e-01 : f32
    %321 = vector.broadcast %cst_145 : f32 to vector<2x16xf32>
    %322 = arith.mulf %321, %320 : vector<2x16xf32>
    %323 = vector.extract_strided_slice %317 {offsets = [0, 128], sizes = [2, 16], strides = [1, 1]} : vector<2x512xf32> to vector<2x16xf32>
    %cst_146 = arith.constant 1.000000e+00 : f32
    %324 = vector.broadcast %cst_146 : f32 to vector<2x16xf32>
    %325 = arith.addf %323, %324 : vector<2x16xf32>
    %cst_147 = arith.constant 5.000000e-01 : f32
    %326 = vector.broadcast %cst_147 : f32 to vector<2x16xf32>
    %327 = arith.mulf %326, %325 : vector<2x16xf32>
    %328 = vector.extract_strided_slice %317 {offsets = [0, 384], sizes = [2, 16], strides = [1, 1]} : vector<2x512xf32> to vector<2x16xf32>
    %cst_148 = arith.constant 1.000000e+00 : f32
    %329 = vector.broadcast %cst_148 : f32 to vector<2x16xf32>
    %330 = arith.addf %328, %329 : vector<2x16xf32>
    %cst_149 = arith.constant 5.000000e-01 : f32
    %331 = vector.broadcast %cst_149 : f32 to vector<2x16xf32>
    %332 = arith.mulf %331, %330 : vector<2x16xf32>
    %333 = vector.extract_strided_slice %314 {offsets = [0, 256], sizes = [2, 16], strides = [1, 1]} : vector<2x512xf32> to vector<2x16xf32>
    %334 = math.tanh %333 : vector<2x16xf32>
    %335 = arith.mulf %327, %308 : vector<2x16xf32>
    %336 = arith.mulf %322, %334 : vector<2x16xf32>
    %337 = arith.addf %335, %336 : vector<2x16xf32>
    %338 = math.tanh %337 : vector<2x16xf32>
    %339 = arith.mulf %332, %338 : vector<2x16xf32>
    %c4_150 = arith.constant 4 : index
    %c0_151 = arith.constant 0 : index
    %340 = vector.load %arg17[%c4_150, %c0_151] : memref<16x128xf32, #tpu.memory_space<vmem>>, vector<2x16xf32>
    tpu.vector_store %arg17[%c4_150, %c0_151], %339 {strides = array<i32>} : memref<16x128xf32, #tpu.memory_space<vmem>>, vector<2x16xf32>,
    %c6_152 = arith.constant 6 : index
    %c0_153 = arith.constant 0 : index
    %341 = vector.load %arg16[%c6_152, %c0_153] : memref<16x512xf32, #tpu.memory_space<vmem>>, vector<2x512xf32>
    %cst_154 = arith.constant dense<0.000000e+00> : vector<2x512xf32>
    %342 = tpu.matmul %339, %246, %cst_154 {dimension_numbers = #tpu.dot_dimension_numbers<[1], [0], [0], [1], [0, 0, 1, 1], [], []>} : vector<2x16xf32>, vector<16x512xf32>, vector<2x512xf32> -> vector<2x512xf32>
    %343 = arith.addf %341, %342 : vector<2x512xf32>
    %cst_155 = arith.constant 5.000000e-01 : f32
    %344 = vector.broadcast %cst_155 : f32 to vector<2x512xf32>
    %345 = arith.mulf %344, %343 : vector<2x512xf32>
    %346 = math.tanh %345 : vector<2x512xf32>
    %347 = vector.extract_strided_slice %346 {offsets = [0, 0], sizes = [2, 16], strides = [1, 1]} : vector<2x512xf32> to vector<2x16xf32>
    %cst_156 = arith.constant 1.000000e+00 : f32
    %348 = vector.broadcast %cst_156 : f32 to vector<2x16xf32>
    %349 = arith.addf %347, %348 : vector<2x16xf32>
    %cst_157 = arith.constant 5.000000e-01 : f32
    %350 = vector.broadcast %cst_157 : f32 to vector<2x16xf32>
    %351 = arith.mulf %350, %349 : vector<2x16xf32>
    %352 = vector.extract_strided_slice %346 {offsets = [0, 128], sizes = [2, 16], strides = [1, 1]} : vector<2x512xf32> to vector<2x16xf32>
    %cst_158 = arith.constant 1.000000e+00 : f32
    %353 = vector.broadcast %cst_158 : f32 to vector<2x16xf32>
    %354 = arith.addf %352, %353 : vector<2x16xf32>
    %cst_159 = arith.constant 5.000000e-01 : f32
    %355 = vector.broadcast %cst_159 : f32 to vector<2x16xf32>
    %356 = arith.mulf %355, %354 : vector<2x16xf32>
    %357 = vector.extract_strided_slice %346 {offsets = [0, 384], sizes = [2, 16], strides = [1, 1]} : vector<2x512xf32> to vector<2x16xf32>
    %cst_160 = arith.constant 1.000000e+00 : f32
    %358 = vector.broadcast %cst_160 : f32 to vector<2x16xf32>
    %359 = arith.addf %357, %358 : vector<2x16xf32>
    %cst_161 = arith.constant 5.000000e-01 : f32
    %360 = vector.broadcast %cst_161 : f32 to vector<2x16xf32>
    %361 = arith.mulf %360, %359 : vector<2x16xf32>
    %362 = vector.extract_strided_slice %343 {offsets = [0, 256], sizes = [2, 16], strides = [1, 1]} : vector<2x512xf32> to vector<2x16xf32>
    %363 = math.tanh %362 : vector<2x16xf32>
    %364 = arith.mulf %356, %337 : vector<2x16xf32>
    %365 = arith.mulf %351, %363 : vector<2x16xf32>
    %366 = arith.addf %364, %365 : vector<2x16xf32>
    %367 = math.tanh %366 : vector<2x16xf32>
    %368 = arith.mulf %361, %367 : vector<2x16xf32>
    %c6_162 = arith.constant 6 : index
    %c0_163 = arith.constant 0 : index
    %369 = vector.load %arg17[%c6_162, %c0_163] : memref<16x128xf32, #tpu.memory_space<vmem>>, vector<2x16xf32>
    tpu.vector_store %arg17[%c6_162, %c0_163], %368 {strides = array<i32>} : memref<16x128xf32, #tpu.memory_space<vmem>>, vector<2x16xf32>,
    %c8_164 = arith.constant 8 : index
    %c0_165 = arith.constant 0 : index
    %370 = vector.load %arg16[%c8_164, %c0_165] : memref<16x512xf32, #tpu.memory_space<vmem>>, vector<2x512xf32>
    %cst_166 = arith.constant dense<0.000000e+00> : vector<2x512xf32>
    %371 = tpu.matmul %368, %246, %cst_166 {dimension_numbers = #tpu.dot_dimension_numbers<[1], [0], [0], [1], [0, 0, 1, 1], [], []>} : vector<2x16xf32>, vector<16x512xf32>, vector<2x512xf32> -> vector<2x512xf32>
    %372 = arith.addf %370, %371 : vector<2x512xf32>
    %cst_167 = arith.constant 5.000000e-01 : f32
    %373 = vector.broadcast %cst_167 : f32 to vector<2x512xf32>
    %374 = arith.mulf %373, %372 : vector<2x512xf32>
    %375 = math.tanh %374 : vector<2x512xf32>
    %376 = vector.extract_strided_slice %375 {offsets = [0, 0], sizes = [2, 16], strides = [1, 1]} : vector<2x512xf32> to vector<2x16xf32>
    %cst_168 = arith.constant 1.000000e+00 : f32
    %377 = vector.broadcast %cst_168 : f32 to vector<2x16xf32>
    %378 = arith.addf %376, %377 : vector<2x16xf32>
    %cst_169 = arith.constant 5.000000e-01 : f32
    %379 = vector.broadcast %cst_169 : f32 to vector<2x16xf32>
    %380 = arith.mulf %379, %378 : vector<2x16xf32>
    %381 = vector.extract_strided_slice %375 {offsets = [0, 128], sizes = [2, 16], strides = [1, 1]} : vector<2x512xf32> to vector<2x16xf32>
    %cst_170 = arith.constant 1.000000e+00 : f32
    %382 = vector.broadcast %cst_170 : f32 to vector<2x16xf32>
    %383 = arith.addf %381, %382 : vector<2x16xf32>
    %cst_171 = arith.constant 5.000000e-01 : f32
    %384 = vector.broadcast %cst_171 : f32 to vector<2x16xf32>
    %385 = arith.mulf %384, %383 : vector<2x16xf32>
    %386 = vector.extract_strided_slice %375 {offsets = [0, 384], sizes = [2, 16], strides = [1, 1]} : vector<2x512xf32> to vector<2x16xf32>
    %cst_172 = arith.constant 1.000000e+00 : f32
    %387 = vector.broadcast %cst_172 : f32 to vector<2x16xf32>
    %388 = arith.addf %386, %387 : vector<2x16xf32>
    %cst_173 = arith.constant 5.000000e-01 : f32
    %389 = vector.broadcast %cst_173 : f32 to vector<2x16xf32>
    %390 = arith.mulf %389, %388 : vector<2x16xf32>
    %391 = vector.extract_strided_slice %372 {offsets = [0, 256], sizes = [2, 16], strides = [1, 1]} : vector<2x512xf32> to vector<2x16xf32>
    %392 = math.tanh %391 : vector<2x16xf32>
    %393 = arith.mulf %385, %366 : vector<2x16xf32>
    %394 = arith.mulf %380, %392 : vector<2x16xf32>
    %395 = arith.addf %393, %394 : vector<2x16xf32>
    %396 = math.tanh %395 : vector<2x16xf32>
    %397 = arith.mulf %390, %396 : vector<2x16xf32>
    %c8_174 = arith.constant 8 : index
    %c0_175 = arith.constant 0 : index
    %398 = vector.load %arg17[%c8_174, %c0_175] : memref<16x128xf32, #tpu.memory_space<vmem>>, vector<2x16xf32>
    tpu.vector_store %arg17[%c8_174, %c0_175], %397 {strides = array<i32>} : memref<16x128xf32, #tpu.memory_space<vmem>>, vector<2x16xf32>,
    %c10_176 = arith.constant 10 : index
    %c0_177 = arith.constant 0 : index
    %399 = vector.load %arg16[%c10_176, %c0_177] : memref<16x512xf32, #tpu.memory_space<vmem>>, vector<2x512xf32>
    %cst_178 = arith.constant dense<0.000000e+00> : vector<2x512xf32>
    %400 = tpu.matmul %397, %246, %cst_178 {dimension_numbers = #tpu.dot_dimension_numbers<[1], [0], [0], [1], [0, 0, 1, 1], [], []>} : vector<2x16xf32>, vector<16x512xf32>, vector<2x512xf32> -> vector<2x512xf32>
    %401 = arith.addf %399, %400 : vector<2x512xf32>
    %cst_179 = arith.constant 5.000000e-01 : f32
    %402 = vector.broadcast %cst_179 : f32 to vector<2x512xf32>
    %403 = arith.mulf %402, %401 : vector<2x512xf32>
    %404 = math.tanh %403 : vector<2x512xf32>
    %405 = vector.extract_strided_slice %404 {offsets = [0, 0], sizes = [2, 16], strides = [1, 1]} : vector<2x512xf32> to vector<2x16xf32>
    %cst_180 = arith.constant 1.000000e+00 : f32
    %406 = vector.broadcast %cst_180 : f32 to vector<2x16xf32>
    %407 = arith.addf %405, %406 : vector<2x16xf32>
    %cst_181 = arith.constant 5.000000e-01 : f32
    %408 = vector.broadcast %cst_181 : f32 to vector<2x16xf32>
    %409 = arith.mulf %408, %407 : vector<2x16xf32>
    %410 = vector.extract_strided_slice %404 {offsets = [0, 128], sizes = [2, 16], strides = [1, 1]} : vector<2x512xf32> to vector<2x16xf32>
    %cst_182 = arith.constant 1.000000e+00 : f32
    %411 = vector.broadcast %cst_182 : f32 to vector<2x16xf32>
    %412 = arith.addf %410, %411 : vector<2x16xf32>
    %cst_183 = arith.constant 5.000000e-01 : f32
    %413 = vector.broadcast %cst_183 : f32 to vector<2x16xf32>
    %414 = arith.mulf %413, %412 : vector<2x16xf32>
    %415 = vector.extract_strided_slice %404 {offsets = [0, 384], sizes = [2, 16], strides = [1, 1]} : vector<2x512xf32> to vector<2x16xf32>
    %cst_184 = arith.constant 1.000000e+00 : f32
    %416 = vector.broadcast %cst_184 : f32 to vector<2x16xf32>
    %417 = arith.addf %415, %416 : vector<2x16xf32>
    %cst_185 = arith.constant 5.000000e-01 : f32
    %418 = vector.broadcast %cst_185 : f32 to vector<2x16xf32>
    %419 = arith.mulf %418, %417 : vector<2x16xf32>
    %420 = vector.extract_strided_slice %401 {offsets = [0, 256], sizes = [2, 16], strides = [1, 1]} : vector<2x512xf32> to vector<2x16xf32>
    %421 = math.tanh %420 : vector<2x16xf32>
    %422 = arith.mulf %414, %395 : vector<2x16xf32>
    %423 = arith.mulf %409, %421 : vector<2x16xf32>
    %424 = arith.addf %422, %423 : vector<2x16xf32>
    %425 = math.tanh %424 : vector<2x16xf32>
    %426 = arith.mulf %419, %425 : vector<2x16xf32>
    %c10_186 = arith.constant 10 : index
    %c0_187 = arith.constant 0 : index
    %427 = vector.load %arg17[%c10_186, %c0_187] : memref<16x128xf32, #tpu.memory_space<vmem>>, vector<2x16xf32>
    tpu.vector_store %arg17[%c10_186, %c0_187], %426 {strides = array<i32>} : memref<16x128xf32, #tpu.memory_space<vmem>>, vector<2x16xf32>,
    %c12_188 = arith.constant 12 : index
    %c0_189 = arith.constant 0 : index
    %428 = vector.load %arg16[%c12_188, %c0_189] : memref<16x512xf32, #tpu.memory_space<vmem>>, vector<2x512xf32>
    %cst_190 = arith.constant dense<0.000000e+00> : vector<2x512xf32>
    %429 = tpu.matmul %426, %246, %cst_190 {dimension_numbers = #tpu.dot_dimension_numbers<[1], [0], [0], [1], [0, 0, 1, 1], [], []>} : vector<2x16xf32>, vector<16x512xf32>, vector<2x512xf32> -> vector<2x512xf32>
    %430 = arith.addf %428, %429 : vector<2x512xf32>
    %cst_191 = arith.constant 5.000000e-01 : f32
    %431 = vector.broadcast %cst_191 : f32 to vector<2x512xf32>
    %432 = arith.mulf %431, %430 : vector<2x512xf32>
    %433 = math.tanh %432 : vector<2x512xf32>
    %434 = vector.extract_strided_slice %433 {offsets = [0, 0], sizes = [2, 16], strides = [1, 1]} : vector<2x512xf32> to vector<2x16xf32>
    %cst_192 = arith.constant 1.000000e+00 : f32
    %435 = vector.broadcast %cst_192 : f32 to vector<2x16xf32>
    %436 = arith.addf %434, %435 : vector<2x16xf32>
    %cst_193 = arith.constant 5.000000e-01 : f32
    %437 = vector.broadcast %cst_193 : f32 to vector<2x16xf32>
    %438 = arith.mulf %437, %436 : vector<2x16xf32>
    %439 = vector.extract_strided_slice %433 {offsets = [0, 128], sizes = [2, 16], strides = [1, 1]} : vector<2x512xf32> to vector<2x16xf32>
    %cst_194 = arith.constant 1.000000e+00 : f32
    %440 = vector.broadcast %cst_194 : f32 to vector<2x16xf32>
    %441 = arith.addf %439, %440 : vector<2x16xf32>
    %cst_195 = arith.constant 5.000000e-01 : f32
    %442 = vector.broadcast %cst_195 : f32 to vector<2x16xf32>
    %443 = arith.mulf %442, %441 : vector<2x16xf32>
    %444 = vector.extract_strided_slice %433 {offsets = [0, 384], sizes = [2, 16], strides = [1, 1]} : vector<2x512xf32> to vector<2x16xf32>
    %cst_196 = arith.constant 1.000000e+00 : f32
    %445 = vector.broadcast %cst_196 : f32 to vector<2x16xf32>
    %446 = arith.addf %444, %445 : vector<2x16xf32>
    %cst_197 = arith.constant 5.000000e-01 : f32
    %447 = vector.broadcast %cst_197 : f32 to vector<2x16xf32>
    %448 = arith.mulf %447, %446 : vector<2x16xf32>
    %449 = vector.extract_strided_slice %430 {offsets = [0, 256], sizes = [2, 16], strides = [1, 1]} : vector<2x512xf32> to vector<2x16xf32>
    %450 = math.tanh %449 : vector<2x16xf32>
    %451 = arith.mulf %443, %424 : vector<2x16xf32>
    %452 = arith.mulf %438, %450 : vector<2x16xf32>
    %453 = arith.addf %451, %452 : vector<2x16xf32>
    %454 = math.tanh %453 : vector<2x16xf32>
    %455 = arith.mulf %448, %454 : vector<2x16xf32>
    %c12_198 = arith.constant 12 : index
    %c0_199 = arith.constant 0 : index
    %456 = vector.load %arg17[%c12_198, %c0_199] : memref<16x128xf32, #tpu.memory_space<vmem>>, vector<2x16xf32>
    tpu.vector_store %arg17[%c12_198, %c0_199], %455 {strides = array<i32>} : memref<16x128xf32, #tpu.memory_space<vmem>>, vector<2x16xf32>,
    %c14_200 = arith.constant 14 : index
    %c0_201 = arith.constant 0 : index
    %457 = vector.load %arg16[%c14_200, %c0_201] : memref<16x512xf32, #tpu.memory_space<vmem>>, vector<2x512xf32>
    %cst_202 = arith.constant dense<0.000000e+00> : vector<2x512xf32>
    %458 = tpu.matmul %455, %246, %cst_202 {dimension_numbers = #tpu.dot_dimension_numbers<[1], [0], [0], [1], [0, 0, 1, 1], [], []>} : vector<2x16xf32>, vector<16x512xf32>, vector<2x512xf32> -> vector<2x512xf32>
    %459 = arith.addf %457, %458 : vector<2x512xf32>
    %cst_203 = arith.constant 5.000000e-01 : f32
    %460 = vector.broadcast %cst_203 : f32 to vector<2x512xf32>
    %461 = arith.mulf %460, %459 : vector<2x512xf32>
    %462 = math.tanh %461 : vector<2x512xf32>
    %463 = vector.extract_strided_slice %462 {offsets = [0, 0], sizes = [2, 16], strides = [1, 1]} : vector<2x512xf32> to vector<2x16xf32>
    %cst_204 = arith.constant 1.000000e+00 : f32
    %464 = vector.broadcast %cst_204 : f32 to vector<2x16xf32>
    %465 = arith.addf %463, %464 : vector<2x16xf32>
    %cst_205 = arith.constant 5.000000e-01 : f32
    %466 = vector.broadcast %cst_205 : f32 to vector<2x16xf32>
    %467 = arith.mulf %466, %465 : vector<2x16xf32>
    %468 = vector.extract_strided_slice %462 {offsets = [0, 128], sizes = [2, 16], strides = [1, 1]} : vector<2x512xf32> to vector<2x16xf32>
    %cst_206 = arith.constant 1.000000e+00 : f32
    %469 = vector.broadcast %cst_206 : f32 to vector<2x16xf32>
    %470 = arith.addf %468, %469 : vector<2x16xf32>
    %cst_207 = arith.constant 5.000000e-01 : f32
    %471 = vector.broadcast %cst_207 : f32 to vector<2x16xf32>
    %472 = arith.mulf %471, %470 : vector<2x16xf32>
    %473 = vector.extract_strided_slice %462 {offsets = [0, 384], sizes = [2, 16], strides = [1, 1]} : vector<2x512xf32> to vector<2x16xf32>
    %cst_208 = arith.constant 1.000000e+00 : f32
    %474 = vector.broadcast %cst_208 : f32 to vector<2x16xf32>
    %475 = arith.addf %473, %474 : vector<2x16xf32>
    %cst_209 = arith.constant 5.000000e-01 : f32
    %476 = vector.broadcast %cst_209 : f32 to vector<2x16xf32>
    %477 = arith.mulf %476, %475 : vector<2x16xf32>
    %478 = vector.extract_strided_slice %459 {offsets = [0, 256], sizes = [2, 16], strides = [1, 1]} : vector<2x512xf32> to vector<2x16xf32>
    %479 = math.tanh %478 : vector<2x16xf32>
    %480 = arith.mulf %472, %453 : vector<2x16xf32>
    %481 = arith.mulf %467, %479 : vector<2x16xf32>
    %482 = arith.addf %480, %481 : vector<2x16xf32>
    %483 = math.tanh %482 : vector<2x16xf32>
    %484 = arith.mulf %477, %483 : vector<2x16xf32>
    %c14_210 = arith.constant 14 : index
    %c0_211 = arith.constant 0 : index
    %485 = vector.load %arg17[%c14_210, %c0_211] : memref<16x128xf32, #tpu.memory_space<vmem>>, vector<2x16xf32>
    tpu.vector_store %arg17[%c14_210, %c0_211], %484 {strides = array<i32>} : memref<16x128xf32, #tpu.memory_space<vmem>>, vector<2x16xf32>,
    %c0_212 = arith.constant 0 : index
    %c0_213 = arith.constant 0 : index
    %486 = vector.load %arg17[%c0_212, %c0_213] : memref<16x128xf32, #tpu.memory_space<vmem>>, vector<16x128xf32>
    %c0_214 = arith.constant 0 : index
    %c0_215 = arith.constant 0 : index
    %487 = vector.load %arg7[%c0_214, %c0_215] : memref<128x512xf32, #tpu.memory_space<vmem>>, vector<128x512xf32>
    %c0_216 = arith.constant 0 : index
    %c0_217 = arith.constant 0 : index
    %488 = vector.load %arg8[%c0_216, %c0_217] : memref<16x512xf32, #tpu.memory_space<vmem>>, vector<16x512xf32>
    %c0_218 = arith.constant 0 : index
    %c0_219 = arith.constant 0 : index
    %489 = vector.load %arg9[%c0_218, %c0_219] : memref<1x512xf32, #tpu.memory_space<vmem>>, vector<1x512xf32>
    %cst_220 = arith.constant dense<0.000000e+00> : vector<16x512xf32>
    %490 = tpu.matmul %486, %487, %cst_220 {dimension_numbers = #tpu.dot_dimension_numbers<[1], [0], [0], [1], [0, 0, 1, 1], [], []>} : vector<16x128xf32>, vector<128x512xf32>, vector<16x512xf32> -> vector<16x512xf32>
    %491 = vector.broadcast %489 : vector<1x512xf32> to vector<16x512xf32>
    %492 = arith.addf %490, %491 : vector<16x512xf32>
    %c0_221 = arith.constant 0 : index
    %c0_222 = arith.constant 0 : index
    %493 = vector.load %arg16[%c0_221, %c0_222] : memref<16x512xf32, #tpu.memory_space<vmem>>, vector<16x512xf32>
    tpu.vector_store %arg16[%c0_221, %c0_222], %492 {strides = array<i32>} : memref<16x512xf32, #tpu.memory_space<vmem>>, vector<16x512xf32>,
    %cst_223 = arith.constant 0.000000e+00 : f32
    %494 = vector.broadcast %cst_223 : f32 to vector<2x16xf32>
    %cst_224 = arith.constant 0.000000e+00 : f32
    %495 = vector.broadcast %cst_224 : f32 to vector<2x16xf32>
    %c0_225 = arith.constant 0 : index
    %c0_226 = arith.constant 0 : index
    %496 = vector.load %arg16[%c0_225, %c0_226] : memref<16x512xf32, #tpu.memory_space<vmem>>, vector<2x512xf32>
    %cst_227 = arith.constant dense<0.000000e+00> : vector<2x512xf32>
    %497 = tpu.matmul %494, %488, %cst_227 {dimension_numbers = #tpu.dot_dimension_numbers<[1], [0], [0], [1], [0, 0, 1, 1], [], []>} : vector<2x16xf32>, vector<16x512xf32>, vector<2x512xf32> -> vector<2x512xf32>
    %498 = arith.addf %496, %497 : vector<2x512xf32>
    %cst_228 = arith.constant 5.000000e-01 : f32
    %499 = vector.broadcast %cst_228 : f32 to vector<2x512xf32>
    %500 = arith.mulf %499, %498 : vector<2x512xf32>
    %501 = math.tanh %500 : vector<2x512xf32>
    %502 = vector.extract_strided_slice %501 {offsets = [0, 0], sizes = [2, 16], strides = [1, 1]} : vector<2x512xf32> to vector<2x16xf32>
    %cst_229 = arith.constant 1.000000e+00 : f32
    %503 = vector.broadcast %cst_229 : f32 to vector<2x16xf32>
    %504 = arith.addf %502, %503 : vector<2x16xf32>
    %cst_230 = arith.constant 5.000000e-01 : f32
    %505 = vector.broadcast %cst_230 : f32 to vector<2x16xf32>
    %506 = arith.mulf %505, %504 : vector<2x16xf32>
    %507 = vector.extract_strided_slice %501 {offsets = [0, 128], sizes = [2, 16], strides = [1, 1]} : vector<2x512xf32> to vector<2x16xf32>
    %cst_231 = arith.constant 1.000000e+00 : f32
    %508 = vector.broadcast %cst_231 : f32 to vector<2x16xf32>
    %509 = arith.addf %507, %508 : vector<2x16xf32>
    %cst_232 = arith.constant 5.000000e-01 : f32
    %510 = vector.broadcast %cst_232 : f32 to vector<2x16xf32>
    %511 = arith.mulf %510, %509 : vector<2x16xf32>
    %512 = vector.extract_strided_slice %501 {offsets = [0, 384], sizes = [2, 16], strides = [1, 1]} : vector<2x512xf32> to vector<2x16xf32>
    %cst_233 = arith.constant 1.000000e+00 : f32
    %513 = vector.broadcast %cst_233 : f32 to vector<2x16xf32>
    %514 = arith.addf %512, %513 : vector<2x16xf32>
    %cst_234 = arith.constant 5.000000e-01 : f32
    %515 = vector.broadcast %cst_234 : f32 to vector<2x16xf32>
    %516 = arith.mulf %515, %514 : vector<2x16xf32>
    %517 = vector.extract_strided_slice %498 {offsets = [0, 256], sizes = [2, 16], strides = [1, 1]} : vector<2x512xf32> to vector<2x16xf32>
    %518 = math.tanh %517 : vector<2x16xf32>
    %519 = arith.mulf %511, %495 : vector<2x16xf32>
    %520 = arith.mulf %506, %518 : vector<2x16xf32>
    %521 = arith.addf %519, %520 : vector<2x16xf32>
    %522 = math.tanh %521 : vector<2x16xf32>
    %523 = arith.mulf %516, %522 : vector<2x16xf32>
    %c0_235 = arith.constant 0 : index
    %c0_236 = arith.constant 0 : index
    %524 = vector.load %arg17[%c0_235, %c0_236] : memref<16x128xf32, #tpu.memory_space<vmem>>, vector<2x16xf32>
    tpu.vector_store %arg17[%c0_235, %c0_236], %523 {strides = array<i32>} : memref<16x128xf32, #tpu.memory_space<vmem>>, vector<2x16xf32>,
    %c2_237 = arith.constant 2 : index
    %c0_238 = arith.constant 0 : index
    %525 = vector.load %arg16[%c2_237, %c0_238] : memref<16x512xf32, #tpu.memory_space<vmem>>, vector<2x512xf32>
    %cst_239 = arith.constant dense<0.000000e+00> : vector<2x512xf32>
    %526 = tpu.matmul %523, %488, %cst_239 {dimension_numbers = #tpu.dot_dimension_numbers<[1], [0], [0], [1], [0, 0, 1, 1], [], []>} : vector<2x16xf32>, vector<16x512xf32>, vector<2x512xf32> -> vector<2x512xf32>
    %527 = arith.addf %525, %526 : vector<2x512xf32>
    %cst_240 = arith.constant 5.000000e-01 : f32
    %528 = vector.broadcast %cst_240 : f32 to vector<2x512xf32>
    %529 = arith.mulf %528, %527 : vector<2x512xf32>
    %530 = math.tanh %529 : vector<2x512xf32>
    %531 = vector.extract_strided_slice %530 {offsets = [0, 0], sizes = [2, 16], strides = [1, 1]} : vector<2x512xf32> to vector<2x16xf32>
    %cst_241 = arith.constant 1.000000e+00 : f32
    %532 = vector.broadcast %cst_241 : f32 to vector<2x16xf32>
    %533 = arith.addf %531, %532 : vector<2x16xf32>
    %cst_242 = arith.constant 5.000000e-01 : f32
    %534 = vector.broadcast %cst_242 : f32 to vector<2x16xf32>
    %535 = arith.mulf %534, %533 : vector<2x16xf32>
    %536 = vector.extract_strided_slice %530 {offsets = [0, 128], sizes = [2, 16], strides = [1, 1]} : vector<2x512xf32> to vector<2x16xf32>
    %cst_243 = arith.constant 1.000000e+00 : f32
    %537 = vector.broadcast %cst_243 : f32 to vector<2x16xf32>
    %538 = arith.addf %536, %537 : vector<2x16xf32>
    %cst_244 = arith.constant 5.000000e-01 : f32
    %539 = vector.broadcast %cst_244 : f32 to vector<2x16xf32>
    %540 = arith.mulf %539, %538 : vector<2x16xf32>
    %541 = vector.extract_strided_slice %530 {offsets = [0, 384], sizes = [2, 16], strides = [1, 1]} : vector<2x512xf32> to vector<2x16xf32>
    %cst_245 = arith.constant 1.000000e+00 : f32
    %542 = vector.broadcast %cst_245 : f32 to vector<2x16xf32>
    %543 = arith.addf %541, %542 : vector<2x16xf32>
    %cst_246 = arith.constant 5.000000e-01 : f32
    %544 = vector.broadcast %cst_246 : f32 to vector<2x16xf32>
    %545 = arith.mulf %544, %543 : vector<2x16xf32>
    %546 = vector.extract_strided_slice %527 {offsets = [0, 256], sizes = [2, 16], strides = [1, 1]} : vector<2x512xf32> to vector<2x16xf32>
    %547 = math.tanh %546 : vector<2x16xf32>
    %548 = arith.mulf %540, %521 : vector<2x16xf32>
    %549 = arith.mulf %535, %547 : vector<2x16xf32>
    %550 = arith.addf %548, %549 : vector<2x16xf32>
    %551 = math.tanh %550 : vector<2x16xf32>
    %552 = arith.mulf %545, %551 : vector<2x16xf32>
    %c2_247 = arith.constant 2 : index
    %c0_248 = arith.constant 0 : index
    %553 = vector.load %arg17[%c2_247, %c0_248] : memref<16x128xf32, #tpu.memory_space<vmem>>, vector<2x16xf32>
    tpu.vector_store %arg17[%c2_247, %c0_248], %552 {strides = array<i32>} : memref<16x128xf32, #tpu.memory_space<vmem>>, vector<2x16xf32>,
    %c4_249 = arith.constant 4 : index
    %c0_250 = arith.constant 0 : index
    %554 = vector.load %arg16[%c4_249, %c0_250] : memref<16x512xf32, #tpu.memory_space<vmem>>, vector<2x512xf32>
    %cst_251 = arith.constant dense<0.000000e+00> : vector<2x512xf32>
    %555 = tpu.matmul %552, %488, %cst_251 {dimension_numbers = #tpu.dot_dimension_numbers<[1], [0], [0], [1], [0, 0, 1, 1], [], []>} : vector<2x16xf32>, vector<16x512xf32>, vector<2x512xf32> -> vector<2x512xf32>
    %556 = arith.addf %554, %555 : vector<2x512xf32>
    %cst_252 = arith.constant 5.000000e-01 : f32
    %557 = vector.broadcast %cst_252 : f32 to vector<2x512xf32>
    %558 = arith.mulf %557, %556 : vector<2x512xf32>
    %559 = math.tanh %558 : vector<2x512xf32>
    %560 = vector.extract_strided_slice %559 {offsets = [0, 0], sizes = [2, 16], strides = [1, 1]} : vector<2x512xf32> to vector<2x16xf32>
    %cst_253 = arith.constant 1.000000e+00 : f32
    %561 = vector.broadcast %cst_253 : f32 to vector<2x16xf32>
    %562 = arith.addf %560, %561 : vector<2x16xf32>
    %cst_254 = arith.constant 5.000000e-01 : f32
    %563 = vector.broadcast %cst_254 : f32 to vector<2x16xf32>
    %564 = arith.mulf %563, %562 : vector<2x16xf32>
    %565 = vector.extract_strided_slice %559 {offsets = [0, 128], sizes = [2, 16], strides = [1, 1]} : vector<2x512xf32> to vector<2x16xf32>
    %cst_255 = arith.constant 1.000000e+00 : f32
    %566 = vector.broadcast %cst_255 : f32 to vector<2x16xf32>
    %567 = arith.addf %565, %566 : vector<2x16xf32>
    %cst_256 = arith.constant 5.000000e-01 : f32
    %568 = vector.broadcast %cst_256 : f32 to vector<2x16xf32>
    %569 = arith.mulf %568, %567 : vector<2x16xf32>
    %570 = vector.extract_strided_slice %559 {offsets = [0, 384], sizes = [2, 16], strides = [1, 1]} : vector<2x512xf32> to vector<2x16xf32>
    %cst_257 = arith.constant 1.000000e+00 : f32
    %571 = vector.broadcast %cst_257 : f32 to vector<2x16xf32>
    %572 = arith.addf %570, %571 : vector<2x16xf32>
    %cst_258 = arith.constant 5.000000e-01 : f32
    %573 = vector.broadcast %cst_258 : f32 to vector<2x16xf32>
    %574 = arith.mulf %573, %572 : vector<2x16xf32>
    %575 = vector.extract_strided_slice %556 {offsets = [0, 256], sizes = [2, 16], strides = [1, 1]} : vector<2x512xf32> to vector<2x16xf32>
    %576 = math.tanh %575 : vector<2x16xf32>
    %577 = arith.mulf %569, %550 : vector<2x16xf32>
    %578 = arith.mulf %564, %576 : vector<2x16xf32>
    %579 = arith.addf %577, %578 : vector<2x16xf32>
    %580 = math.tanh %579 : vector<2x16xf32>
    %581 = arith.mulf %574, %580 : vector<2x16xf32>
    %c4_259 = arith.constant 4 : index
    %c0_260 = arith.constant 0 : index
    %582 = vector.load %arg17[%c4_259, %c0_260] : memref<16x128xf32, #tpu.memory_space<vmem>>, vector<2x16xf32>
    tpu.vector_store %arg17[%c4_259, %c0_260], %581 {strides = array<i32>} : memref<16x128xf32, #tpu.memory_space<vmem>>, vector<2x16xf32>,
    %c6_261 = arith.constant 6 : index
    %c0_262 = arith.constant 0 : index
    %583 = vector.load %arg16[%c6_261, %c0_262] : memref<16x512xf32, #tpu.memory_space<vmem>>, vector<2x512xf32>
    %cst_263 = arith.constant dense<0.000000e+00> : vector<2x512xf32>
    %584 = tpu.matmul %581, %488, %cst_263 {dimension_numbers = #tpu.dot_dimension_numbers<[1], [0], [0], [1], [0, 0, 1, 1], [], []>} : vector<2x16xf32>, vector<16x512xf32>, vector<2x512xf32> -> vector<2x512xf32>
    %585 = arith.addf %583, %584 : vector<2x512xf32>
    %cst_264 = arith.constant 5.000000e-01 : f32
    %586 = vector.broadcast %cst_264 : f32 to vector<2x512xf32>
    %587 = arith.mulf %586, %585 : vector<2x512xf32>
    %588 = math.tanh %587 : vector<2x512xf32>
    %589 = vector.extract_strided_slice %588 {offsets = [0, 0], sizes = [2, 16], strides = [1, 1]} : vector<2x512xf32> to vector<2x16xf32>
    %cst_265 = arith.constant 1.000000e+00 : f32
    %590 = vector.broadcast %cst_265 : f32 to vector<2x16xf32>
    %591 = arith.addf %589, %590 : vector<2x16xf32>
    %cst_266 = arith.constant 5.000000e-01 : f32
    %592 = vector.broadcast %cst_266 : f32 to vector<2x16xf32>
    %593 = arith.mulf %592, %591 : vector<2x16xf32>
    %594 = vector.extract_strided_slice %588 {offsets = [0, 128], sizes = [2, 16], strides = [1, 1]} : vector<2x512xf32> to vector<2x16xf32>
    %cst_267 = arith.constant 1.000000e+00 : f32
    %595 = vector.broadcast %cst_267 : f32 to vector<2x16xf32>
    %596 = arith.addf %594, %595 : vector<2x16xf32>
    %cst_268 = arith.constant 5.000000e-01 : f32
    %597 = vector.broadcast %cst_268 : f32 to vector<2x16xf32>
    %598 = arith.mulf %597, %596 : vector<2x16xf32>
    %599 = vector.extract_strided_slice %588 {offsets = [0, 384], sizes = [2, 16], strides = [1, 1]} : vector<2x512xf32> to vector<2x16xf32>
    %cst_269 = arith.constant 1.000000e+00 : f32
    %600 = vector.broadcast %cst_269 : f32 to vector<2x16xf32>
    %601 = arith.addf %599, %600 : vector<2x16xf32>
    %cst_270 = arith.constant 5.000000e-01 : f32
    %602 = vector.broadcast %cst_270 : f32 to vector<2x16xf32>
    %603 = arith.mulf %602, %601 : vector<2x16xf32>
    %604 = vector.extract_strided_slice %585 {offsets = [0, 256], sizes = [2, 16], strides = [1, 1]} : vector<2x512xf32> to vector<2x16xf32>
    %605 = math.tanh %604 : vector<2x16xf32>
    %606 = arith.mulf %598, %579 : vector<2x16xf32>
    %607 = arith.mulf %593, %605 : vector<2x16xf32>
    %608 = arith.addf %606, %607 : vector<2x16xf32>
    %609 = math.tanh %608 : vector<2x16xf32>
    %610 = arith.mulf %603, %609 : vector<2x16xf32>
    %c6_271 = arith.constant 6 : index
    %c0_272 = arith.constant 0 : index
    %611 = vector.load %arg17[%c6_271, %c0_272] : memref<16x128xf32, #tpu.memory_space<vmem>>, vector<2x16xf32>
    tpu.vector_store %arg17[%c6_271, %c0_272], %610 {strides = array<i32>} : memref<16x128xf32, #tpu.memory_space<vmem>>, vector<2x16xf32>,
    %c8_273 = arith.constant 8 : index
    %c0_274 = arith.constant 0 : index
    %612 = vector.load %arg16[%c8_273, %c0_274] : memref<16x512xf32, #tpu.memory_space<vmem>>, vector<2x512xf32>
    %cst_275 = arith.constant dense<0.000000e+00> : vector<2x512xf32>
    %613 = tpu.matmul %610, %488, %cst_275 {dimension_numbers = #tpu.dot_dimension_numbers<[1], [0], [0], [1], [0, 0, 1, 1], [], []>} : vector<2x16xf32>, vector<16x512xf32>, vector<2x512xf32> -> vector<2x512xf32>
    %614 = arith.addf %612, %613 : vector<2x512xf32>
    %cst_276 = arith.constant 5.000000e-01 : f32
    %615 = vector.broadcast %cst_276 : f32 to vector<2x512xf32>
    %616 = arith.mulf %615, %614 : vector<2x512xf32>
    %617 = math.tanh %616 : vector<2x512xf32>
    %618 = vector.extract_strided_slice %617 {offsets = [0, 0], sizes = [2, 16], strides = [1, 1]} : vector<2x512xf32> to vector<2x16xf32>
    %cst_277 = arith.constant 1.000000e+00 : f32
    %619 = vector.broadcast %cst_277 : f32 to vector<2x16xf32>
    %620 = arith.addf %618, %619 : vector<2x16xf32>
    %cst_278 = arith.constant 5.000000e-01 : f32
    %621 = vector.broadcast %cst_278 : f32 to vector<2x16xf32>
    %622 = arith.mulf %621, %620 : vector<2x16xf32>
    %623 = vector.extract_strided_slice %617 {offsets = [0, 128], sizes = [2, 16], strides = [1, 1]} : vector<2x512xf32> to vector<2x16xf32>
    %cst_279 = arith.constant 1.000000e+00 : f32
    %624 = vector.broadcast %cst_279 : f32 to vector<2x16xf32>
    %625 = arith.addf %623, %624 : vector<2x16xf32>
    %cst_280 = arith.constant 5.000000e-01 : f32
    %626 = vector.broadcast %cst_280 : f32 to vector<2x16xf32>
    %627 = arith.mulf %626, %625 : vector<2x16xf32>
    %628 = vector.extract_strided_slice %617 {offsets = [0, 384], sizes = [2, 16], strides = [1, 1]} : vector<2x512xf32> to vector<2x16xf32>
    %cst_281 = arith.constant 1.000000e+00 : f32
    %629 = vector.broadcast %cst_281 : f32 to vector<2x16xf32>
    %630 = arith.addf %628, %629 : vector<2x16xf32>
    %cst_282 = arith.constant 5.000000e-01 : f32
    %631 = vector.broadcast %cst_282 : f32 to vector<2x16xf32>
    %632 = arith.mulf %631, %630 : vector<2x16xf32>
    %633 = vector.extract_strided_slice %614 {offsets = [0, 256], sizes = [2, 16], strides = [1, 1]} : vector<2x512xf32> to vector<2x16xf32>
    %634 = math.tanh %633 : vector<2x16xf32>
    %635 = arith.mulf %627, %608 : vector<2x16xf32>
    %636 = arith.mulf %622, %634 : vector<2x16xf32>
    %637 = arith.addf %635, %636 : vector<2x16xf32>
    %638 = math.tanh %637 : vector<2x16xf32>
    %639 = arith.mulf %632, %638 : vector<2x16xf32>
    %c8_283 = arith.constant 8 : index
    %c0_284 = arith.constant 0 : index
    %640 = vector.load %arg17[%c8_283, %c0_284] : memref<16x128xf32, #tpu.memory_space<vmem>>, vector<2x16xf32>
    tpu.vector_store %arg17[%c8_283, %c0_284], %639 {strides = array<i32>} : memref<16x128xf32, #tpu.memory_space<vmem>>, vector<2x16xf32>,
    %c10_285 = arith.constant 10 : index
    %c0_286 = arith.constant 0 : index
    %641 = vector.load %arg16[%c10_285, %c0_286] : memref<16x512xf32, #tpu.memory_space<vmem>>, vector<2x512xf32>
    %cst_287 = arith.constant dense<0.000000e+00> : vector<2x512xf32>
    %642 = tpu.matmul %639, %488, %cst_287 {dimension_numbers = #tpu.dot_dimension_numbers<[1], [0], [0], [1], [0, 0, 1, 1], [], []>} : vector<2x16xf32>, vector<16x512xf32>, vector<2x512xf32> -> vector<2x512xf32>
    %643 = arith.addf %641, %642 : vector<2x512xf32>
    %cst_288 = arith.constant 5.000000e-01 : f32
    %644 = vector.broadcast %cst_288 : f32 to vector<2x512xf32>
    %645 = arith.mulf %644, %643 : vector<2x512xf32>
    %646 = math.tanh %645 : vector<2x512xf32>
    %647 = vector.extract_strided_slice %646 {offsets = [0, 0], sizes = [2, 16], strides = [1, 1]} : vector<2x512xf32> to vector<2x16xf32>
    %cst_289 = arith.constant 1.000000e+00 : f32
    %648 = vector.broadcast %cst_289 : f32 to vector<2x16xf32>
    %649 = arith.addf %647, %648 : vector<2x16xf32>
    %cst_290 = arith.constant 5.000000e-01 : f32
    %650 = vector.broadcast %cst_290 : f32 to vector<2x16xf32>
    %651 = arith.mulf %650, %649 : vector<2x16xf32>
    %652 = vector.extract_strided_slice %646 {offsets = [0, 128], sizes = [2, 16], strides = [1, 1]} : vector<2x512xf32> to vector<2x16xf32>
    %cst_291 = arith.constant 1.000000e+00 : f32
    %653 = vector.broadcast %cst_291 : f32 to vector<2x16xf32>
    %654 = arith.addf %652, %653 : vector<2x16xf32>
    %cst_292 = arith.constant 5.000000e-01 : f32
    %655 = vector.broadcast %cst_292 : f32 to vector<2x16xf32>
    %656 = arith.mulf %655, %654 : vector<2x16xf32>
    %657 = vector.extract_strided_slice %646 {offsets = [0, 384], sizes = [2, 16], strides = [1, 1]} : vector<2x512xf32> to vector<2x16xf32>
    %cst_293 = arith.constant 1.000000e+00 : f32
    %658 = vector.broadcast %cst_293 : f32 to vector<2x16xf32>
    %659 = arith.addf %657, %658 : vector<2x16xf32>
    %cst_294 = arith.constant 5.000000e-01 : f32
    %660 = vector.broadcast %cst_294 : f32 to vector<2x16xf32>
    %661 = arith.mulf %660, %659 : vector<2x16xf32>
    %662 = vector.extract_strided_slice %643 {offsets = [0, 256], sizes = [2, 16], strides = [1, 1]} : vector<2x512xf32> to vector<2x16xf32>
    %663 = math.tanh %662 : vector<2x16xf32>
    %664 = arith.mulf %656, %637 : vector<2x16xf32>
    %665 = arith.mulf %651, %663 : vector<2x16xf32>
    %666 = arith.addf %664, %665 : vector<2x16xf32>
    %667 = math.tanh %666 : vector<2x16xf32>
    %668 = arith.mulf %661, %667 : vector<2x16xf32>
    %c10_295 = arith.constant 10 : index
    %c0_296 = arith.constant 0 : index
    %669 = vector.load %arg17[%c10_295, %c0_296] : memref<16x128xf32, #tpu.memory_space<vmem>>, vector<2x16xf32>
    tpu.vector_store %arg17[%c10_295, %c0_296], %668 {strides = array<i32>} : memref<16x128xf32, #tpu.memory_space<vmem>>, vector<2x16xf32>,
    %c12_297 = arith.constant 12 : index
    %c0_298 = arith.constant 0 : index
    %670 = vector.load %arg16[%c12_297, %c0_298] : memref<16x512xf32, #tpu.memory_space<vmem>>, vector<2x512xf32>
    %cst_299 = arith.constant dense<0.000000e+00> : vector<2x512xf32>
    %671 = tpu.matmul %668, %488, %cst_299 {dimension_numbers = #tpu.dot_dimension_numbers<[1], [0], [0], [1], [0, 0, 1, 1], [], []>} : vector<2x16xf32>, vector<16x512xf32>, vector<2x512xf32> -> vector<2x512xf32>
    %672 = arith.addf %670, %671 : vector<2x512xf32>
    %cst_300 = arith.constant 5.000000e-01 : f32
    %673 = vector.broadcast %cst_300 : f32 to vector<2x512xf32>
    %674 = arith.mulf %673, %672 : vector<2x512xf32>
    %675 = math.tanh %674 : vector<2x512xf32>
    %676 = vector.extract_strided_slice %675 {offsets = [0, 0], sizes = [2, 16], strides = [1, 1]} : vector<2x512xf32> to vector<2x16xf32>
    %cst_301 = arith.constant 1.000000e+00 : f32
    %677 = vector.broadcast %cst_301 : f32 to vector<2x16xf32>
    %678 = arith.addf %676, %677 : vector<2x16xf32>
    %cst_302 = arith.constant 5.000000e-01 : f32
    %679 = vector.broadcast %cst_302 : f32 to vector<2x16xf32>
    %680 = arith.mulf %679, %678 : vector<2x16xf32>
    %681 = vector.extract_strided_slice %675 {offsets = [0, 128], sizes = [2, 16], strides = [1, 1]} : vector<2x512xf32> to vector<2x16xf32>
    %cst_303 = arith.constant 1.000000e+00 : f32
    %682 = vector.broadcast %cst_303 : f32 to vector<2x16xf32>
    %683 = arith.addf %681, %682 : vector<2x16xf32>
    %cst_304 = arith.constant 5.000000e-01 : f32
    %684 = vector.broadcast %cst_304 : f32 to vector<2x16xf32>
    %685 = arith.mulf %684, %683 : vector<2x16xf32>
    %686 = vector.extract_strided_slice %675 {offsets = [0, 384], sizes = [2, 16], strides = [1, 1]} : vector<2x512xf32> to vector<2x16xf32>
    %cst_305 = arith.constant 1.000000e+00 : f32
    %687 = vector.broadcast %cst_305 : f32 to vector<2x16xf32>
    %688 = arith.addf %686, %687 : vector<2x16xf32>
    %cst_306 = arith.constant 5.000000e-01 : f32
    %689 = vector.broadcast %cst_306 : f32 to vector<2x16xf32>
    %690 = arith.mulf %689, %688 : vector<2x16xf32>
    %691 = vector.extract_strided_slice %672 {offsets = [0, 256], sizes = [2, 16], strides = [1, 1]} : vector<2x512xf32> to vector<2x16xf32>
    %692 = math.tanh %691 : vector<2x16xf32>
    %693 = arith.mulf %685, %666 : vector<2x16xf32>
    %694 = arith.mulf %680, %692 : vector<2x16xf32>
    %695 = arith.addf %693, %694 : vector<2x16xf32>
    %696 = math.tanh %695 : vector<2x16xf32>
    %697 = arith.mulf %690, %696 : vector<2x16xf32>
    %c12_307 = arith.constant 12 : index
    %c0_308 = arith.constant 0 : index
    %698 = vector.load %arg17[%c12_307, %c0_308] : memref<16x128xf32, #tpu.memory_space<vmem>>, vector<2x16xf32>
    tpu.vector_store %arg17[%c12_307, %c0_308], %697 {strides = array<i32>} : memref<16x128xf32, #tpu.memory_space<vmem>>, vector<2x16xf32>,
    %c14_309 = arith.constant 14 : index
    %c0_310 = arith.constant 0 : index
    %699 = vector.load %arg16[%c14_309, %c0_310] : memref<16x512xf32, #tpu.memory_space<vmem>>, vector<2x512xf32>
    %cst_311 = arith.constant dense<0.000000e+00> : vector<2x512xf32>
    %700 = tpu.matmul %697, %488, %cst_311 {dimension_numbers = #tpu.dot_dimension_numbers<[1], [0], [0], [1], [0, 0, 1, 1], [], []>} : vector<2x16xf32>, vector<16x512xf32>, vector<2x512xf32> -> vector<2x512xf32>
    %701 = arith.addf %699, %700 : vector<2x512xf32>
    %cst_312 = arith.constant 5.000000e-01 : f32
    %702 = vector.broadcast %cst_312 : f32 to vector<2x512xf32>
    %703 = arith.mulf %702, %701 : vector<2x512xf32>
    %704 = math.tanh %703 : vector<2x512xf32>
    %705 = vector.extract_strided_slice %704 {offsets = [0, 0], sizes = [2, 16], strides = [1, 1]} : vector<2x512xf32> to vector<2x16xf32>
    %cst_313 = arith.constant 1.000000e+00 : f32
    %706 = vector.broadcast %cst_313 : f32 to vector<2x16xf32>
    %707 = arith.addf %705, %706 : vector<2x16xf32>
    %cst_314 = arith.constant 5.000000e-01 : f32
    %708 = vector.broadcast %cst_314 : f32 to vector<2x16xf32>
    %709 = arith.mulf %708, %707 : vector<2x16xf32>
    %710 = vector.extract_strided_slice %704 {offsets = [0, 128], sizes = [2, 16], strides = [1, 1]} : vector<2x512xf32> to vector<2x16xf32>
    %cst_315 = arith.constant 1.000000e+00 : f32
    %711 = vector.broadcast %cst_315 : f32 to vector<2x16xf32>
    %712 = arith.addf %710, %711 : vector<2x16xf32>
    %cst_316 = arith.constant 5.000000e-01 : f32
    %713 = vector.broadcast %cst_316 : f32 to vector<2x16xf32>
    %714 = arith.mulf %713, %712 : vector<2x16xf32>
    %715 = vector.extract_strided_slice %704 {offsets = [0, 384], sizes = [2, 16], strides = [1, 1]} : vector<2x512xf32> to vector<2x16xf32>
    %cst_317 = arith.constant 1.000000e+00 : f32
    %716 = vector.broadcast %cst_317 : f32 to vector<2x16xf32>
    %717 = arith.addf %715, %716 : vector<2x16xf32>
    %cst_318 = arith.constant 5.000000e-01 : f32
    %718 = vector.broadcast %cst_318 : f32 to vector<2x16xf32>
    %719 = arith.mulf %718, %717 : vector<2x16xf32>
    %720 = vector.extract_strided_slice %701 {offsets = [0, 256], sizes = [2, 16], strides = [1, 1]} : vector<2x512xf32> to vector<2x16xf32>
    %721 = math.tanh %720 : vector<2x16xf32>
    %722 = arith.mulf %714, %695 : vector<2x16xf32>
    %723 = arith.mulf %709, %721 : vector<2x16xf32>
    %724 = arith.addf %722, %723 : vector<2x16xf32>
    %725 = math.tanh %724 : vector<2x16xf32>
    %726 = arith.mulf %719, %725 : vector<2x16xf32>
    %c14_319 = arith.constant 14 : index
    %c0_320 = arith.constant 0 : index
    %727 = vector.load %arg17[%c14_319, %c0_320] : memref<16x128xf32, #tpu.memory_space<vmem>>, vector<2x16xf32>
    tpu.vector_store %arg17[%c14_319, %c0_320], %726 {strides = array<i32>} : memref<16x128xf32, #tpu.memory_space<vmem>>, vector<2x16xf32>,
    %c0_321 = arith.constant 0 : index
    %c0_322 = arith.constant 0 : index
    %728 = vector.load %arg17[%c0_321, %c0_322] : memref<16x128xf32, #tpu.memory_space<vmem>>, vector<16x128xf32>
    %c0_323 = arith.constant 0 : index
    %c0_324 = arith.constant 0 : index
    %729 = vector.load %arg10[%c0_323, %c0_324] : memref<128x512xf32, #tpu.memory_space<vmem>>, vector<128x512xf32>
    %c0_325 = arith.constant 0 : index
    %c0_326 = arith.constant 0 : index
    %730 = vector.load %arg11[%c0_325, %c0_326] : memref<32x512xf32, #tpu.memory_space<vmem>>, vector<32x512xf32>
    %c0_327 = arith.constant 0 : index
    %c0_328 = arith.constant 0 : index
    %731 = vector.load %arg12[%c0_327, %c0_328] : memref<1x512xf32, #tpu.memory_space<vmem>>, vector<1x512xf32>
    %cst_329 = arith.constant dense<0.000000e+00> : vector<16x512xf32>
    %732 = tpu.matmul %728, %729, %cst_329 {dimension_numbers = #tpu.dot_dimension_numbers<[1], [0], [0], [1], [0, 0, 1, 1], [], []>} : vector<16x128xf32>, vector<128x512xf32>, vector<16x512xf32> -> vector<16x512xf32>
    %733 = vector.broadcast %731 : vector<1x512xf32> to vector<16x512xf32>
    %734 = arith.addf %732, %733 : vector<16x512xf32>
    %c0_330 = arith.constant 0 : index
    %c0_331 = arith.constant 0 : index
    %735 = vector.load %arg16[%c0_330, %c0_331] : memref<16x512xf32, #tpu.memory_space<vmem>>, vector<16x512xf32>
    tpu.vector_store %arg16[%c0_330, %c0_331], %734 {strides = array<i32>} : memref<16x512xf32, #tpu.memory_space<vmem>>, vector<16x512xf32>,
    %cst_332 = arith.constant 0.000000e+00 : f32
    %736 = vector.broadcast %cst_332 : f32 to vector<2x32xf32>
    %cst_333 = arith.constant 0.000000e+00 : f32
    %737 = vector.broadcast %cst_333 : f32 to vector<2x32xf32>
    %c0_334 = arith.constant 0 : index
    %c0_335 = arith.constant 0 : index
    %738 = vector.load %arg16[%c0_334, %c0_335] : memref<16x512xf32, #tpu.memory_space<vmem>>, vector<2x512xf32>
    %cst_336 = arith.constant dense<0.000000e+00> : vector<2x512xf32>
    %739 = tpu.matmul %736, %730, %cst_336 {dimension_numbers = #tpu.dot_dimension_numbers<[1], [0], [0], [1], [0, 0, 1, 1], [], []>} : vector<2x32xf32>, vector<32x512xf32>, vector<2x512xf32> -> vector<2x512xf32>
    %740 = arith.addf %738, %739 : vector<2x512xf32>
    %cst_337 = arith.constant 5.000000e-01 : f32
    %741 = vector.broadcast %cst_337 : f32 to vector<2x512xf32>
    %742 = arith.mulf %741, %740 : vector<2x512xf32>
    %743 = math.tanh %742 : vector<2x512xf32>
    %744 = vector.extract_strided_slice %743 {offsets = [0, 0], sizes = [2, 32], strides = [1, 1]} : vector<2x512xf32> to vector<2x32xf32>
    %cst_338 = arith.constant 1.000000e+00 : f32
    %745 = vector.broadcast %cst_338 : f32 to vector<2x32xf32>
    %746 = arith.addf %744, %745 : vector<2x32xf32>
    %cst_339 = arith.constant 5.000000e-01 : f32
    %747 = vector.broadcast %cst_339 : f32 to vector<2x32xf32>
    %748 = arith.mulf %747, %746 : vector<2x32xf32>
    %749 = vector.extract_strided_slice %743 {offsets = [0, 128], sizes = [2, 32], strides = [1, 1]} : vector<2x512xf32> to vector<2x32xf32>
    %cst_340 = arith.constant 1.000000e+00 : f32
    %750 = vector.broadcast %cst_340 : f32 to vector<2x32xf32>
    %751 = arith.addf %749, %750 : vector<2x32xf32>
    %cst_341 = arith.constant 5.000000e-01 : f32
    %752 = vector.broadcast %cst_341 : f32 to vector<2x32xf32>
    %753 = arith.mulf %752, %751 : vector<2x32xf32>
    %754 = vector.extract_strided_slice %743 {offsets = [0, 384], sizes = [2, 32], strides = [1, 1]} : vector<2x512xf32> to vector<2x32xf32>
    %cst_342 = arith.constant 1.000000e+00 : f32
    %755 = vector.broadcast %cst_342 : f32 to vector<2x32xf32>
    %756 = arith.addf %754, %755 : vector<2x32xf32>
    %cst_343 = arith.constant 5.000000e-01 : f32
    %757 = vector.broadcast %cst_343 : f32 to vector<2x32xf32>
    %758 = arith.mulf %757, %756 : vector<2x32xf32>
    %759 = vector.extract_strided_slice %740 {offsets = [0, 256], sizes = [2, 32], strides = [1, 1]} : vector<2x512xf32> to vector<2x32xf32>
    %760 = math.tanh %759 : vector<2x32xf32>
    %761 = arith.mulf %753, %737 : vector<2x32xf32>
    %762 = arith.mulf %748, %760 : vector<2x32xf32>
    %763 = arith.addf %761, %762 : vector<2x32xf32>
    %764 = math.tanh %763 : vector<2x32xf32>
    %765 = arith.mulf %758, %764 : vector<2x32xf32>
    %c0_344 = arith.constant 0 : index
    %c0_345 = arith.constant 0 : index
    %766 = vector.load %arg17[%c0_344, %c0_345] : memref<16x128xf32, #tpu.memory_space<vmem>>, vector<2x32xf32>
    tpu.vector_store %arg17[%c0_344, %c0_345], %765 {strides = array<i32>} : memref<16x128xf32, #tpu.memory_space<vmem>>, vector<2x32xf32>,
    %c2_346 = arith.constant 2 : index
    %c0_347 = arith.constant 0 : index
    %767 = vector.load %arg16[%c2_346, %c0_347] : memref<16x512xf32, #tpu.memory_space<vmem>>, vector<2x512xf32>
    %cst_348 = arith.constant dense<0.000000e+00> : vector<2x512xf32>
    %768 = tpu.matmul %765, %730, %cst_348 {dimension_numbers = #tpu.dot_dimension_numbers<[1], [0], [0], [1], [0, 0, 1, 1], [], []>} : vector<2x32xf32>, vector<32x512xf32>, vector<2x512xf32> -> vector<2x512xf32>
    %769 = arith.addf %767, %768 : vector<2x512xf32>
    %cst_349 = arith.constant 5.000000e-01 : f32
    %770 = vector.broadcast %cst_349 : f32 to vector<2x512xf32>
    %771 = arith.mulf %770, %769 : vector<2x512xf32>
    %772 = math.tanh %771 : vector<2x512xf32>
    %773 = vector.extract_strided_slice %772 {offsets = [0, 0], sizes = [2, 32], strides = [1, 1]} : vector<2x512xf32> to vector<2x32xf32>
    %cst_350 = arith.constant 1.000000e+00 : f32
    %774 = vector.broadcast %cst_350 : f32 to vector<2x32xf32>
    %775 = arith.addf %773, %774 : vector<2x32xf32>
    %cst_351 = arith.constant 5.000000e-01 : f32
    %776 = vector.broadcast %cst_351 : f32 to vector<2x32xf32>
    %777 = arith.mulf %776, %775 : vector<2x32xf32>
    %778 = vector.extract_strided_slice %772 {offsets = [0, 128], sizes = [2, 32], strides = [1, 1]} : vector<2x512xf32> to vector<2x32xf32>
    %cst_352 = arith.constant 1.000000e+00 : f32
    %779 = vector.broadcast %cst_352 : f32 to vector<2x32xf32>
    %780 = arith.addf %778, %779 : vector<2x32xf32>
    %cst_353 = arith.constant 5.000000e-01 : f32
    %781 = vector.broadcast %cst_353 : f32 to vector<2x32xf32>
    %782 = arith.mulf %781, %780 : vector<2x32xf32>
    %783 = vector.extract_strided_slice %772 {offsets = [0, 384], sizes = [2, 32], strides = [1, 1]} : vector<2x512xf32> to vector<2x32xf32>
    %cst_354 = arith.constant 1.000000e+00 : f32
    %784 = vector.broadcast %cst_354 : f32 to vector<2x32xf32>
    %785 = arith.addf %783, %784 : vector<2x32xf32>
    %cst_355 = arith.constant 5.000000e-01 : f32
    %786 = vector.broadcast %cst_355 : f32 to vector<2x32xf32>
    %787 = arith.mulf %786, %785 : vector<2x32xf32>
    %788 = vector.extract_strided_slice %769 {offsets = [0, 256], sizes = [2, 32], strides = [1, 1]} : vector<2x512xf32> to vector<2x32xf32>
    %789 = math.tanh %788 : vector<2x32xf32>
    %790 = arith.mulf %782, %763 : vector<2x32xf32>
    %791 = arith.mulf %777, %789 : vector<2x32xf32>
    %792 = arith.addf %790, %791 : vector<2x32xf32>
    %793 = math.tanh %792 : vector<2x32xf32>
    %794 = arith.mulf %787, %793 : vector<2x32xf32>
    %c2_356 = arith.constant 2 : index
    %c0_357 = arith.constant 0 : index
    %795 = vector.load %arg17[%c2_356, %c0_357] : memref<16x128xf32, #tpu.memory_space<vmem>>, vector<2x32xf32>
    tpu.vector_store %arg17[%c2_356, %c0_357], %794 {strides = array<i32>} : memref<16x128xf32, #tpu.memory_space<vmem>>, vector<2x32xf32>,
    %c4_358 = arith.constant 4 : index
    %c0_359 = arith.constant 0 : index
    %796 = vector.load %arg16[%c4_358, %c0_359] : memref<16x512xf32, #tpu.memory_space<vmem>>, vector<2x512xf32>
    %cst_360 = arith.constant dense<0.000000e+00> : vector<2x512xf32>
    %797 = tpu.matmul %794, %730, %cst_360 {dimension_numbers = #tpu.dot_dimension_numbers<[1], [0], [0], [1], [0, 0, 1, 1], [], []>} : vector<2x32xf32>, vector<32x512xf32>, vector<2x512xf32> -> vector<2x512xf32>
    %798 = arith.addf %796, %797 : vector<2x512xf32>
    %cst_361 = arith.constant 5.000000e-01 : f32
    %799 = vector.broadcast %cst_361 : f32 to vector<2x512xf32>
    %800 = arith.mulf %799, %798 : vector<2x512xf32>
    %801 = math.tanh %800 : vector<2x512xf32>
    %802 = vector.extract_strided_slice %801 {offsets = [0, 0], sizes = [2, 32], strides = [1, 1]} : vector<2x512xf32> to vector<2x32xf32>
    %cst_362 = arith.constant 1.000000e+00 : f32
    %803 = vector.broadcast %cst_362 : f32 to vector<2x32xf32>
    %804 = arith.addf %802, %803 : vector<2x32xf32>
    %cst_363 = arith.constant 5.000000e-01 : f32
    %805 = vector.broadcast %cst_363 : f32 to vector<2x32xf32>
    %806 = arith.mulf %805, %804 : vector<2x32xf32>
    %807 = vector.extract_strided_slice %801 {offsets = [0, 128], sizes = [2, 32], strides = [1, 1]} : vector<2x512xf32> to vector<2x32xf32>
    %cst_364 = arith.constant 1.000000e+00 : f32
    %808 = vector.broadcast %cst_364 : f32 to vector<2x32xf32>
    %809 = arith.addf %807, %808 : vector<2x32xf32>
    %cst_365 = arith.constant 5.000000e-01 : f32
    %810 = vector.broadcast %cst_365 : f32 to vector<2x32xf32>
    %811 = arith.mulf %810, %809 : vector<2x32xf32>
    %812 = vector.extract_strided_slice %801 {offsets = [0, 384], sizes = [2, 32], strides = [1, 1]} : vector<2x512xf32> to vector<2x32xf32>
    %cst_366 = arith.constant 1.000000e+00 : f32
    %813 = vector.broadcast %cst_366 : f32 to vector<2x32xf32>
    %814 = arith.addf %812, %813 : vector<2x32xf32>
    %cst_367 = arith.constant 5.000000e-01 : f32
    %815 = vector.broadcast %cst_367 : f32 to vector<2x32xf32>
    %816 = arith.mulf %815, %814 : vector<2x32xf32>
    %817 = vector.extract_strided_slice %798 {offsets = [0, 256], sizes = [2, 32], strides = [1, 1]} : vector<2x512xf32> to vector<2x32xf32>
    %818 = math.tanh %817 : vector<2x32xf32>
    %819 = arith.mulf %811, %792 : vector<2x32xf32>
    %820 = arith.mulf %806, %818 : vector<2x32xf32>
    %821 = arith.addf %819, %820 : vector<2x32xf32>
    %822 = math.tanh %821 : vector<2x32xf32>
    %823 = arith.mulf %816, %822 : vector<2x32xf32>
    %c4_368 = arith.constant 4 : index
    %c0_369 = arith.constant 0 : index
    %824 = vector.load %arg17[%c4_368, %c0_369] : memref<16x128xf32, #tpu.memory_space<vmem>>, vector<2x32xf32>
    tpu.vector_store %arg17[%c4_368, %c0_369], %823 {strides = array<i32>} : memref<16x128xf32, #tpu.memory_space<vmem>>, vector<2x32xf32>,
    %c6_370 = arith.constant 6 : index
    %c0_371 = arith.constant 0 : index
    %825 = vector.load %arg16[%c6_370, %c0_371] : memref<16x512xf32, #tpu.memory_space<vmem>>, vector<2x512xf32>
    %cst_372 = arith.constant dense<0.000000e+00> : vector<2x512xf32>
    %826 = tpu.matmul %823, %730, %cst_372 {dimension_numbers = #tpu.dot_dimension_numbers<[1], [0], [0], [1], [0, 0, 1, 1], [], []>} : vector<2x32xf32>, vector<32x512xf32>, vector<2x512xf32> -> vector<2x512xf32>
    %827 = arith.addf %825, %826 : vector<2x512xf32>
    %cst_373 = arith.constant 5.000000e-01 : f32
    %828 = vector.broadcast %cst_373 : f32 to vector<2x512xf32>
    %829 = arith.mulf %828, %827 : vector<2x512xf32>
    %830 = math.tanh %829 : vector<2x512xf32>
    %831 = vector.extract_strided_slice %830 {offsets = [0, 0], sizes = [2, 32], strides = [1, 1]} : vector<2x512xf32> to vector<2x32xf32>
    %cst_374 = arith.constant 1.000000e+00 : f32
    %832 = vector.broadcast %cst_374 : f32 to vector<2x32xf32>
    %833 = arith.addf %831, %832 : vector<2x32xf32>
    %cst_375 = arith.constant 5.000000e-01 : f32
    %834 = vector.broadcast %cst_375 : f32 to vector<2x32xf32>
    %835 = arith.mulf %834, %833 : vector<2x32xf32>
    %836 = vector.extract_strided_slice %830 {offsets = [0, 128], sizes = [2, 32], strides = [1, 1]} : vector<2x512xf32> to vector<2x32xf32>
    %cst_376 = arith.constant 1.000000e+00 : f32
    %837 = vector.broadcast %cst_376 : f32 to vector<2x32xf32>
    %838 = arith.addf %836, %837 : vector<2x32xf32>
    %cst_377 = arith.constant 5.000000e-01 : f32
    %839 = vector.broadcast %cst_377 : f32 to vector<2x32xf32>
    %840 = arith.mulf %839, %838 : vector<2x32xf32>
    %841 = vector.extract_strided_slice %830 {offsets = [0, 384], sizes = [2, 32], strides = [1, 1]} : vector<2x512xf32> to vector<2x32xf32>
    %cst_378 = arith.constant 1.000000e+00 : f32
    %842 = vector.broadcast %cst_378 : f32 to vector<2x32xf32>
    %843 = arith.addf %841, %842 : vector<2x32xf32>
    %cst_379 = arith.constant 5.000000e-01 : f32
    %844 = vector.broadcast %cst_379 : f32 to vector<2x32xf32>
    %845 = arith.mulf %844, %843 : vector<2x32xf32>
    %846 = vector.extract_strided_slice %827 {offsets = [0, 256], sizes = [2, 32], strides = [1, 1]} : vector<2x512xf32> to vector<2x32xf32>
    %847 = math.tanh %846 : vector<2x32xf32>
    %848 = arith.mulf %840, %821 : vector<2x32xf32>
    %849 = arith.mulf %835, %847 : vector<2x32xf32>
    %850 = arith.addf %848, %849 : vector<2x32xf32>
    %851 = math.tanh %850 : vector<2x32xf32>
    %852 = arith.mulf %845, %851 : vector<2x32xf32>
    %c6_380 = arith.constant 6 : index
    %c0_381 = arith.constant 0 : index
    %853 = vector.load %arg17[%c6_380, %c0_381] : memref<16x128xf32, #tpu.memory_space<vmem>>, vector<2x32xf32>
    tpu.vector_store %arg17[%c6_380, %c0_381], %852 {strides = array<i32>} : memref<16x128xf32, #tpu.memory_space<vmem>>, vector<2x32xf32>,
    %c8_382 = arith.constant 8 : index
    %c0_383 = arith.constant 0 : index
    %854 = vector.load %arg16[%c8_382, %c0_383] : memref<16x512xf32, #tpu.memory_space<vmem>>, vector<2x512xf32>
    %cst_384 = arith.constant dense<0.000000e+00> : vector<2x512xf32>
    %855 = tpu.matmul %852, %730, %cst_384 {dimension_numbers = #tpu.dot_dimension_numbers<[1], [0], [0], [1], [0, 0, 1, 1], [], []>} : vector<2x32xf32>, vector<32x512xf32>, vector<2x512xf32> -> vector<2x512xf32>
    %856 = arith.addf %854, %855 : vector<2x512xf32>
    %cst_385 = arith.constant 5.000000e-01 : f32
    %857 = vector.broadcast %cst_385 : f32 to vector<2x512xf32>
    %858 = arith.mulf %857, %856 : vector<2x512xf32>
    %859 = math.tanh %858 : vector<2x512xf32>
    %860 = vector.extract_strided_slice %859 {offsets = [0, 0], sizes = [2, 32], strides = [1, 1]} : vector<2x512xf32> to vector<2x32xf32>
    %cst_386 = arith.constant 1.000000e+00 : f32
    %861 = vector.broadcast %cst_386 : f32 to vector<2x32xf32>
    %862 = arith.addf %860, %861 : vector<2x32xf32>
    %cst_387 = arith.constant 5.000000e-01 : f32
    %863 = vector.broadcast %cst_387 : f32 to vector<2x32xf32>
    %864 = arith.mulf %863, %862 : vector<2x32xf32>
    %865 = vector.extract_strided_slice %859 {offsets = [0, 128], sizes = [2, 32], strides = [1, 1]} : vector<2x512xf32> to vector<2x32xf32>
    %cst_388 = arith.constant 1.000000e+00 : f32
    %866 = vector.broadcast %cst_388 : f32 to vector<2x32xf32>
    %867 = arith.addf %865, %866 : vector<2x32xf32>
    %cst_389 = arith.constant 5.000000e-01 : f32
    %868 = vector.broadcast %cst_389 : f32 to vector<2x32xf32>
    %869 = arith.mulf %868, %867 : vector<2x32xf32>
    %870 = vector.extract_strided_slice %859 {offsets = [0, 384], sizes = [2, 32], strides = [1, 1]} : vector<2x512xf32> to vector<2x32xf32>
    %cst_390 = arith.constant 1.000000e+00 : f32
    %871 = vector.broadcast %cst_390 : f32 to vector<2x32xf32>
    %872 = arith.addf %870, %871 : vector<2x32xf32>
    %cst_391 = arith.constant 5.000000e-01 : f32
    %873 = vector.broadcast %cst_391 : f32 to vector<2x32xf32>
    %874 = arith.mulf %873, %872 : vector<2x32xf32>
    %875 = vector.extract_strided_slice %856 {offsets = [0, 256], sizes = [2, 32], strides = [1, 1]} : vector<2x512xf32> to vector<2x32xf32>
    %876 = math.tanh %875 : vector<2x32xf32>
    %877 = arith.mulf %869, %850 : vector<2x32xf32>
    %878 = arith.mulf %864, %876 : vector<2x32xf32>
    %879 = arith.addf %877, %878 : vector<2x32xf32>
    %880 = math.tanh %879 : vector<2x32xf32>
    %881 = arith.mulf %874, %880 : vector<2x32xf32>
    %c8_392 = arith.constant 8 : index
    %c0_393 = arith.constant 0 : index
    %882 = vector.load %arg17[%c8_392, %c0_393] : memref<16x128xf32, #tpu.memory_space<vmem>>, vector<2x32xf32>
    tpu.vector_store %arg17[%c8_392, %c0_393], %881 {strides = array<i32>} : memref<16x128xf32, #tpu.memory_space<vmem>>, vector<2x32xf32>,
    %c10_394 = arith.constant 10 : index
    %c0_395 = arith.constant 0 : index
    %883 = vector.load %arg16[%c10_394, %c0_395] : memref<16x512xf32, #tpu.memory_space<vmem>>, vector<2x512xf32>
    %cst_396 = arith.constant dense<0.000000e+00> : vector<2x512xf32>
    %884 = tpu.matmul %881, %730, %cst_396 {dimension_numbers = #tpu.dot_dimension_numbers<[1], [0], [0], [1], [0, 0, 1, 1], [], []>} : vector<2x32xf32>, vector<32x512xf32>, vector<2x512xf32> -> vector<2x512xf32>
    %885 = arith.addf %883, %884 : vector<2x512xf32>
    %cst_397 = arith.constant 5.000000e-01 : f32
    %886 = vector.broadcast %cst_397 : f32 to vector<2x512xf32>
    %887 = arith.mulf %886, %885 : vector<2x512xf32>
    %888 = math.tanh %887 : vector<2x512xf32>
    %889 = vector.extract_strided_slice %888 {offsets = [0, 0], sizes = [2, 32], strides = [1, 1]} : vector<2x512xf32> to vector<2x32xf32>
    %cst_398 = arith.constant 1.000000e+00 : f32
    %890 = vector.broadcast %cst_398 : f32 to vector<2x32xf32>
    %891 = arith.addf %889, %890 : vector<2x32xf32>
    %cst_399 = arith.constant 5.000000e-01 : f32
    %892 = vector.broadcast %cst_399 : f32 to vector<2x32xf32>
    %893 = arith.mulf %892, %891 : vector<2x32xf32>
    %894 = vector.extract_strided_slice %888 {offsets = [0, 128], sizes = [2, 32], strides = [1, 1]} : vector<2x512xf32> to vector<2x32xf32>
    %cst_400 = arith.constant 1.000000e+00 : f32
    %895 = vector.broadcast %cst_400 : f32 to vector<2x32xf32>
    %896 = arith.addf %894, %895 : vector<2x32xf32>
    %cst_401 = arith.constant 5.000000e-01 : f32
    %897 = vector.broadcast %cst_401 : f32 to vector<2x32xf32>
    %898 = arith.mulf %897, %896 : vector<2x32xf32>
    %899 = vector.extract_strided_slice %888 {offsets = [0, 384], sizes = [2, 32], strides = [1, 1]} : vector<2x512xf32> to vector<2x32xf32>
    %cst_402 = arith.constant 1.000000e+00 : f32
    %900 = vector.broadcast %cst_402 : f32 to vector<2x32xf32>
    %901 = arith.addf %899, %900 : vector<2x32xf32>
    %cst_403 = arith.constant 5.000000e-01 : f32
    %902 = vector.broadcast %cst_403 : f32 to vector<2x32xf32>
    %903 = arith.mulf %902, %901 : vector<2x32xf32>
    %904 = vector.extract_strided_slice %885 {offsets = [0, 256], sizes = [2, 32], strides = [1, 1]} : vector<2x512xf32> to vector<2x32xf32>
    %905 = math.tanh %904 : vector<2x32xf32>
    %906 = arith.mulf %898, %879 : vector<2x32xf32>
    %907 = arith.mulf %893, %905 : vector<2x32xf32>
    %908 = arith.addf %906, %907 : vector<2x32xf32>
    %909 = math.tanh %908 : vector<2x32xf32>
    %910 = arith.mulf %903, %909 : vector<2x32xf32>
    %c10_404 = arith.constant 10 : index
    %c0_405 = arith.constant 0 : index
    %911 = vector.load %arg17[%c10_404, %c0_405] : memref<16x128xf32, #tpu.memory_space<vmem>>, vector<2x32xf32>
    tpu.vector_store %arg17[%c10_404, %c0_405], %910 {strides = array<i32>} : memref<16x128xf32, #tpu.memory_space<vmem>>, vector<2x32xf32>,
    %c12_406 = arith.constant 12 : index
    %c0_407 = arith.constant 0 : index
    %912 = vector.load %arg16[%c12_406, %c0_407] : memref<16x512xf32, #tpu.memory_space<vmem>>, vector<2x512xf32>
    %cst_408 = arith.constant dense<0.000000e+00> : vector<2x512xf32>
    %913 = tpu.matmul %910, %730, %cst_408 {dimension_numbers = #tpu.dot_dimension_numbers<[1], [0], [0], [1], [0, 0, 1, 1], [], []>} : vector<2x32xf32>, vector<32x512xf32>, vector<2x512xf32> -> vector<2x512xf32>
    %914 = arith.addf %912, %913 : vector<2x512xf32>
    %cst_409 = arith.constant 5.000000e-01 : f32
    %915 = vector.broadcast %cst_409 : f32 to vector<2x512xf32>
    %916 = arith.mulf %915, %914 : vector<2x512xf32>
    %917 = math.tanh %916 : vector<2x512xf32>
    %918 = vector.extract_strided_slice %917 {offsets = [0, 0], sizes = [2, 32], strides = [1, 1]} : vector<2x512xf32> to vector<2x32xf32>
    %cst_410 = arith.constant 1.000000e+00 : f32
    %919 = vector.broadcast %cst_410 : f32 to vector<2x32xf32>
    %920 = arith.addf %918, %919 : vector<2x32xf32>
    %cst_411 = arith.constant 5.000000e-01 : f32
    %921 = vector.broadcast %cst_411 : f32 to vector<2x32xf32>
    %922 = arith.mulf %921, %920 : vector<2x32xf32>
    %923 = vector.extract_strided_slice %917 {offsets = [0, 128], sizes = [2, 32], strides = [1, 1]} : vector<2x512xf32> to vector<2x32xf32>
    %cst_412 = arith.constant 1.000000e+00 : f32
    %924 = vector.broadcast %cst_412 : f32 to vector<2x32xf32>
    %925 = arith.addf %923, %924 : vector<2x32xf32>
    %cst_413 = arith.constant 5.000000e-01 : f32
    %926 = vector.broadcast %cst_413 : f32 to vector<2x32xf32>
    %927 = arith.mulf %926, %925 : vector<2x32xf32>
    %928 = vector.extract_strided_slice %917 {offsets = [0, 384], sizes = [2, 32], strides = [1, 1]} : vector<2x512xf32> to vector<2x32xf32>
    %cst_414 = arith.constant 1.000000e+00 : f32
    %929 = vector.broadcast %cst_414 : f32 to vector<2x32xf32>
    %930 = arith.addf %928, %929 : vector<2x32xf32>
    %cst_415 = arith.constant 5.000000e-01 : f32
    %931 = vector.broadcast %cst_415 : f32 to vector<2x32xf32>
    %932 = arith.mulf %931, %930 : vector<2x32xf32>
    %933 = vector.extract_strided_slice %914 {offsets = [0, 256], sizes = [2, 32], strides = [1, 1]} : vector<2x512xf32> to vector<2x32xf32>
    %934 = math.tanh %933 : vector<2x32xf32>
    %935 = arith.mulf %927, %908 : vector<2x32xf32>
    %936 = arith.mulf %922, %934 : vector<2x32xf32>
    %937 = arith.addf %935, %936 : vector<2x32xf32>
    %938 = math.tanh %937 : vector<2x32xf32>
    %939 = arith.mulf %932, %938 : vector<2x32xf32>
    %c12_416 = arith.constant 12 : index
    %c0_417 = arith.constant 0 : index
    %940 = vector.load %arg17[%c12_416, %c0_417] : memref<16x128xf32, #tpu.memory_space<vmem>>, vector<2x32xf32>
    tpu.vector_store %arg17[%c12_416, %c0_417], %939 {strides = array<i32>} : memref<16x128xf32, #tpu.memory_space<vmem>>, vector<2x32xf32>,
    %c14_418 = arith.constant 14 : index
    %c0_419 = arith.constant 0 : index
    %941 = vector.load %arg16[%c14_418, %c0_419] : memref<16x512xf32, #tpu.memory_space<vmem>>, vector<2x512xf32>
    %cst_420 = arith.constant dense<0.000000e+00> : vector<2x512xf32>
    %942 = tpu.matmul %939, %730, %cst_420 {dimension_numbers = #tpu.dot_dimension_numbers<[1], [0], [0], [1], [0, 0, 1, 1], [], []>} : vector<2x32xf32>, vector<32x512xf32>, vector<2x512xf32> -> vector<2x512xf32>
    %943 = arith.addf %941, %942 : vector<2x512xf32>
    %cst_421 = arith.constant 5.000000e-01 : f32
    %944 = vector.broadcast %cst_421 : f32 to vector<2x512xf32>
    %945 = arith.mulf %944, %943 : vector<2x512xf32>
    %946 = math.tanh %945 : vector<2x512xf32>
    %947 = vector.extract_strided_slice %946 {offsets = [0, 0], sizes = [2, 32], strides = [1, 1]} : vector<2x512xf32> to vector<2x32xf32>
    %cst_422 = arith.constant 1.000000e+00 : f32
    %948 = vector.broadcast %cst_422 : f32 to vector<2x32xf32>
    %949 = arith.addf %947, %948 : vector<2x32xf32>
    %cst_423 = arith.constant 5.000000e-01 : f32
    %950 = vector.broadcast %cst_423 : f32 to vector<2x32xf32>
    %951 = arith.mulf %950, %949 : vector<2x32xf32>
    %952 = vector.extract_strided_slice %946 {offsets = [0, 128], sizes = [2, 32], strides = [1, 1]} : vector<2x512xf32> to vector<2x32xf32>
    %cst_424 = arith.constant 1.000000e+00 : f32
    %953 = vector.broadcast %cst_424 : f32 to vector<2x32xf32>
    %954 = arith.addf %952, %953 : vector<2x32xf32>
    %cst_425 = arith.constant 5.000000e-01 : f32
    %955 = vector.broadcast %cst_425 : f32 to vector<2x32xf32>
    %956 = arith.mulf %955, %954 : vector<2x32xf32>
    %957 = vector.extract_strided_slice %946 {offsets = [0, 384], sizes = [2, 32], strides = [1, 1]} : vector<2x512xf32> to vector<2x32xf32>
    %cst_426 = arith.constant 1.000000e+00 : f32
    %958 = vector.broadcast %cst_426 : f32 to vector<2x32xf32>
    %959 = arith.addf %957, %958 : vector<2x32xf32>
    %cst_427 = arith.constant 5.000000e-01 : f32
    %960 = vector.broadcast %cst_427 : f32 to vector<2x32xf32>
    %961 = arith.mulf %960, %959 : vector<2x32xf32>
    %962 = vector.extract_strided_slice %943 {offsets = [0, 256], sizes = [2, 32], strides = [1, 1]} : vector<2x512xf32> to vector<2x32xf32>
    %963 = math.tanh %962 : vector<2x32xf32>
    %964 = arith.mulf %956, %937 : vector<2x32xf32>
    %965 = arith.mulf %951, %963 : vector<2x32xf32>
    %966 = arith.addf %964, %965 : vector<2x32xf32>
    %967 = math.tanh %966 : vector<2x32xf32>
    %968 = arith.mulf %961, %967 : vector<2x32xf32>
    %c14_428 = arith.constant 14 : index
    %c0_429 = arith.constant 0 : index
    %969 = vector.load %arg17[%c14_428, %c0_429] : memref<16x128xf32, #tpu.memory_space<vmem>>, vector<2x32xf32>
    tpu.vector_store %arg17[%c14_428, %c0_429], %968 {strides = array<i32>} : memref<16x128xf32, #tpu.memory_space<vmem>>, vector<2x32xf32>,
    %c0_430 = arith.constant 0 : index
    %c0_431 = arith.constant 0 : index
    %970 = vector.load %arg17[%c0_430, %c0_431] : memref<16x128xf32, #tpu.memory_space<vmem>>, vector<16x128xf32>
    %c0_432 = arith.constant 0 : index
    %c0_433 = arith.constant 0 : index
    %971 = vector.load %arg13[%c0_432, %c0_433] : memref<128x128xf32, #tpu.memory_space<vmem>>, vector<128x128xf32>
    %cst_434 = arith.constant dense<0.000000e+00> : vector<16x128xf32>
    %972 = tpu.matmul %970, %971, %cst_434 {dimension_numbers = #tpu.dot_dimension_numbers<[1], [0], [0], [1], [0, 0, 1, 1], [], []>} : vector<16x128xf32>, vector<128x128xf32>, vector<16x128xf32> -> vector<16x128xf32>
    %c0_435 = arith.constant 0 : index
    %c0_436 = arith.constant 0 : index
    %973 = vector.load %arg14[%c0_435, %c0_436] : memref<1x128xf32, #tpu.memory_space<vmem>>, vector<1x128xf32>
    %974 = vector.broadcast %973 : vector<1x128xf32> to vector<16x128xf32>
    %975 = arith.addf %972, %974 : vector<16x128xf32>
    %c0_437 = arith.constant 0 : index
    %c0_438 = arith.constant 0 : index
    %976 = vector.load %arg15[%c0_437, %c0_438] : memref<16x128xf32, #tpu.memory_space<vmem>>, vector<16x128xf32>
    tpu.vector_store %arg15[%c0_437, %c0_438], %975 {strides = array<i32>} : memref<16x128xf32, #tpu.memory_space<vmem>>, vector<16x128xf32>,
    return
  }
}

</mosaic_0001>

<bundles_post_ra>
// kernel: recurrent_autoencoder.1
= control target key start
LH: loop header
LB: loop body
LE: loop exit
PB: predicated region body
PF: predicated region fallthrough
CT: control target
= control target key end

     0   :  { %20 = vsyncpa [#allocation5], 0  ;;  %s6426_s0 = inlined_call_operand.vmem [shape: f32[16,4], index: 0, kind: input, shape index: {}]   ;;  %s6427_s1 = inlined_call_operand.vmem [shape: f32[4,512], index: 1, kind: input, shape index: {}]   ;;  %s6428_s2 = inlined_call_operand.hbm [shape: f32[32,512], index: 2, kind: input, shape index: {}]   ;;  %s6429_s3 = inlined_call_operand.vmem [shape: f32[1,512], index: 3, kind: input, shape index: {}]   ;;  %s6430_s4 = inlined_call_operand.hbm [shape: f32[128,512], index: 4, kind: input, shape index: {}]   ;;  %s6431_s5 = inlined_call_operand.hbm [shape: f32[16,512], index: 5, kind: input, shape index: {}]   ;;  %s6432_s6 = inlined_call_operand.vmem [shape: f32[1,512], index: 6, kind: input, shape index: {}]   ;;  %s6433_s7 = inlined_call_operand.hbm [shape: f32[128,512], index: 7, kind: input, shape index: {}]   ;;  %s6434_s8 = inlined_call_operand.hbm [shape: f32[16,512], index: 8, kind: input, shape index: {}]   ;;  %s6435_s9 = inlined_call_operand.vmem [shape: f32[1,512], index: 9, kind: input, shape index: {}]   ;;  %s6436_s10 = inlined_call_operand.hbm [shape: f32[128,512], index: 10, kind: input, shape index: {}]   ;;  %s6437_s11 = inlined_call_operand.hbm [shape: f32[32,512], index: 11, kind: input, shape index: {}]   ;;  %s6438_s12 = inlined_call_operand.vmem [shape: f32[1,512], index: 12, kind: input, shape index: {}]   ;;  %s6439_s13 = inlined_call_operand.hbm [shape: f32[128,128], index: 13, kind: input, shape index: {}]   ;;  %s6440_s14 = inlined_call_operand.vmem [shape: f32[1,128], index: 14, kind: input, shape index: {}]   ;;  %s6441_s15 = inlined_call_operand.vmem [shape: f32[16,128], index: 15, kind: output, shape index: {}]  }
   0x1   :  { %21 = vsyncpa [#allocation7], 0 }
   0x2   :  { %22 = vsyncpa [#allocation10], 0 }
   0x3   :  { %23 = vsyncpa [#allocation13], 0 }
   0x4   :  { %24 = vsyncpa [#allocation16], 0  ;;  %s48_s20 = sshll.u32 %s6430_s4, 4  ;;  %s5523_s21 = smov [#allocation6]   ;;  %s49_s20 = int_to_ptr.hbm [resolvable:$true] %s48_s20 }
   0x5   :  { %s50_s22 = sshll.u32 %s5523_s21, 4  ;;  %s76_s25 = sshll.u32 %s6433_s7, 4  ;;  %s51_s22 = int_to_ptr.vmem [resolvable:$true] %s50_s22  ;;  %s77_s25 = int_to_ptr.hbm [resolvable:$true] %s76_s25 }
   0x6   :  { %s5524_s26 = smov 512   ;;  %s5525_s27 = smov 32  }
   0x7   :  { %56 = dma.hbm_to_vmem [thread:$0]  %s49_s20, 8192, %s51_s22, [#allocation7], %s5524_s26, %s5524_s26, %s5525_s27  }
   0x8   :  { %s5526_s28 = smov [#allocation9]   ;;  %s104_s4 = sshll.u32 %s6436_s10, 4  ;;  %s105_s4 = int_to_ptr.hbm [resolvable:$true] %s104_s4 }
   0x9   :  { %s78_s29 = sshll.u32 %s5526_s28, 4  ;;  %s33_s18 = sshll.u32 %s6428_s2, 4  ;;  %s79_s29 = int_to_ptr.vmem [resolvable:$true] %s78_s29  ;;  %s34_s18 = int_to_ptr.hbm [resolvable:$true] %s33_s18 }
   0xa   :  { %84 = dma.hbm_to_vmem [thread:$0]  %s77_s25, 8192, %s79_s29, [#allocation10], %s5524_s26, %s5524_s26, %s5525_s27  }
   0xb   :  { %s5527_s19 = smov [#allocation12]   ;;  %s5528_s20 = smov [#allocation4]  }
   0xc   :  { %s106_s21 = sshll.u32 %s5527_s19, 4  ;;  %s35_s10 = sshll.u32 %s5528_s20, 4  ;;  %s107_s21 = int_to_ptr.vmem [resolvable:$true] %s106_s21  ;;  %s36_s10 = int_to_ptr.vmem [resolvable:$true] %s35_s10 }
   0xd   :  { %112 = dma.hbm_to_vmem [thread:$0]  %s105_s4, 8192, %s107_s21, [#allocation13], %s5524_s26, %s5524_s26, %s5525_s27  }
   0xe   :  { %s61_s24 = sshll.u32 %s6431_s5, 4  ;;  %s89_s28 = sshll.u32 %s6434_s8, 4  ;;  %s62_s24 = int_to_ptr.hbm [resolvable:$true] %s61_s24  ;;  %s90_s28 = int_to_ptr.hbm [resolvable:$true] %s89_s28 }
   0xf   :  { %41 = dma.hbm_to_vmem [thread:$0]  %s34_s18, 2048, %s36_s10, [#allocation5], %s5524_s26, %s5524_s26, %s5525_s27  }
  0x10   :  { %s5529_s29 = smov [#allocation8]   ;;  %s5530_s16 = smov [#allocation11]  }
  0x11   :  { %s63_s30 = sshll.u32 %s5529_s29, 4  ;;  %s91_s5 = sshll.u32 %s5530_s16, 4  ;;  %s64_s30 = int_to_ptr.vmem [resolvable:$true] %s63_s30  ;;  %s92_s5 = int_to_ptr.vmem [resolvable:$true] %s91_s5 }
  0x12   :  { %69 = dma.hbm_to_vmem [thread:$0]  %s62_s24, 1024, %s64_s30, [#allocation7], %s5524_s26, %s5524_s26, %s5525_s27  }
  0x13   :  { %s117_s17 = sshll.u32 %s6437_s11, 4  ;;  %s132_s19 = sshll.u32 %s6439_s13, 4  ;;  %s118_s17 = int_to_ptr.hbm [resolvable:$true] %s117_s17  ;;  %s133_s19 = int_to_ptr.hbm [resolvable:$true] %s132_s19 }
  0x14   :  { %97 = dma.hbm_to_vmem [thread:$0]  %s90_s28, 1024, %s92_s5, [#allocation10], %s5524_s26, %s5524_s26, %s5525_s27  }
  0x15   :  { %s5531_s21 = smov [#allocation14]   ;;  %s5532_s10 = smov [#allocation15]  }
  0x16   :  { %s119_s20 = sshll.u32 %s5531_s21, 4  ;;  %s134_s11 = sshll.u32 %s5532_s10, 4  ;;  %s120_s20 = int_to_ptr.vmem [resolvable:$true] %s119_s20  ;;  %s135_s11 = int_to_ptr.vmem [resolvable:$true] %s134_s11 }
  0x17   :  { %125 = dma.hbm_to_vmem [thread:$0]  %s118_s17, 2048, %s120_s20, [#allocation13], %s5524_s26, %s5524_s26, %s5525_s27  }
  0x18   :  { %s5533_s22 = smov 128   ;;  %s5534_s23 = smov 8  }
  0x19   :  { %140 = dma.hbm_to_vmem [thread:$0]  %s133_s19, 2048, %s135_s11, [#allocation16], %s5533_s22, %s5533_s22, %s5534_s23  }
  0x1a   :  { %5513 = dma.done.wait [#allocation5], 2048  }
  0x1b   :  { %5514 = vsyncadd [#allocation5], 4294965248 }
  0x1c   :  { %5515 = dma.done.wait [#allocation7], 9216  }
  0x1d   :  { %5516 = vsyncadd [#allocation7], 4294958080 }
  0x1e   :  { %5517 = dma.done.wait [#allocation10], 9216  }
  0x1f   :  { %5518 = vsyncadd [#allocation10], 4294958080 }
  0x20   :  { %5519 = dma.done.wait [#allocation13], 10240  }
  0x21   :  { %5520 = vsyncadd [#allocation13], 4294957056 }
  0x22   :  { %5521 = dma.done.wait [#allocation16], 2048  }
  0x23   :  { %5522 = vsyncadd [#allocation16], 4294965248  ;;  %v5535_v0 = vmov 0.0   ;;  %v179_v1 = vld [vmem:[%s6427_s1] sm:$0xff]  ;;  %v180_v2 = vld [vmem:[%s6427_s1 + $0x8] sm:$0xff]  ;;  %vm223_vm0 = vcmask 1043456  }
  0x24   :  { %175 = vst [vmem:[#allocation3] sm:$0xff] %v5535_v0  ;;  %v5669_v3 = vld [vmem:[#allocation4 + $0x60] sm:$0xff]  ;;  %v177_v6 = vld [vmem:[%s6426_s0] sm:$0xff]  ;;  %vm216_vm1 = vcmask 31744   ;;  %v5692_v13 = vld [vmem:[#allocation4 + $0x78] sm:$0xff]  ;;  %vm442_vm2 = vcmask 254976  }
  0x25   :  { %176 = vst [vmem:[#allocation3 + $0x8] sm:$0xff] %v5535_v0  ;;  %590 = vmatpush.msra.mxu0 %v5669_v3  ;;  %v5672_v4 = vld [vmem:[#allocation4 + $0x40] sm:$0xff]  ;;  %v5688_v12 = vld [vmem:[#allocation4 + $0x68] sm:$0xff]  ;;  %v5700_v15 = vld [vmem:[#allocation4 + $0x58] sm:$0xff]  ;;  %vm336_vm3 = vcmask 261120   ;;  %vm568_vm4 = vcmask 257026  }
  0x26   :  { %209 = vst [vmem:[#allocation1] ss:$2 sm:$0xff] %v179_v1  ;;  %v5675_v5 = vld [vmem:[#allocation4 + $0x20] sm:$0xff]  ;;  %v5696_v14 = vld [vmem:[#allocation4 + $0x48] sm:$0xff]  ;;  %v178_v17 = vld [vmem:[%s6426_s0 + $0x8] sm:$0xff]  ;;  %vm695_vm5 = vcmask 259076  }
  0x27   :  { %211 = vst [vmem:[#allocation1 + $0x10] ss:$2 sm:$0xff] %v180_v2  ;;  %591 = vmatpush.msra.mxu0 %v5672_v4  ;;  %v5681_v7 = vld [vmem:[#allocation4] sm:$0xff]  ;;  %v5704_v16 = vld [vmem:[#allocation4 + $0x28] sm:$0xff]  ;;  %v5715_v19 = vld [vmem:[#allocation4 + $0x70] sm:$0xff]  ;;  %vm822_vm6 = vcmask 261126  }
  0x28   :  { %v5713_v18 = vld [vmem:[#allocation4 + $0x8] sm:$0xff]  ;;  %v5718_v20 = vld [vmem:[#allocation4 + $0x38] sm:$0xff]  ;;  %v5724_v21 = vld [vmem:[#allocation4 + $0x50] sm:$0xff]  ;;  %vm1608_vm7 = vcmask 123904   ;;  %vm1503_vm8 = vcmask 130048   ;;  %vm1734_vm9 = vcmask 125954  }
  0x29   :  { %592 = vmatpush.msra.mxu0 %v5675_v5  ;;  %v5727_v22 = vld [vmem:[#allocation4 + $0x18] sm:$0xff]  ;;  %v5731_v23 = vld [vmem:[#allocation4 + $0x30] sm:$0xff]  ;;  %v197_v25 = vld [vmem:[%s6429_s3] sm:$0xf]  ;;  %vm1861_vm10 = vcmask 128004   ;;  %vm1988_vm11 = vcmask 130054  }
  0x2a   :  { %v5737_v24 = vld [vmem:[#allocation4 + $0x10] sm:$0xff]  ;;  %v199_v26 = vperm.slane %v197_v25, 0  ;;  %v201_v29 = vperm.slane %v197_v25, 2  ;;  %v202_v30 = vperm.slane %v197_v25, 3  ;;  %v200_v37 = vperm.slane %v197_v25, 1 }
  0x2b   :  { %593 = vmatpush.msra.mxu0 %v5681_v7 }
  0x2d   :  { %v212_v8 = vld.sshfl [vmem:[#allocation1] sm:$0xff pattern:$0x75316420]  ;;  %v213_v9 = vld.sshfl [vmem:[#allocation1 + $0x8] sm:$0xff pattern:$0x75316420]  ;;  %717 = vmatpush.msrb.mxu0 %v5669_v3 }
  0x2e   :  { %4863 = vmatpush.msk.msra.mxu1 %vm223_vm0, %v212_v8  ;;  %v214_v10 = vld.sshfl [vmem:[#allocation1 + $0x10] sm:$0xff pattern:$0x75316420]  ;;  %v215_v11 = vld.sshfl [vmem:[#allocation1 + $0x18] sm:$0xff pattern:$0x75316420] }
  0x2f   :  { %4869 = vmatpush.msk.msra.mxu2 %vm223_vm0, %v214_v10  ;;  %4864 = vmatmul.msk.f32.vlgmr.msra.gmra.mxu1 %vm216_vm1, %v177_v6 }
  0x30   :  { %4866 = vmatpush.msk.msrb.mxu1 %vm223_vm0, %v213_v9  ;;  %4870 = vmatmul.msk.f32.vlgmr.msra.gmra.mxu2 %vm216_vm1, %v177_v6 }
  0x31   :  { %352 = vmatpush.msrb.mxu2 %v5669_v3  ;;  %4872 = vmatpush.msk.msra.mxu3 %vm223_vm0, %v215_v11 }
  0x32   :  { %4873 = vmatmul.msk.f32.vlgmr.msra.gmra.mxu3 %vm216_vm1, %v177_v6  ;;  %372 = vmatpush.msra.mxu1 %v5688_v12 }
  0x33   :  { %353 = vmatpush.msrb.mxu2 %v5672_v4  ;;  %412 = vmatpush.msrb.mxu3 %v5692_v13 }
  0x34   :  { %373 = vmatpush.msra.mxu1 %v5696_v14  ;;  %718 = vmatpush.msrb.mxu0 %v5672_v4 }
  0x35   :  { %354 = vmatpush.msrb.mxu2 %v5675_v5  ;;  %413 = vmatpush.msrb.mxu3 %v5700_v15 }
  0x36   :  { %374 = vmatpush.msra.mxu1 %v5704_v16  ;;  %719 = vmatpush.msrb.mxu0 %v5675_v5 }
  0x37   :  { %4865 = vmatmul.msk.f32.gmra.mxu1 %vm216_vm1, %v178_v17  ;;  %355 = vmatpush.msrb.mxu2 %v5681_v7 }
  0x38   :  { %4871 = vmatmul.msk.f32.gmra.mxu2 %vm216_vm1, %v178_v17  ;;  %375 = vmatpush.msra.mxu1 %v5713_v18 }
  0x39   :  { %392 = vmatpush.msra.mxu2 %v5715_v19  ;;  %414 = vmatpush.msrb.mxu3 %v5718_v20 }
  0x3a   :  { %4874 = vmatmul.msk.f32.gmra.mxu3 %vm216_vm1, %v178_v17  ;;  %720 = vmatpush.msrb.mxu0 %v5681_v7 }
  0x3b   :  { %393 = vmatpush.msra.mxu2 %v5724_v21  ;;  %415 = vmatpush.msrb.mxu3 %v5727_v22 }
  0x3d   :  { %463 = vmatpush.msra.mxu3 %v5669_v3  ;;  %394 = vmatpush.msra.mxu2 %v5731_v23 }
  0x3f   :  { %464 = vmatpush.msra.mxu3 %v5672_v4  ;;  %4867 = vmatmul.msk.f32.vlgmr.msrb.gmra.mxu1 %vm216_vm1, %v177_v6 }
  0x40   :  { %395 = vmatpush.msra.mxu2 %v5737_v24  ;;  %483 = vmatpush.msrb.mxu1 %v5688_v12 }
  0x41   :  { %356 = vmatmul.f32.vlgmr.msrb.gmra.mxu2 %v5535_v0  ;;  %465 = vmatpush.msra.mxu3 %v5675_v5 }
  0x42   :  { %503 = vmatpush.msrb.mxu2 %v5715_v19  ;;  %416 = vmatmul.f32.vlgmr.msrb.gmra.mxu3 %v5535_v0 }
  0x43   :  { %484 = vmatpush.msrb.mxu1 %v5696_v14  ;;  %466 = vmatpush.msra.mxu3 %v5681_v7 }
  0x44   :  { %504 = vmatpush.msrb.mxu2 %v5724_v21 }
  0x45   :  { %485 = vmatpush.msrb.mxu1 %v5704_v16  ;;  %523 = vmatpush.msrb.mxu3 %v5692_v13 }
  0x46   :  { %505 = vmatpush.msrb.mxu2 %v5731_v23 }
  0x47   :  { %486 = vmatpush.msrb.mxu1 %v5713_v18  ;;  %524 = vmatpush.msrb.mxu3 %v5700_v15 }
  0x48   :  { %4868 = vmatmul.msk.f32.gmra.mxu1 %vm216_vm1, %v178_v17  ;;  %506 = vmatpush.msrb.mxu2 %v5737_v24 }
  0x49   :  { %396 = vmatmul.f32.vlgmr.msra.gmra.mxu2 %v5535_v0  ;;  %525 = vmatpush.msrb.mxu3 %v5718_v20 }
  0x4a   :  { %630 = vmatpush.msra.mxu2 %v5715_v19 }
  0x4b   :  { %526 = vmatpush.msrb.mxu3 %v5727_v22 }
  0x4c   :  { %631 = vmatpush.msra.mxu2 %v5724_v21 }
  0x4e   :  { %632 = vmatpush.msra.mxu2 %v5731_v23 }
  0x50   :  { %376 = vmatmul.f32.vlgmr.msra.gmra.mxu1 %v5535_v0  ;;  %633 = vmatpush.msra.mxu2 %v5737_v24 }
  0x51   :  { %610 = vmatpush.msra.mxu1 %v5688_v12 }
  0x53   :  { %611 = vmatpush.msra.mxu1 %v5696_v14 }
  0x55   :  { %612 = vmatpush.msra.mxu1 %v5704_v16 }
  0x57   :  { %613 = vmatpush.msra.mxu1 %v5713_v18 }
  0xac   :  { %v249_v27 = vpop.f32.mrf.mxu1 }
  0xad   :  { %v250_v28 = vadd.f32 %v249_v27, %v199_v26 }
  0xaf   :  { %324 = vst [vmem:[#allocation2 + $0x30] sm:$0xff] %v250_v28 }
  0xb3   :  { %v295_v31 = vpop.f32.mrf.mxu2 }
  0xb4   :  { %v296_v32 = vadd.f32 %v295_v31, %v201_v29  ;;  %v252_v33 = vpop.f32.mrf.mxu1 }
  0xb5   :  { %v253_v34 = vadd.f32 %v252_v33, %v199_v26  ;;  %v318_v35 = vpop.f32.mrf.mxu3 }
  0xb6   :  { %326 = vst [vmem:[#allocation2 + $0x18] sm:$0xff] %v296_v32  ;;  %v319_v36 = vadd.f32 %v318_v35, %v202_v30  ;;  %v332_v45 = vld [vmem:[#allocation2 + $0x30] sm:$0x3] }
  0xb7   :  { %328 = vst [vmem:[#allocation2 + $0x8] sm:$0xff] %v253_v34 }
  0xb8   :  { %327 = vst [vmem:[#allocation2 + $0x10] sm:$0xff] %v319_v36 }
  0xbb   :  { %v298_v38 = vpop.f32.mrf.mxu2 }
  0xbc   :  { %v299_v39 = vadd.f32 %v298_v38, %v201_v29  ;;  %v272_v40 = vpop.f32.mrf.mxu1 }
  0xbd   :  { %v273_v41 = vadd.f32 %v272_v40, %v200_v37  ;;  %v321_v42 = vpop.f32.mrf.mxu3  ;;  %v334_v56 = vld [vmem:[#allocation2 + $0x18] sm:$0x3] }
  0xbe   :  { %330 = vst [vmem:[#allocation2 + $0x28] sm:$0xff] %v299_v39  ;;  %v322_v43 = vadd.f32 %v321_v42, %v202_v30 }
  0xbf   :  { %325 = vst [vmem:[#allocation2] sm:$0xff] %v273_v41  ;;  %v335_v54 = vld [vmem:[#allocation2 + $0x10] sm:$0x3]  ;;  %v446_v41 = vld [vmem:[#allocation2 + $0x18] sm:$0xc] }
  0xc0   :  { %331 = vst [vmem:[#allocation2 + $0x38] sm:$0xff] %v322_v43 }
  0xc4   :  { %v357_v44 = vpop.f32.mrf.mxu2 }
  0xc5   :  { %v275_v46 = vpop.f32.mrf.mxu1  ;;  %v420_v47 = vadd.f32 %v357_v44, %v332_v45  ;;  %v417_v55 = vpop.f32.mrf.mxu3 }
  0xc6   :  { %v276_v48 = vadd.f32 %v275_v46, %v200_v37  ;;  %v333_v51 = vld [vmem:[#allocation2] sm:$0x3]  ;;  %v423_v59 = vadd.f32 %v417_v55, %v335_v54  ;;  %v445_v31 = vld [vmem:[#allocation2] sm:$0xc]  ;;  %v444_v37 = vld [vmem:[#allocation2 + $0x30] sm:$0xc] }
  0xc7   :  { %v424_v49 = vmul.f32 0.5, %v420_v47  ;;  %v447_v47 = vld [vmem:[#allocation2 + $0x10] sm:$0xc] }
  0xc8   :  { %329 = vst [vmem:[#allocation2 + $0x20] sm:$0xff] %v276_v48  ;;  %v426_v61 = vmul.f32 0.5, %v423_v59 }
  0xc9   :  { %5001 = vtanh.f32 %v424_v49 }
  0xcc   :  { %v397_v50 = vpop.f32.mrf.mxu2 }
  0xcd   :  { %v377_v52 = vpop.f32.mrf.mxu1  ;;  %v422_v57 = vadd.f32 %v397_v50, %v334_v56 }
  0xce   :  { %v421_v53 = vadd.f32 %v377_v52, %v333_v51 }
  0xcf   :  { %v5002_v60 = vpop.eup %5001 }
  0xd0   :  { %v425_v58 = vmul.f32 0.5, %v421_v53  ;;  %v430_v62 = vadd.f32 1.0, %v5002_v60 }
  0xd2   :  { %5003 = vtanh.f32 %v425_v58  ;;  %v431_v6 = vmul.f32 0.5, %v430_v62 }
  0xd3   :  { %5005 = vtanh.f32 %v422_v57 }
  0xd4   :  { %5007 = vtanh.f32 %v426_v61 }
  0xd8   :  { %v5004_v63 = vpop.eup %5003 }
  0xd9   :  { %v432_v1 = vadd.f32 1.0, %v5004_v63  ;;  %v5006_v2 = vpop.eup %5005 }
  0xda   :  { %v438_v9 = vmul.f32 %v5006_v2, %v431_v6  ;;  %v5008_v11 = vpop.eup %5007 }
  0xdb   :  { %v433_v8 = vmul.f32 0.5, %v432_v1  ;;  %v434_v25 = vadd.f32 1.0, %v5008_v11  ;;  %v571_v11 = vld [vmem:[#allocation2] sm:$0x30] }
  0xdd   :  { %v437_v10 = vmul.f32 0.0, %v433_v8  ;;  %v435_v26 = vmul.f32 0.5, %v434_v25 }
  0xdf   :  { %v439_v17 = vadd.f32 %v438_v9, %v437_v10  ;;  %v570_v10 = vld [vmem:[#allocation2 + $0x30] sm:$0x30] }
  0xe1   :  { %5009 = vtanh.f32 %v439_v17  ;;  %v561_v53 = vrot.slane %v439_v17, 6 }
  0xe7   :  { %v5010_v27 = vpop.eup %5009 }
  0xe8   :  { %v441_v28 = vmul.f32 %v5010_v27, %v435_v26 }
  0xea   :  { %443 = vst.msk [vmem:[#allocation3] sm:$0x3] %vm442_vm2, %v441_v28  ;;  %4875 = vmatmul.msk.f32.vlgmr.msra.gmra.mxu3 %vm336_vm3, %v441_v28  ;;  %4876 = vmatmul.msk.f32.vlgmr.msrb.gmra.mxu1 %vm336_vm3, %v441_v28 }
  0xeb   :  { %4877 = vmatmul.msk.f32.vlgmr.msrb.gmra.mxu2 %vm336_vm3, %v441_v28  ;;  %650 = vmatpush.msra.mxu3 %v5692_v13 }
  0xec   :  { %737 = vmatpush.msrb.mxu1 %v5688_v12  ;;  %757 = vmatpush.msrb.mxu2 %v5715_v19 }
  0xed   :  { %651 = vmatpush.msra.mxu3 %v5700_v15 }
  0xee   :  { %738 = vmatpush.msrb.mxu1 %v5696_v14  ;;  %758 = vmatpush.msrb.mxu2 %v5724_v21 }
  0xef   :  { %652 = vmatpush.msra.mxu3 %v5718_v20 }
  0xf0   :  { %739 = vmatpush.msrb.mxu1 %v5704_v16  ;;  %759 = vmatpush.msrb.mxu2 %v5731_v23 }
  0xf1   :  { %653 = vmatpush.msra.mxu3 %v5727_v22 }
  0xf2   :  { %4878 = vmatmul.msk.f32.vlgmr.msrb.gmra.mxu3 %vm336_vm3, %v441_v28  ;;  %740 = vmatpush.msrb.mxu1 %v5713_v18 }
  0xf3   :  { %777 = vmatpush.msrb.mxu3 %v5692_v13  ;;  %760 = vmatpush.msrb.mxu2 %v5737_v24 }
  0xf5   :  { %778 = vmatpush.msrb.mxu3 %v5700_v15 }
  0xf7   :  { %779 = vmatpush.msrb.mxu3 %v5718_v20 }
  0xf9   :  { %780 = vmatpush.msrb.mxu3 %v5727_v22 }
 0x167   :  { %v488_v29 = vpop.f32.mrf.mxu1 }
 0x168   :  { %v536_v30 = vrot.slane %v488_v29, 6 }
 0x16a   :  { %v544_v32 = vadd.f32 %v536_v30, %v445_v31 }
 0x16c   :  { %v548_v33 = vmul.f32 0.5, %v544_v32  ;;  %v572_v32 = vld [vmem:[#allocation2 + $0x18] sm:$0x30] }
 0x16d   :  { %v468_v34 = vpop.f32.mrf.mxu3 }
 0x16e   :  { %5011 = vtanh.f32 %v548_v33  ;;  %v535_v35 = vrot.slane %v468_v34, 6  ;;  %v508_v36 = vpop.f32.mrf.mxu2  ;;  %v573_v33 = vld [vmem:[#allocation2 + $0x10] sm:$0x30] }
 0x16f   :  { %v537_v39 = vrot.slane %v508_v36, 6 }
 0x170   :  { %v543_v38 = vadd.f32 %v535_v35, %v444_v37 }
 0x171   :  { %v545_v43 = vadd.f32 %v537_v39, %v446_v41 }
 0x172   :  { %v547_v40 = vmul.f32 0.5, %v543_v38 }
 0x174   :  { %v5012_v42 = vpop.eup %5011  ;;  %5013 = vtanh.f32 %v547_v40 }
 0x175   :  { %v528_v44 = vpop.f32.mrf.mxu3  ;;  %v555_v46 = vadd.f32 1.0, %v5012_v42  ;;  %5015 = vtanh.f32 %v545_v43 }
 0x176   :  { %v538_v45 = vrot.slane %v528_v44, 6 }
 0x177   :  { %v556_v51 = vmul.f32 0.5, %v555_v46 }
 0x178   :  { %v546_v48 = vadd.f32 %v538_v45, %v447_v47 }
 0x179   :  { %v563_v56 = vmul.f32 %v561_v53, %v556_v51 }
 0x17a   :  { %v5014_v49 = vpop.eup %5013  ;;  %v549_v50 = vmul.f32 0.5, %v546_v48 }
 0x17b   :  { %v553_v52 = vadd.f32 1.0, %v5014_v49  ;;  %v5016_v55 = vpop.eup %5015 }
 0x17c   :  { %5017 = vtanh.f32 %v549_v50 }
 0x17d   :  { %v554_v54 = vmul.f32 0.5, %v553_v52 }
 0x17f   :  { %v564_v57 = vmul.f32 %v5016_v55, %v554_v54 }
 0x181   :  { %v565_v58 = vadd.f32 %v564_v57, %v563_v56 }
 0x182   :  { %v5018_v59 = vpop.eup %5017 }
 0x183   :  { %5019 = vtanh.f32 %v565_v58  ;;  %v557_v60 = vadd.f32 1.0, %v5018_v59  ;;  %v688_v43 = vrot.slane %v565_v58, 6  ;;  %v697_v58 = vld [vmem:[#allocation2 + $0x30] sm:$0xc0]  ;;  %v698_v59 = vld [vmem:[#allocation2] sm:$0xc0] }
 0x185   :  { %v558_v61 = vmul.f32 0.5, %v557_v60 }
 0x189   :  { %v5020_v62 = vpop.eup %5019 }
 0x18a   :  { %v567_v63 = vmul.f32 %v5020_v62, %v558_v61 }
 0x18c   :  { %569 = vst.msk [vmem:[#allocation3] sm:$0xc] %vm568_vm4, %v567_v63  ;;  %v575_v1 = vrot.slane %v567_v63, 2 }
 0x18e   :  { %4879 = vmatmul.msk.f32.vlgmr.msra.gmra.mxu0 %vm336_vm3, %v575_v1  ;;  %4880 = vmatmul.msk.f32.vlgmr.msra.gmra.mxu1 %vm336_vm3, %v575_v1 }
 0x18f   :  { %4881 = vmatmul.msk.f32.vlgmr.msra.gmra.mxu2 %vm336_vm3, %v575_v1  ;;  %4882 = vmatmul.msk.f32.vlgmr.msra.gmra.mxu3 %vm336_vm3, %v575_v1 }
 0x190   :  { %844 = vmatpush.msra.mxu0 %v5669_v3  ;;  %864 = vmatpush.msra.mxu1 %v5688_v12 }
 0x191   :  { %884 = vmatpush.msra.mxu2 %v5715_v19  ;;  %904 = vmatpush.msra.mxu3 %v5692_v13 }
 0x192   :  { %845 = vmatpush.msra.mxu0 %v5672_v4  ;;  %865 = vmatpush.msra.mxu1 %v5696_v14 }
 0x193   :  { %885 = vmatpush.msra.mxu2 %v5724_v21  ;;  %905 = vmatpush.msra.mxu3 %v5700_v15 }
 0x194   :  { %846 = vmatpush.msra.mxu0 %v5675_v5  ;;  %866 = vmatpush.msra.mxu1 %v5704_v16 }
 0x195   :  { %886 = vmatpush.msra.mxu2 %v5731_v23  ;;  %906 = vmatpush.msra.mxu3 %v5718_v20 }
 0x196   :  { %847 = vmatpush.msra.mxu0 %v5681_v7  ;;  %867 = vmatpush.msra.mxu1 %v5713_v18 }
 0x197   :  { %887 = vmatpush.msra.mxu2 %v5737_v24  ;;  %907 = vmatpush.msra.mxu3 %v5727_v22 }
 0x20b   :  { %v595_v2 = vpop.f32.mrf.mxu0  ;;  %v615_v6 = vpop.f32.mrf.mxu1 }
 0x20c   :  { %v662_v8 = vrot.slane %v595_v2, 4  ;;  %v663_v9 = vrot.slane %v615_v6, 4 }
 0x20e   :  { %v670_v17 = vadd.f32 %v662_v8, %v570_v10  ;;  %v671_v25 = vadd.f32 %v663_v9, %v571_v11  ;;  %v699_v9 = vld [vmem:[#allocation2 + $0x18] sm:$0xc0]  ;;  %v700_v10 = vld [vmem:[#allocation2 + $0x10] sm:$0xc0] }
 0x210   :  { %v674_v26 = vmul.f32 0.5, %v670_v17  ;;  %v675_v27 = vmul.f32 0.5, %v671_v25 }
 0x212   :  { %5021 = vtanh.f32 %v674_v26  ;;  %v635_v28 = vpop.f32.mrf.mxu2  ;;  %v655_v29 = vpop.f32.mrf.mxu3 }
 0x213   :  { %5023 = vtanh.f32 %v675_v27  ;;  %v664_v30 = vrot.slane %v635_v28, 4  ;;  %v665_v31 = vrot.slane %v655_v29, 4 }
 0x215   :  { %v672_v34 = vadd.f32 %v664_v30, %v572_v32  ;;  %v673_v35 = vadd.f32 %v665_v31, %v573_v33 }
 0x217   :  { %5025 = vtanh.f32 %v672_v34  ;;  %v676_v36 = vmul.f32 0.5, %v673_v35 }
 0x218   :  { %v5022_v37 = vpop.eup %5021 }
 0x219   :  { %v5024_v38 = vpop.eup %5023  ;;  %v680_v39 = vadd.f32 1.0, %v5022_v37  ;;  %5027 = vtanh.f32 %v676_v36 }
 0x21a   :  { %v682_v40 = vadd.f32 1.0, %v5024_v38 }
 0x21b   :  { %v681_v41 = vmul.f32 0.5, %v680_v39 }
 0x21c   :  { %v683_v42 = vmul.f32 0.5, %v682_v40 }
 0x21d   :  { %v5026_v44 = vpop.eup %5025 }
 0x21e   :  { %v690_v45 = vmul.f32 %v688_v43, %v683_v42  ;;  %v691_v46 = vmul.f32 %v5026_v44, %v681_v41  ;;  %v824_v43 = vld [vmem:[#allocation2 + $0x8] sm:$0x3] }
 0x21f   :  { %v5028_v47 = vpop.eup %5027 }
 0x220   :  { %v692_v48 = vadd.f32 %v691_v46, %v690_v45  ;;  %v684_v49 = vadd.f32 1.0, %v5028_v47  ;;  %v825_v45 = vld [vmem:[#allocation2 + $0x20] sm:$0x3] }
 0x222   :  { %5029 = vtanh.f32 %v692_v48  ;;  %v685_v50 = vmul.f32 0.5, %v684_v49  ;;  %v815_v32 = vrot.slane %v692_v48, 6 }
 0x228   :  { %v5030_v51 = vpop.eup %5029 }
 0x229   :  { %v694_v52 = vmul.f32 %v5030_v51, %v685_v50  ;;  %v826_v51 = vld [vmem:[#allocation2 + $0x28] sm:$0x3] }
 0x22b   :  { %696 = vst.msk [vmem:[#allocation3] sm:$0x30] %vm695_vm5, %v694_v52  ;;  %v702_v53 = vrot.slane %v694_v52, 4 }
 0x22d   :  { %4883 = vmatmul.msk.f32.vlgmr.msrb.gmra.mxu0 %vm336_vm3, %v702_v53  ;;  %4884 = vmatmul.msk.f32.vlgmr.msrb.gmra.mxu1 %vm336_vm3, %v702_v53 }
 0x22e   :  { %4885 = vmatmul.msk.f32.vlgmr.msrb.gmra.mxu2 %vm336_vm3, %v702_v53  ;;  %4886 = vmatmul.msk.f32.vlgmr.msrb.gmra.mxu3 %vm336_vm3, %v702_v53  ;;  %v827_v53 = vld [vmem:[#allocation2 + $0x38] sm:$0x3] }
 0x22f   :  { %957 = vmatpush.msrb.mxu0 %v5669_v3  ;;  %977 = vmatpush.msrb.mxu1 %v5688_v12 }
 0x230   :  { %997 = vmatpush.msrb.mxu2 %v5715_v19  ;;  %1017 = vmatpush.msrb.mxu3 %v5692_v13 }
 0x231   :  { %958 = vmatpush.msrb.mxu0 %v5672_v4  ;;  %978 = vmatpush.msrb.mxu1 %v5696_v14 }
 0x232   :  { %998 = vmatpush.msrb.mxu2 %v5724_v21  ;;  %1018 = vmatpush.msrb.mxu3 %v5700_v15 }
 0x233   :  { %959 = vmatpush.msrb.mxu0 %v5675_v5  ;;  %979 = vmatpush.msrb.mxu1 %v5704_v16 }
 0x234   :  { %999 = vmatpush.msrb.mxu2 %v5731_v23  ;;  %1019 = vmatpush.msrb.mxu3 %v5718_v20 }
 0x235   :  { %960 = vmatpush.msrb.mxu0 %v5681_v7  ;;  %980 = vmatpush.msrb.mxu1 %v5713_v18 }
 0x236   :  { %1000 = vmatpush.msrb.mxu2 %v5737_v24  ;;  %1020 = vmatpush.msrb.mxu3 %v5727_v22 }
 0x2aa   :  { %v722_v54 = vpop.f32.mrf.mxu0  ;;  %v742_v55 = vpop.f32.mrf.mxu1 }
 0x2ab   :  { %v789_v56 = vrot.slane %v722_v54, 2  ;;  %v790_v57 = vrot.slane %v742_v55, 2 }
 0x2ad   :  { %v797_v60 = vadd.f32 %v789_v56, %v697_v58  ;;  %v798_v61 = vadd.f32 %v790_v57, %v698_v59 }
 0x2af   :  { %v801_v62 = vmul.f32 0.5, %v797_v60  ;;  %v802_v63 = vmul.f32 0.5, %v798_v61 }
 0x2b1   :  { %5031 = vtanh.f32 %v801_v62  ;;  %v762_v1 = vpop.f32.mrf.mxu2  ;;  %v782_v2 = vpop.f32.mrf.mxu3 }
 0x2b2   :  { %5033 = vtanh.f32 %v802_v63  ;;  %v791_v6 = vrot.slane %v762_v1, 2  ;;  %v792_v8 = vrot.slane %v782_v2, 2 }
 0x2b4   :  { %v799_v11 = vadd.f32 %v791_v6, %v699_v9  ;;  %v800_v17 = vadd.f32 %v792_v8, %v700_v10 }
 0x2b6   :  { %5035 = vtanh.f32 %v799_v11  ;;  %v803_v25 = vmul.f32 0.5, %v800_v17 }
 0x2b7   :  { %v5032_v26 = vpop.eup %5031 }
 0x2b8   :  { %v5034_v27 = vpop.eup %5033  ;;  %v807_v28 = vadd.f32 1.0, %v5032_v26  ;;  %5037 = vtanh.f32 %v803_v25 }
 0x2b9   :  { %v809_v29 = vadd.f32 1.0, %v5034_v27  ;;  %v940_v27 = vld [vmem:[#allocation2 + $0x28] sm:$0xc] }
 0x2ba   :  { %v808_v30 = vmul.f32 0.5, %v807_v28 }
 0x2bb   :  { %v810_v31 = vmul.f32 0.5, %v809_v29 }
 0x2bc   :  { %v5036_v33 = vpop.eup %5035 }
 0x2bd   :  { %v817_v34 = vmul.f32 %v815_v32, %v810_v31  ;;  %v818_v35 = vmul.f32 %v5036_v33, %v808_v30 }
 0x2be   :  { %v5038_v36 = vpop.eup %5037 }
 0x2bf   :  { %v819_v37 = vadd.f32 %v818_v35, %v817_v34  ;;  %v811_v38 = vadd.f32 1.0, %v5038_v36 }
 0x2c1   :  { %5039 = vtanh.f32 %v819_v37  ;;  %v812_v39 = vmul.f32 0.5, %v811_v38  ;;  %v930_v1 = vrot.slane %v819_v37, 6 }
 0x2c7   :  { %v5040_v40 = vpop.eup %5039 }
 0x2c8   :  { %v821_v41 = vmul.f32 %v5040_v40, %v812_v39 }
 0x2ca   :  { %823 = vst.msk [vmem:[#allocation3] sm:$0xc0] %vm822_vm6, %v821_v41  ;;  %v829_v42 = vrot.slane %v821_v41, 6 }
 0x2cc   :  { %4887 = vmatmul.msk.f32.vlgmr.msra.gmra.mxu0 %vm336_vm3, %v829_v42  ;;  %4888 = vmatmul.msk.f32.vlgmr.msra.gmra.mxu1 %vm336_vm3, %v829_v42 }
 0x2cd   :  { %4889 = vmatmul.msk.f32.vlgmr.msra.gmra.mxu2 %vm336_vm3, %v829_v42  ;;  %4890 = vmatmul.msk.f32.vlgmr.msra.gmra.mxu3 %vm336_vm3, %v829_v42 }
 0x2ce   :  { %1083 = vmatpush.msra.mxu0 %v5669_v3  ;;  %1103 = vmatpush.msra.mxu1 %v5688_v12 }
 0x2cf   :  { %1123 = vmatpush.msra.mxu2 %v5715_v19  ;;  %1143 = vmatpush.msra.mxu3 %v5692_v13 }
 0x2d0   :  { %1084 = vmatpush.msra.mxu0 %v5672_v4  ;;  %1104 = vmatpush.msra.mxu1 %v5696_v14 }
 0x2d1   :  { %1124 = vmatpush.msra.mxu2 %v5724_v21  ;;  %1144 = vmatpush.msra.mxu3 %v5700_v15 }
 0x2d2   :  { %1085 = vmatpush.msra.mxu0 %v5675_v5  ;;  %1105 = vmatpush.msra.mxu1 %v5704_v16 }
 0x2d3   :  { %1125 = vmatpush.msra.mxu2 %v5731_v23  ;;  %1145 = vmatpush.msra.mxu3 %v5718_v20 }
 0x2d4   :  { %1086 = vmatpush.msra.mxu0 %v5681_v7  ;;  %1106 = vmatpush.msra.mxu1 %v5713_v18 }
 0x2d5   :  { %1126 = vmatpush.msra.mxu2 %v5737_v24  ;;  %1146 = vmatpush.msra.mxu3 %v5727_v22 }
 0x349   :  { %v849_v44 = vpop.f32.mrf.mxu0  ;;  %v869_v46 = vpop.f32.mrf.mxu1 }
 0x34a   :  { %v912_v47 = vadd.f32 %v849_v44, %v824_v43  ;;  %v913_v48 = vadd.f32 %v869_v46, %v825_v45 }
 0x34c   :  { %v916_v49 = vmul.f32 0.5, %v912_v47  ;;  %v917_v50 = vmul.f32 0.5, %v913_v48  ;;  %v1377_v47 = vld [vmem:[#allocation6 + $0x1e0] sm:$0xff]  ;;  %v1378_v48 = vld [vmem:[#allocation6 + $0x1e8] sm:$0xff] }
 0x34e   :  { %5041 = vtanh.f32 %v916_v49  ;;  %v1379_v49 = vld [vmem:[#allocation6 + $0x1f0] sm:$0xff] }
 0x34f   :  { %5043 = vtanh.f32 %v917_v50  ;;  %v1380_v50 = vld [vmem:[#allocation6 + $0x1f8] sm:$0xff] }
 0x350   :  { %v889_v52 = vpop.f32.mrf.mxu2  ;;  %v909_v54 = vpop.f32.mrf.mxu3 }
 0x351   :  { %v914_v55 = vadd.f32 %v889_v52, %v826_v51  ;;  %v915_v56 = vadd.f32 %v909_v54, %v827_v53  ;;  %v1373_v51 = vld [vmem:[#allocation6 + $0x1c0] sm:$0xff]  ;;  %v1374_v52 = vld [vmem:[#allocation6 + $0x1c8] sm:$0xff]  ;;  %v1375_v53 = vld [vmem:[#allocation6 + $0x1d0] sm:$0xff] }
 0x352   :  { %v1376_v54 = vld [vmem:[#allocation6 + $0x1d8] sm:$0xff] }
 0x353   :  { %5045 = vtanh.f32 %v914_v55  ;;  %v918_v57 = vmul.f32 0.5, %v915_v56  ;;  %v1369_v55 = vld [vmem:[#allocation6 + $0x1a0] sm:$0xff]  ;;  %v1370_v56 = vld [vmem:[#allocation6 + $0x1a8] sm:$0xff] }
 0x354   :  { %v5042_v58 = vpop.eup %5041 }
 0x355   :  { %v5044_v59 = vpop.eup %5043  ;;  %v922_v60 = vadd.f32 1.0, %v5042_v58  ;;  %5047 = vtanh.f32 %v918_v57  ;;  %v1371_v57 = vld [vmem:[#allocation6 + $0x1b0] sm:$0xff]  ;;  %v1372_v58 = vld [vmem:[#allocation6 + $0x1b8] sm:$0xff] }
 0x356   :  { %v924_v61 = vadd.f32 1.0, %v5044_v59  ;;  %v1365_v59 = vld [vmem:[#allocation6 + $0x180] sm:$0xff] }
 0x357   :  { %v923_v62 = vmul.f32 0.5, %v922_v60  ;;  %v1366_v60 = vld [vmem:[#allocation6 + $0x188] sm:$0xff] }
 0x358   :  { %v925_v63 = vmul.f32 0.5, %v924_v61  ;;  %v1367_v61 = vld [vmem:[#allocation6 + $0x190] sm:$0xff] }
 0x359   :  { %v5046_v2 = vpop.eup %5045 }
 0x35a   :  { %v932_v6 = vmul.f32 %v930_v1, %v925_v63  ;;  %v933_v8 = vmul.f32 %v5046_v2, %v923_v62  ;;  %v1368_v62 = vld [vmem:[#allocation6 + $0x198] sm:$0xff]  ;;  %v1361_v63 = vld [vmem:[#allocation6 + $0x160] sm:$0xff]  ;;  %v1362_v1 = vld [vmem:[#allocation6 + $0x168] sm:$0xff] }
 0x35b   :  { %v5048_v9 = vpop.eup %5047  ;;  %v1363_v2 = vld [vmem:[#allocation6 + $0x170] sm:$0xff] }
 0x35c   :  { %v934_v10 = vadd.f32 %v933_v8, %v932_v6  ;;  %v926_v11 = vadd.f32 1.0, %v5048_v9  ;;  %v1364_v6 = vld [vmem:[#allocation6 + $0x178] sm:$0xff]  ;;  %v1357_v8 = vld [vmem:[#allocation6 + $0x140] sm:$0xff]  ;;  %v1358_v9 = vld [vmem:[#allocation6 + $0x148] sm:$0xff] }
 0x35e   :  { %5049 = vtanh.f32 %v934_v10  ;;  %v927_v17 = vmul.f32 0.5, %v926_v11  ;;  %v1055_v36 = vrot.slane %v934_v10, 6  ;;  %v1359_v10 = vld [vmem:[#allocation6 + $0x150] sm:$0xff]  ;;  %v1360_v11 = vld [vmem:[#allocation6 + $0x158] sm:$0xff] }
 0x364   :  { %v5050_v25 = vpop.eup %5049 }
 0x365   :  { %v936_v26 = vmul.f32 %v5050_v25, %v927_v17  ;;  %v1353_v17 = vld [vmem:[#allocation6 + $0x120] sm:$0xff]  ;;  %v1354_v25 = vld [vmem:[#allocation6 + $0x128] sm:$0xff] }
 0x367   :  { %937 = vst.msk [vmem:[#allocation3 + $0x8] sm:$0x3] %vm442_vm2, %v936_v26  ;;  %4891 = vmatmul.msk.f32.vlgmr.msrb.gmra.mxu0 %vm336_vm3, %v936_v26  ;;  %4892 = vmatmul.msk.f32.vlgmr.msrb.gmra.mxu1 %vm336_vm3, %v936_v26 }
 0x368   :  { %4893 = vmatmul.msk.f32.vlgmr.msrb.gmra.mxu2 %vm336_vm3, %v936_v26  ;;  %4894 = vmatmul.msk.f32.vlgmr.msrb.gmra.mxu3 %vm336_vm3, %v936_v26  ;;  %v1355_v26 = vld [vmem:[#allocation6 + $0x130] sm:$0xff] }
 0x369   :  { %1209 = vmatpush.msrb.mxu0 %v5669_v3  ;;  %1229 = vmatpush.msrb.mxu1 %v5688_v12 }
 0x36a   :  { %1249 = vmatpush.msrb.mxu2 %v5715_v19  ;;  %1269 = vmatpush.msrb.mxu3 %v5692_v13 }
 0x36b   :  { %1210 = vmatpush.msrb.mxu0 %v5672_v4  ;;  %1230 = vmatpush.msrb.mxu1 %v5696_v14  ;;  %v938_v14 = vld [vmem:[#allocation2 + $0x8] sm:$0xc] }
 0x36c   :  { %1250 = vmatpush.msrb.mxu2 %v5724_v21  ;;  %1270 = vmatpush.msrb.mxu3 %v5700_v15 }
 0x36d   :  { %1211 = vmatpush.msrb.mxu0 %v5675_v5  ;;  %1231 = vmatpush.msrb.mxu1 %v5704_v16  ;;  %v939_v5 = vld [vmem:[#allocation2 + $0x20] sm:$0xc] }
 0x36e   :  { %1251 = vmatpush.msrb.mxu2 %v5731_v23  ;;  %1271 = vmatpush.msrb.mxu3 %v5718_v20 }
 0x36f   :  { %1212 = vmatpush.msrb.mxu0 %v5681_v7  ;;  %1232 = vmatpush.msrb.mxu1 %v5713_v18 }
 0x370   :  { %1252 = vmatpush.msrb.mxu2 %v5737_v24  ;;  %1272 = vmatpush.msrb.mxu3 %v5727_v22  ;;  %v941_v24 = vld [vmem:[#allocation2 + $0x38] sm:$0xc] }
 0x3e4   :  { %v962_v3 = vpop.f32.mrf.mxu0  ;;  %v982_v4 = vpop.f32.mrf.mxu1 }
 0x3e5   :  { %v1029_v12 = vrot.slane %v962_v3, 6  ;;  %v1030_v13 = vrot.slane %v982_v4, 6  ;;  %v1356_v3 = vld [vmem:[#allocation6 + $0x138] sm:$0xff]  ;;  %v1349_v4 = vld [vmem:[#allocation6 + $0x100] sm:$0xff] }
 0x3e7   :  { %v1037_v15 = vadd.f32 %v1029_v12, %v938_v14  ;;  %v1038_v16 = vadd.f32 %v1030_v13, %v939_v5  ;;  %v1350_v12 = vld [vmem:[#allocation6 + $0x108] sm:$0xff]  ;;  %v1351_v13 = vld [vmem:[#allocation6 + $0x110] sm:$0xff]  ;;  %v1352_v14 = vld [vmem:[#allocation6 + $0x118] sm:$0xff] }
 0x3e8   :  { %v1345_v5 = vld [vmem:[#allocation6 + $0xe0] sm:$0xff] }
 0x3e9   :  { %v1041_v19 = vmul.f32 0.5, %v1037_v15  ;;  %v1042_v21 = vmul.f32 0.5, %v1038_v16  ;;  %v1346_v15 = vld [vmem:[#allocation6 + $0xe8] sm:$0xff]  ;;  %v1347_v16 = vld [vmem:[#allocation6 + $0xf0] sm:$0xff] }
 0x3eb   :  { %5051 = vtanh.f32 %v1041_v19  ;;  %v1002_v20 = vpop.f32.mrf.mxu2  ;;  %v1022_v23 = vpop.f32.mrf.mxu3  ;;  %v1348_v19 = vld [vmem:[#allocation6 + $0xf8] sm:$0xff] }
 0x3ec   :  { %5053 = vtanh.f32 %v1042_v21  ;;  %v1031_v7 = vrot.slane %v1002_v20, 6  ;;  %v1032_v18 = vrot.slane %v1022_v23, 6  ;;  %v1341_v21 = vld [vmem:[#allocation6 + $0xc0] sm:$0xff]  ;;  %v1342_v20 = vld [vmem:[#allocation6 + $0xc8] sm:$0xff]  ;;  %v1343_v23 = vld [vmem:[#allocation6 + $0xd0] sm:$0xff] }
 0x3ee   :  { %v1039_v28 = vadd.f32 %v1031_v7, %v940_v27  ;;  %v1040_v22 = vadd.f32 %v1032_v18, %v941_v24  ;;  %v1344_v7 = vld [vmem:[#allocation6 + $0xd8] sm:$0xff]  ;;  %v1337_v18 = vld [vmem:[#allocation6 + $0xa0] sm:$0xff]  ;;  %v1338_v27 = vld [vmem:[#allocation6 + $0xa8] sm:$0xff] }
 0x3ef   :  { %v1339_v24 = vld [vmem:[#allocation6 + $0xb0] sm:$0xff] }
 0x3f0   :  { %5055 = vtanh.f32 %v1039_v28  ;;  %v1043_v29 = vmul.f32 0.5, %v1040_v22  ;;  %v1340_v28 = vld [vmem:[#allocation6 + $0xb8] sm:$0xff] }
 0x3f1   :  { %v5052_v30 = vpop.eup %5051 }
 0x3f2   :  { %v5054_v31 = vpop.eup %5053  ;;  %v1047_v32 = vadd.f32 1.0, %v5052_v30  ;;  %5057 = vtanh.f32 %v1043_v29  ;;  %v1333_v30 = vld [vmem:[#allocation6 + $0x80] sm:$0xff] }
 0x3f3   :  { %v1049_v33 = vadd.f32 1.0, %v5054_v31  ;;  %v1334_v31 = vld [vmem:[#allocation6 + $0x88] sm:$0xff] }
 0x3f4   :  { %v1048_v34 = vmul.f32 0.5, %v1047_v32  ;;  %v1335_v32 = vld [vmem:[#allocation6 + $0x90] sm:$0xff] }
 0x3f5   :  { %v1050_v35 = vmul.f32 0.5, %v1049_v33 }
 0x3f6   :  { %v5056_v37 = vpop.eup %5055 }
 0x3f7   :  { %v1057_v38 = vmul.f32 %v1055_v36, %v1050_v35  ;;  %v1058_v39 = vmul.f32 %v5056_v37, %v1048_v34  ;;  %v1336_v35 = vld [vmem:[#allocation6 + $0x98] sm:$0xff]  ;;  %v1064_v37 = vld [vmem:[#allocation2 + $0x20] sm:$0x30] }
 0x3f8   :  { %v5058_v40 = vpop.eup %5057  ;;  %v1063_v36 = vld [vmem:[#allocation2 + $0x8] sm:$0x30] }
 0x3f9   :  { %v5879_v41 = vadd.f32 %v1058_v39, %v1057_v38  ;;  %v1051_v42 = vadd.f32 1.0, %v5058_v40  ;;  %v1329_v40 = vld [vmem:[#allocation6 + $0x60] sm:$0xff] }
 0x3fb   :  { %5059 = vtanh.f32 %v5879_v41  ;;  %v1052_v43 = vmul.f32 0.5, %v1051_v42  ;;  %v1330_v42 = vld [vmem:[#allocation6 + $0x68] sm:$0xff] }
 0x401   :  { %v5060_v44 = vpop.eup %5059 }
 0x402   :  { %v1061_v45 = vmul.f32 %v5060_v44, %v1052_v43  ;;  %v1331_v43 = vld [vmem:[#allocation6 + $0x70] sm:$0xff]  ;;  %v1332_v44 = vld [vmem:[#allocation6 + $0x78] sm:$0xff] }
 0x404   :  { %1062 = vst.msk [vmem:[#allocation3 + $0x8] sm:$0xc] %vm568_vm4, %v1061_v45  ;;  %v1068_v46 = vrot.slane %v1061_v45, 2  ;;  %v1325_v45 = vld [vmem:[#allocation6 + $0x40] sm:$0xff] }
 0x406   :  { %4895 = vmatmul.msk.f32.vlgmr.msra.gmra.mxu0 %vm336_vm3, %v1068_v46  ;;  %4896 = vmatmul.msk.f32.vlgmr.msra.gmra.mxu1 %vm336_vm3, %v1068_v46 }
 0x407   :  { %4897 = vmatmul.msk.f32.vlgmr.msra.gmra.mxu2 %vm336_vm3, %v1068_v46  ;;  %4898 = vmatmul.msk.f32.vlgmr.msra.gmra.mxu3 %vm336_vm3, %v1068_v46  ;;  %v1326_v46 = vld [vmem:[#allocation6 + $0x48] sm:$0xff] }
 0x408   :  { %1399 = vmatpush.msra.mxu0 %v1377_v47  ;;  %1422 = vmatpush.msra.mxu1 %v1378_v48 }
 0x409   :  { %1445 = vmatpush.msra.mxu2 %v1379_v49  ;;  %1468 = vmatpush.msra.mxu3 %v1380_v50  ;;  %v1327_v49 = vld [vmem:[#allocation6 + $0x50] sm:$0xff]  ;;  %v1328_v50 = vld [vmem:[#allocation6 + $0x58] sm:$0xff] }
 0x40a   :  { %1400 = vmatpush.msra.mxu0 %v1373_v51  ;;  %1423 = vmatpush.msra.mxu1 %v1374_v52  ;;  %v1321_v51 = vld [vmem:[#allocation6 + $0x20] sm:$0xff]  ;;  %v1322_v52 = vld [vmem:[#allocation6 + $0x28] sm:$0xff] }
 0x40b   :  { %1446 = vmatpush.msra.mxu2 %v1375_v53  ;;  %1469 = vmatpush.msra.mxu3 %v1376_v54  ;;  %v1323_v53 = vld [vmem:[#allocation6 + $0x30] sm:$0xff]  ;;  %v1324_v54 = vld [vmem:[#allocation6 + $0x38] sm:$0xff] }
 0x40c   :  { %1401 = vmatpush.msra.mxu0 %v1369_v55  ;;  %1424 = vmatpush.msra.mxu1 %v1370_v56 }
 0x40d   :  { %1447 = vmatpush.msra.mxu2 %v1371_v57  ;;  %1470 = vmatpush.msra.mxu3 %v1372_v58  ;;  %v1317_v57 = vld [vmem:[#allocation6] sm:$0xff]  ;;  %v1318_v58 = vld [vmem:[#allocation6 + $0x8] sm:$0xff] }
 0x40e   :  { %1402 = vmatpush.msra.mxu0 %v1365_v59  ;;  %1425 = vmatpush.msra.mxu1 %v1366_v60 }
 0x40f   :  { %1448 = vmatpush.msra.mxu2 %v1367_v61  ;;  %1471 = vmatpush.msra.mxu3 %v1368_v62  ;;  %v1319_v61 = vld [vmem:[#allocation6 + $0x10] sm:$0xff]  ;;  %v1320_v62 = vld [vmem:[#allocation6 + $0x18] sm:$0xff] }
 0x410   :  { %1403 = vmatpush.msra.mxu0 %v1361_v63  ;;  %1426 = vmatpush.msra.mxu1 %v1362_v1  ;;  %v1065_v63 = vld [vmem:[#allocation2 + $0x28] sm:$0x30]  ;;  %v1066_v1 = vld [vmem:[#allocation2 + $0x38] sm:$0x30] }
 0x411   :  { %1449 = vmatpush.msra.mxu2 %v1363_v2  ;;  %1472 = vmatpush.msra.mxu3 %v1364_v6 }
 0x412   :  { %1404 = vmatpush.msra.mxu0 %v1357_v8  ;;  %1427 = vmatpush.msra.mxu1 %v1358_v9 }
 0x413   :  { %1450 = vmatpush.msra.mxu2 %v1359_v10  ;;  %1473 = vmatpush.msra.mxu3 %v1360_v11 }
 0x414   :  { %1405 = vmatpush.msra.mxu0 %v1353_v17  ;;  %1428 = vmatpush.msra.mxu1 %v1354_v25 }
 0x415   :  { %1451 = vmatpush.msra.mxu2 %v1355_v26  ;;  %1474 = vmatpush.msra.mxu3 %v1356_v3  ;;  %v1181_v3 = vrot.slane %v5879_v41, 6  ;;  %v1315_v41 = vld [vmem:[#allocation3] sm:$0xff] }
 0x416   :  { %1406 = vmatpush.msra.mxu0 %v1349_v4  ;;  %1429 = vmatpush.msra.mxu1 %v1350_v12 }
 0x417   :  { %1452 = vmatpush.msra.mxu2 %v1351_v13  ;;  %1475 = vmatpush.msra.mxu3 %v1352_v14 }
 0x418   :  { %1407 = vmatpush.msra.mxu0 %v1345_v5  ;;  %1430 = vmatpush.msra.mxu1 %v1346_v15 }
 0x419   :  { %1453 = vmatpush.msra.mxu2 %v1347_v16  ;;  %1476 = vmatpush.msra.mxu3 %v1348_v19 }
 0x41a   :  { %1408 = vmatpush.msra.mxu0 %v1341_v21  ;;  %1431 = vmatpush.msra.mxu1 %v1342_v20 }
 0x41b   :  { %1454 = vmatpush.msra.mxu2 %v1343_v23  ;;  %1477 = vmatpush.msra.mxu3 %v1344_v7 }
 0x41c   :  { %1409 = vmatpush.msra.mxu0 %v1337_v18  ;;  %1432 = vmatpush.msra.mxu1 %v1338_v27 }
 0x41d   :  { %1455 = vmatpush.msra.mxu2 %v1339_v24  ;;  %1478 = vmatpush.msra.mxu3 %v1340_v28  ;;  %v1189_v24 = vld [vmem:[#allocation2 + $0x8] sm:$0xc0]  ;;  %v1190_v28 = vld [vmem:[#allocation2 + $0x20] sm:$0xc0] }
 0x41e   :  { %1410 = vmatpush.msra.mxu0 %v1333_v30  ;;  %1433 = vmatpush.msra.mxu1 %v1334_v31 }
 0x41f   :  { %1456 = vmatpush.msra.mxu2 %v1335_v32  ;;  %1479 = vmatpush.msra.mxu3 %v1336_v35  ;;  %v1191_v35 = vld [vmem:[#allocation2 + $0x28] sm:$0xc0] }
 0x420   :  { %1411 = vmatpush.msra.mxu0 %v1329_v40  ;;  %1434 = vmatpush.msra.mxu1 %v1330_v42  ;;  %v5907_v40 = vld [vmem:[#allocation8 + $0x30] sm:$0xff] }
 0x421   :  { %1457 = vmatpush.msra.mxu2 %v1331_v43  ;;  %1480 = vmatpush.msra.mxu3 %v1332_v44  ;;  %v1192_v43 = vld [vmem:[#allocation2 + $0x38] sm:$0xc0] }
 0x422   :  { %1412 = vmatpush.msra.mxu0 %v1325_v45  ;;  %1435 = vmatpush.msra.mxu1 %v1326_v46 }
 0x423   :  { %1458 = vmatpush.msra.mxu2 %v1327_v49  ;;  %1481 = vmatpush.msra.mxu3 %v1328_v50  ;;  %v5919_v50 = vld [vmem:[#allocation8] sm:$0xff] }
 0x424   :  { %1413 = vmatpush.msra.mxu0 %v1321_v51  ;;  %1436 = vmatpush.msra.mxu1 %v1322_v52  ;;  %v5921_v51 = vld [vmem:[#allocation8 + $0x8] sm:$0xff]  ;;  %v5923_v52 = vld [vmem:[#allocation8 + $0x10] sm:$0xff] }
 0x425   :  { %1459 = vmatpush.msra.mxu2 %v1323_v53  ;;  %1482 = vmatpush.msra.mxu3 %v1324_v54 }
 0x426   :  { %1414 = vmatpush.msra.mxu0 %v1317_v57  ;;  %1437 = vmatpush.msra.mxu1 %v1318_v58 }
 0x427   :  { %1460 = vmatpush.msra.mxu2 %v1319_v61  ;;  %1483 = vmatpush.msra.mxu3 %v1320_v62 }
 0x483   :  { %v1088_v22 = vpop.f32.mrf.mxu0  ;;  %v1108_v29 = vpop.f32.mrf.mxu1 }
 0x484   :  { %v1155_v33 = vrot.slane %v1088_v22, 4  ;;  %v1156_v34 = vrot.slane %v1108_v29, 4  ;;  %v5899_v22 = vld [vmem:[%s6432_s6] sm:$0xf] }
 0x485   :  { %v1393_v57 = vperm.slane %v5899_v22, 2  ;;  %v1394_v58 = vperm.slane %v5899_v22, 3 }
 0x486   :  { %v1163_v38 = vadd.f32 %v1155_v33, %v1063_v36  ;;  %v1164_v39 = vadd.f32 %v1156_v34, %v1064_v37  ;;  %v1391_v33 = vperm.slane %v5899_v22, 0  ;;  %v1392_v34 = vperm.slane %v5899_v22, 1 }
 0x488   :  { %v1167_v47 = vmul.f32 0.5, %v1163_v38  ;;  %v1168_v48 = vmul.f32 0.5, %v1164_v39  ;;  %v5903_v38 = vld [vmem:[#allocation8 + $0x20] sm:$0xff]  ;;  %v5905_v39 = vld [vmem:[#allocation8 + $0x28] sm:$0xff] }
 0x48a   :  { %5061 = vtanh.f32 %v1167_v47  ;;  %v1128_v55 = vpop.f32.mrf.mxu2  ;;  %v1148_v56 = vpop.f32.mrf.mxu3  ;;  %v5911_v47 = vld [vmem:[#allocation8 + $0x38] sm:$0xff] }
 0x48b   :  { %5063 = vtanh.f32 %v1168_v48  ;;  %v1157_v59 = vrot.slane %v1128_v55, 4  ;;  %v1158_v60 = vrot.slane %v1148_v56, 4  ;;  %v5927_v55 = vld [vmem:[#allocation8 + $0x18] sm:$0xff] }
 0x48d   :  { %v1165_v2 = vadd.f32 %v1157_v59, %v1065_v63  ;;  %v1166_v6 = vadd.f32 %v1158_v60, %v1066_v1 }
 0x48f   :  { %5065 = vtanh.f32 %v1165_v2  ;;  %v1169_v8 = vmul.f32 0.5, %v1166_v6 }
 0x490   :  { %v5062_v9 = vpop.eup %5061 }
 0x491   :  { %v5064_v10 = vpop.eup %5063  ;;  %v1173_v11 = vadd.f32 1.0, %v5062_v9  ;;  %5067 = vtanh.f32 %v1169_v8 }
 0x492   :  { %v1175_v17 = vadd.f32 1.0, %v5064_v10 }
 0x493   :  { %v1174_v25 = vmul.f32 0.5, %v1173_v11 }
 0x494   :  { %v1176_v26 = vmul.f32 0.5, %v1175_v17 }
 0x495   :  { %v5066_v4 = vpop.eup %5065 }
 0x496   :  { %v1183_v12 = vmul.f32 %v1181_v3, %v1176_v26  ;;  %v1184_v13 = vmul.f32 %v5066_v4, %v1174_v25 }
 0x497   :  { %v5068_v14 = vpop.eup %5067 }
 0x498   :  { %v5888_v5 = vadd.f32 %v1184_v13, %v1183_v12  ;;  %v1177_v15 = vadd.f32 1.0, %v5068_v14 }
 0x49a   :  { %5069 = vtanh.f32 %v5888_v5  ;;  %v1178_v16 = vmul.f32 0.5, %v1177_v15  ;;  %v1307_v10 = vrot.slane %v5888_v5, 6 }
 0x4a0   :  { %v5070_v19 = vpop.eup %5069 }
 0x4a1   :  { %v1187_v21 = vmul.f32 %v5070_v19, %v1178_v16 }
 0x4a3   :  { %1188 = vst.msk [vmem:[#allocation3 + $0x8] sm:$0x30] %vm695_vm5, %v1187_v21  ;;  %v1194_v20 = vrot.slane %v1187_v21, 4 }
 0x4a5   :  { %4899 = vmatmul.msk.f32.vlgmr.msrb.gmra.mxu0 %vm336_vm3, %v1194_v20  ;;  %4900 = vmatmul.msk.f32.vlgmr.msrb.gmra.mxu1 %vm336_vm3, %v1194_v20 }
 0x4a6   :  { %4901 = vmatmul.msk.f32.vlgmr.msrb.gmra.mxu2 %vm336_vm3, %v1194_v20  ;;  %4902 = vmatmul.msk.f32.vlgmr.msrb.gmra.mxu3 %vm336_vm3, %v1194_v20 }
 0x4a7   :  { %1520 = vmatpush.msrb.mxu0 %v5903_v38  ;;  %1540 = vmatpush.msrb.mxu1 %v5905_v39 }
 0x4a8   :  { %1560 = vmatpush.msrb.mxu2 %v5907_v40  ;;  %1580 = vmatpush.msrb.mxu3 %v5911_v47 }
 0x4a9   :  { %1521 = vmatpush.msrb.mxu0 %v5919_v50  ;;  %1541 = vmatpush.msrb.mxu1 %v5921_v51 }
 0x4aa   :  { %1561 = vmatpush.msrb.mxu2 %v5923_v52  ;;  %1581 = vmatpush.msrb.mxu3 %v5927_v55 }
 0x4ad   :  { %1415 = vmatmul.f32.vlgmr.msra.gmra.mxu0 %v1315_v41  ;;  %1438 = vmatmul.f32.vlgmr.msra.gmra.mxu1 %v1315_v41 }
 0x4ae   :  { %1461 = vmatmul.f32.vlgmr.msra.gmra.mxu2 %v1315_v41  ;;  %1484 = vmatmul.f32.vlgmr.msra.gmra.mxu3 %v1315_v41 }
 0x4af   :  { %1631 = vmatpush.msra.mxu0 %v5903_v38  ;;  %1651 = vmatpush.msra.mxu1 %v5905_v39 }
 0x4b0   :  { %1671 = vmatpush.msra.mxu2 %v5907_v40  ;;  %1691 = vmatpush.msra.mxu3 %v5911_v47 }
 0x4b1   :  { %1632 = vmatpush.msra.mxu0 %v5919_v50  ;;  %1652 = vmatpush.msra.mxu1 %v5921_v51 }
 0x4b2   :  { %1672 = vmatpush.msra.mxu2 %v5923_v52  ;;  %1692 = vmatpush.msra.mxu3 %v5927_v55 }
 0x522   :  { %v1214_v23 = vpop.f32.mrf.mxu0  ;;  %v1234_v7 = vpop.f32.mrf.mxu1 }
 0x523   :  { %v1281_v18 = vrot.slane %v1214_v23, 2  ;;  %v1282_v27 = vrot.slane %v1234_v7, 2 }
 0x525   :  { %v1289_v29 = vadd.f32 %v1281_v18, %v1189_v24  ;;  %v1290_v30 = vadd.f32 %v1282_v27, %v1190_v28 }
 0x527   :  { %v1293_v31 = vmul.f32 0.5, %v1289_v29  ;;  %v1294_v32 = vmul.f32 0.5, %v1290_v30 }
 0x529   :  { %5071 = vtanh.f32 %v1293_v31  ;;  %v1254_v36 = vpop.f32.mrf.mxu2  ;;  %v1274_v37 = vpop.f32.mrf.mxu3 }
 0x52a   :  { %5073 = vtanh.f32 %v1294_v32  ;;  %v1283_v42 = vrot.slane %v1254_v36, 2  ;;  %v1284_v44 = vrot.slane %v1274_v37, 2  ;;  %v1416_v45 = vpop.f32.mrf.mxu0  ;;  %v1439_v46 = vpop.f32.mrf.mxu1 }
 0x52b   :  { %v1417_v48 = vadd.f32 %v1416_v45, %v1391_v33  ;;  %v1440_v49 = vadd.f32 %v1439_v46, %v1392_v34 }
 0x52c   :  { %v1291_v53 = vadd.f32 %v1283_v42, %v1191_v35  ;;  %v1292_v54 = vadd.f32 %v1284_v44, %v1192_v43 }
 0x52d   :  { %1491 = vst [vmem:[#allocation2 + $0x30] sm:$0xff] %v1417_v48 }
 0x52e   :  { %5075 = vtanh.f32 %v1291_v53  ;;  %v1295_v56 = vmul.f32 0.5, %v1292_v54  ;;  %1492 = vst [vmem:[#allocation2] sm:$0xff] %v1440_v49 }
 0x52f   :  { %v5072_v59 = vpop.eup %5071 }
 0x530   :  { %v5074_v60 = vpop.eup %5073  ;;  %v1299_v61 = vadd.f32 1.0, %v5072_v59  ;;  %5077 = vtanh.f32 %v1295_v56 }
 0x531   :  { %v1301_v62 = vadd.f32 1.0, %v5074_v60  ;;  %v1462_v63 = vpop.f32.mrf.mxu2  ;;  %v1485_v1 = vpop.f32.mrf.mxu3 }
 0x532   :  { %v1300_v2 = vmul.f32 0.5, %v1299_v61  ;;  %v1463_v6 = vadd.f32 %v1462_v63, %v1393_v57  ;;  %v1486_v8 = vadd.f32 %v1485_v1, %v1394_v58 }
 0x533   :  { %v1302_v9 = vmul.f32 0.5, %v1301_v62 }
 0x534   :  { %v5076_v11 = vpop.eup %5075  ;;  %1493 = vst [vmem:[#allocation2 + $0x18] sm:$0xff] %v1463_v6  ;;  %v1499_v18 = vld [vmem:[#allocation2 + $0x30] sm:$0x3] }
 0x535   :  { %v1309_v17 = vmul.f32 %v1307_v10, %v1302_v9  ;;  %v1310_v25 = vmul.f32 %v5076_v11, %v1300_v2  ;;  %1494 = vst [vmem:[#allocation2 + $0x10] sm:$0xff] %v1486_v8  ;;  %v1500_v24 = vld [vmem:[#allocation2] sm:$0x3]  ;;  %v1610_v8 = vld [vmem:[#allocation2 + $0x30] sm:$0xc] }
 0x536   :  { %v5078_v26 = vpop.eup %5077  ;;  %v1611_v9 = vld [vmem:[#allocation2] sm:$0xc] }
 0x537   :  { %v1311_v3 = vadd.f32 %v1310_v25, %v1309_v17  ;;  %v1303_v4 = vadd.f32 1.0, %v5078_v26 }
 0x539   :  { %5079 = vtanh.f32 %v1311_v3  ;;  %v1304_v12 = vmul.f32 0.5, %v1303_v4 }
 0x53b   :  { %v1501_v22 = vld [vmem:[#allocation2 + $0x18] sm:$0x3] }
 0x53f   :  { %v5080_v13 = vpop.eup %5079 }
 0x540   :  { %v1313_v14 = vmul.f32 %v5080_v13, %v1304_v12  ;;  %v1612_v13 = vld [vmem:[#allocation2 + $0x18] sm:$0xc] }
 0x542   :  { %1314 = vst.msk [vmem:[#allocation3 + $0x8] sm:$0xc0] %vm822_vm6, %v1313_v14  ;;  %v1613_v14 = vld [vmem:[#allocation2 + $0x10] sm:$0xc] }
 0x549   :  { %v1316_v15 = vld [vmem:[#allocation3 + $0x8] sm:$0xff] }
 0x54a   :  { %1418 = vmatmul.f32.gmra.mxu0 %v1316_v15  ;;  %1441 = vmatmul.f32.gmra.mxu1 %v1316_v15 }
 0x54b   :  { %1464 = vmatmul.f32.gmra.mxu2 %v1316_v15  ;;  %1487 = vmatmul.f32.gmra.mxu3 %v1316_v15 }
 0x552   :  { %1522 = vmatmul.f32.vlgmr.msrb.gmra.mxu0 %v5535_v0  ;;  %1542 = vmatmul.f32.vlgmr.msrb.gmra.mxu1 %v5535_v0 }
 0x553   :  { %1562 = vmatmul.f32.vlgmr.msrb.gmra.mxu2 %v5535_v0  ;;  %1582 = vmatmul.f32.vlgmr.msrb.gmra.mxu3 %v5535_v0 }
 0x554   :  { %1758 = vmatpush.msrb.mxu0 %v5903_v38  ;;  %1778 = vmatpush.msrb.mxu1 %v5905_v39 }
 0x555   :  { %1798 = vmatpush.msrb.mxu2 %v5907_v40  ;;  %1818 = vmatpush.msrb.mxu3 %v5911_v47 }
 0x556   :  { %1759 = vmatpush.msrb.mxu0 %v5919_v50  ;;  %1779 = vmatpush.msrb.mxu1 %v5921_v51 }
 0x557   :  { %1799 = vmatpush.msrb.mxu2 %v5923_v52  ;;  %1819 = vmatpush.msrb.mxu3 %v5927_v55 }
 0x5c7   :  { %v1419_v5 = vpop.f32.mrf.mxu0  ;;  %v1442_v16 = vpop.f32.mrf.mxu1 }
 0x5c8   :  { %v1420_v19 = vadd.f32 %v1419_v5, %v1391_v33  ;;  %v1443_v21 = vadd.f32 %v1442_v16, %v1392_v34  ;;  %v1502_v34 = vld [vmem:[#allocation2 + $0x10] sm:$0x3] }
 0x5ca   :  { %1495 = vst [vmem:[#allocation2 + $0x8] sm:$0xff] %v1420_v19 }
 0x5cb   :  { %1496 = vst [vmem:[#allocation2 + $0x20] sm:$0xff] %v1443_v21 }
 0x5ce   :  { %v1465_v20 = vpop.f32.mrf.mxu2  ;;  %v1488_v41 = vpop.f32.mrf.mxu3 }
 0x5cf   :  { %v1466_v23 = vadd.f32 %v1465_v20, %v1393_v57  ;;  %v1489_v7 = vadd.f32 %v1488_v41, %v1394_v58  ;;  %v1523_v27 = vpop.f32.mrf.mxu0  ;;  %v1543_v28 = vpop.f32.mrf.mxu1 }
 0x5d0   :  { %v1586_v29 = vadd.f32 %v1523_v27, %v1499_v18  ;;  %v1587_v30 = vadd.f32 %v1543_v28, %v1500_v24 }
 0x5d1   :  { %1497 = vst [vmem:[#allocation2 + $0x28] sm:$0xff] %v1466_v23 }
 0x5d2   :  { %1498 = vst [vmem:[#allocation2 + $0x38] sm:$0xff] %v1489_v7  ;;  %v1590_v31 = vmul.f32 0.5, %v1586_v29  ;;  %v1591_v32 = vmul.f32 0.5, %v1587_v30 }
 0x5d4   :  { %5081 = vtanh.f32 %v1590_v31 }
 0x5d5   :  { %5083 = vtanh.f32 %v1591_v32 }
 0x5d6   :  { %v1563_v33 = vpop.f32.mrf.mxu2  ;;  %v1583_v35 = vpop.f32.mrf.mxu3 }
 0x5d7   :  { %v1588_v36 = vadd.f32 %v1563_v33, %v1501_v22  ;;  %v1589_v37 = vadd.f32 %v1583_v35, %v1502_v34 }
 0x5d9   :  { %5085 = vtanh.f32 %v1588_v36  ;;  %v1592_v42 = vmul.f32 0.5, %v1589_v37 }
 0x5da   :  { %v5082_v43 = vpop.eup %5081 }
 0x5db   :  { %v5084_v44 = vpop.eup %5083  ;;  %v1596_v45 = vadd.f32 1.0, %v5082_v43  ;;  %5087 = vtanh.f32 %v1592_v42  ;;  %v1736_v43 = vld [vmem:[#allocation2 + $0x30] sm:$0x30] }
 0x5dc   :  { %v1598_v46 = vadd.f32 1.0, %v5084_v44  ;;  %v1737_v44 = vld [vmem:[#allocation2] sm:$0x30] }
 0x5dd   :  { %v1597_v48 = vmul.f32 0.5, %v1596_v45 }
 0x5de   :  { %v1599_v49 = vmul.f32 0.5, %v1598_v46 }
 0x5df   :  { %v5086_v53 = vpop.eup %5085 }
 0x5e0   :  { %v1603_v54 = vmul.f32 0.0, %v1599_v49  ;;  %v1604_v56 = vmul.f32 %v5086_v53, %v1597_v48 }
 0x5e1   :  { %v5088_v57 = vpop.eup %5087 }
 0x5e2   :  { %v1605_v58 = vadd.f32 %v1604_v56, %v1603_v54  ;;  %v1600_v59 = vadd.f32 1.0, %v5088_v57 }
 0x5e4   :  { %5089 = vtanh.f32 %v1605_v58  ;;  %v1601_v60 = vmul.f32 0.5, %v1600_v59  ;;  %v1727_v18 = vrot.slane %v1605_v58, 6  ;;  %v1738_v58 = vld [vmem:[#allocation2 + $0x18] sm:$0x30]  ;;  %v1739_v59 = vld [vmem:[#allocation2 + $0x10] sm:$0x30] }
 0x5ea   :  { %v5090_v61 = vpop.eup %5089 }
 0x5eb   :  { %v1607_v62 = vmul.f32 %v5090_v61, %v1601_v60 }
 0x5ed   :  { %1609 = vst.msk [vmem:[#allocation3] sm:$0x3] %vm1608_vm7, %v1607_v62  ;;  %4903 = vmatmul.msk.f32.vlgmr.msra.gmra.mxu0 %vm1503_vm8, %v1607_v62  ;;  %4904 = vmatmul.msk.f32.vlgmr.msra.gmra.mxu1 %vm1503_vm8, %v1607_v62 }
 0x5ee   :  { %4905 = vmatmul.msk.f32.vlgmr.msra.gmra.mxu2 %vm1503_vm8, %v1607_v62  ;;  %4906 = vmatmul.msk.f32.vlgmr.msra.gmra.mxu3 %vm1503_vm8, %v1607_v62 }
 0x5ef   :  { %1885 = vmatpush.msra.mxu0 %v5903_v38  ;;  %1905 = vmatpush.msra.mxu1 %v5905_v39 }
 0x5f0   :  { %1925 = vmatpush.msra.mxu2 %v5907_v40  ;;  %1945 = vmatpush.msra.mxu3 %v5911_v47 }
 0x5f1   :  { %1886 = vmatpush.msra.mxu0 %v5919_v50  ;;  %1906 = vmatpush.msra.mxu1 %v5921_v51 }
 0x5f2   :  { %1926 = vmatpush.msra.mxu2 %v5923_v52  ;;  %1946 = vmatpush.msra.mxu3 %v5927_v55 }
 0x66a   :  { %v1634_v63 = vpop.f32.mrf.mxu0  ;;  %v1654_v1 = vpop.f32.mrf.mxu1 }
 0x66b   :  { %v1701_v2 = vrot.slane %v1634_v63, 6  ;;  %v1702_v6 = vrot.slane %v1654_v1, 6 }
 0x66d   :  { %v1709_v10 = vadd.f32 %v1701_v2, %v1610_v8  ;;  %v1710_v11 = vadd.f32 %v1702_v6, %v1611_v9 }
 0x66f   :  { %v1713_v17 = vmul.f32 0.5, %v1709_v10  ;;  %v1714_v25 = vmul.f32 0.5, %v1710_v11 }
 0x671   :  { %5091 = vtanh.f32 %v1713_v17  ;;  %v1674_v26 = vpop.f32.mrf.mxu2  ;;  %v1694_v3 = vpop.f32.mrf.mxu3 }
 0x672   :  { %5093 = vtanh.f32 %v1714_v25  ;;  %v1703_v4 = vrot.slane %v1674_v26, 6  ;;  %v1704_v12 = vrot.slane %v1694_v3, 6 }
 0x674   :  { %v1711_v15 = vadd.f32 %v1703_v4, %v1612_v13  ;;  %v1712_v5 = vadd.f32 %v1704_v12, %v1613_v14 }
 0x676   :  { %5095 = vtanh.f32 %v1711_v15  ;;  %v1715_v16 = vmul.f32 0.5, %v1712_v5 }
 0x677   :  { %v5092_v19 = vpop.eup %5091 }
 0x678   :  { %v5094_v21 = vpop.eup %5093  ;;  %v1719_v20 = vadd.f32 1.0, %v5092_v19  ;;  %5097 = vtanh.f32 %v1715_v16 }
 0x679   :  { %v1721_v41 = vadd.f32 1.0, %v5094_v21 }
 0x67a   :  { %v1720_v23 = vmul.f32 0.5, %v1719_v20  ;;  %v1863_v20 = vld [vmem:[#allocation2 + $0x30] sm:$0xc0] }
 0x67b   :  { %v1722_v7 = vmul.f32 0.5, %v1721_v41  ;;  %v1864_v41 = vld [vmem:[#allocation2] sm:$0xc0] }
 0x67c   :  { %v5096_v27 = vpop.eup %5095 }
 0x67d   :  { %v1729_v24 = vmul.f32 %v1727_v18, %v1722_v7  ;;  %v1730_v28 = vmul.f32 %v5096_v27, %v1720_v23 }
 0x67e   :  { %v5098_v29 = vpop.eup %5097 }
 0x67f   :  { %v1731_v30 = vadd.f32 %v1730_v28, %v1729_v24  ;;  %v1723_v31 = vadd.f32 1.0, %v5098_v29 }
 0x681   :  { %5099 = vtanh.f32 %v1731_v30  ;;  %v1724_v32 = vmul.f32 0.5, %v1723_v31  ;;  %v1854_v10 = vrot.slane %v1731_v30, 6  ;;  %v1865_v31 = vld [vmem:[#allocation2 + $0x18] sm:$0xc0] }
 0x687   :  { %v5100_v22 = vpop.eup %5099 }
 0x688   :  { %v1733_v33 = vmul.f32 %v5100_v22, %v1724_v32  ;;  %v1866_v32 = vld [vmem:[#allocation2 + $0x10] sm:$0xc0] }
 0x68a   :  { %1735 = vst.msk [vmem:[#allocation3] sm:$0xc] %vm1734_vm9, %v1733_v33  ;;  %v1741_v34 = vrot.slane %v1733_v33, 2 }
 0x68c   :  { %4907 = vmatmul.msk.f32.vlgmr.msrb.gmra.mxu0 %vm1503_vm8, %v1741_v34  ;;  %4908 = vmatmul.msk.f32.vlgmr.msrb.gmra.mxu1 %vm1503_vm8, %v1741_v34 }
 0x68d   :  { %4909 = vmatmul.msk.f32.vlgmr.msrb.gmra.mxu2 %vm1503_vm8, %v1741_v34  ;;  %4910 = vmatmul.msk.f32.vlgmr.msrb.gmra.mxu3 %vm1503_vm8, %v1741_v34 }
 0x68e   :  { %2012 = vmatpush.msrb.mxu0 %v5903_v38  ;;  %2032 = vmatpush.msrb.mxu1 %v5905_v39 }
 0x68f   :  { %2052 = vmatpush.msrb.mxu2 %v5907_v40  ;;  %2072 = vmatpush.msrb.mxu3 %v5911_v47 }
 0x690   :  { %2013 = vmatpush.msrb.mxu0 %v5919_v50  ;;  %2033 = vmatpush.msrb.mxu1 %v5921_v51 }
 0x691   :  { %2053 = vmatpush.msrb.mxu2 %v5923_v52  ;;  %2073 = vmatpush.msrb.mxu3 %v5927_v55 }
 0x709   :  { %v1761_v35 = vpop.f32.mrf.mxu0  ;;  %v1781_v36 = vpop.f32.mrf.mxu1 }
 0x70a   :  { %v1828_v37 = vrot.slane %v1761_v35, 4  ;;  %v1829_v42 = vrot.slane %v1781_v36, 4 }
 0x70c   :  { %v1836_v45 = vadd.f32 %v1828_v37, %v1736_v43  ;;  %v1837_v46 = vadd.f32 %v1829_v42, %v1737_v44 }
 0x70e   :  { %v1840_v48 = vmul.f32 0.5, %v1836_v45  ;;  %v1841_v49 = vmul.f32 0.5, %v1837_v46 }
 0x710   :  { %5101 = vtanh.f32 %v1840_v48  ;;  %v1801_v53 = vpop.f32.mrf.mxu2  ;;  %v1821_v54 = vpop.f32.mrf.mxu3 }
 0x711   :  { %5103 = vtanh.f32 %v1841_v49  ;;  %v1830_v56 = vrot.slane %v1801_v53, 4  ;;  %v1831_v57 = vrot.slane %v1821_v54, 4 }
 0x713   :  { %v1838_v60 = vadd.f32 %v1830_v56, %v1738_v58  ;;  %v1839_v61 = vadd.f32 %v1831_v57, %v1739_v59 }
 0x715   :  { %5105 = vtanh.f32 %v1838_v60  ;;  %v1842_v62 = vmul.f32 0.5, %v1839_v61  ;;  %v1990_v61 = vld [vmem:[#allocation2 + $0x8] sm:$0x3] }
 0x716   :  { %v5102_v63 = vpop.eup %5101 }
 0x717   :  { %v5104_v1 = vpop.eup %5103  ;;  %v1846_v2 = vadd.f32 1.0, %v5102_v63  ;;  %5107 = vtanh.f32 %v1842_v62  ;;  %v1991_v63 = vld [vmem:[#allocation2 + $0x20] sm:$0x3] }
 0x718   :  { %v1848_v6 = vadd.f32 1.0, %v5104_v1 }
 0x719   :  { %v1847_v8 = vmul.f32 0.5, %v1846_v2 }
 0x71a   :  { %v1849_v9 = vmul.f32 0.5, %v1848_v6 }
 0x71b   :  { %v5106_v11 = vpop.eup %5105 }
 0x71c   :  { %v1856_v17 = vmul.f32 %v1854_v10, %v1849_v9  ;;  %v1857_v25 = vmul.f32 %v5106_v11, %v1847_v8  ;;  %v1992_v10 = vld [vmem:[#allocation2 + $0x28] sm:$0x3] }
 0x71d   :  { %v5108_v26 = vpop.eup %5107 }
 0x71e   :  { %v1858_v3 = vadd.f32 %v1857_v25, %v1856_v17  ;;  %v1850_v4 = vadd.f32 1.0, %v5108_v26  ;;  %v1993_v17 = vld [vmem:[#allocation2 + $0x38] sm:$0x3] }
 0x720   :  { %5109 = vtanh.f32 %v1858_v3  ;;  %v1851_v12 = vmul.f32 0.5, %v1850_v4  ;;  %v1981_v45 = vrot.slane %v1858_v3, 6 }
 0x726   :  { %v5110_v13 = vpop.eup %5109 }
 0x727   :  { %v1860_v14 = vmul.f32 %v5110_v13, %v1851_v12 }
 0x729   :  { %1862 = vst.msk [vmem:[#allocation3] sm:$0x30] %vm1861_vm10, %v1860_v14  ;;  %v1868_v15 = vrot.slane %v1860_v14, 4 }
 0x72b   :  { %4911 = vmatmul.msk.f32.vlgmr.msra.gmra.mxu0 %vm1503_vm8, %v1868_v15  ;;  %4912 = vmatmul.msk.f32.vlgmr.msra.gmra.mxu1 %vm1503_vm8, %v1868_v15 }
 0x72c   :  { %4913 = vmatmul.msk.f32.vlgmr.msra.gmra.mxu2 %vm1503_vm8, %v1868_v15  ;;  %4914 = vmatmul.msk.f32.vlgmr.msra.gmra.mxu3 %vm1503_vm8, %v1868_v15 }
 0x72d   :  { %2125 = vmatpush.msra.mxu0 %v5903_v38  ;;  %2145 = vmatpush.msra.mxu1 %v5905_v39 }
 0x72e   :  { %2165 = vmatpush.msra.mxu2 %v5907_v40  ;;  %2185 = vmatpush.msra.mxu3 %v5911_v47 }
 0x72f   :  { %2126 = vmatpush.msra.mxu0 %v5919_v50  ;;  %2146 = vmatpush.msra.mxu1 %v5921_v51 }
 0x730   :  { %2166 = vmatpush.msra.mxu2 %v5923_v52  ;;  %2186 = vmatpush.msra.mxu3 %v5927_v55 }
 0x7a8   :  { %v1888_v5 = vpop.f32.mrf.mxu0  ;;  %v1908_v16 = vpop.f32.mrf.mxu1 }
 0x7a9   :  { %v1955_v19 = vrot.slane %v1888_v5, 2  ;;  %v1956_v21 = vrot.slane %v1908_v16, 2 }
 0x7ab   :  { %v1963_v23 = vadd.f32 %v1955_v19, %v1863_v20  ;;  %v1964_v7 = vadd.f32 %v1956_v21, %v1864_v41 }
 0x7ad   :  { %v1967_v18 = vmul.f32 0.5, %v1963_v23  ;;  %v1968_v27 = vmul.f32 0.5, %v1964_v7 }
 0x7af   :  { %5111 = vtanh.f32 %v1967_v18  ;;  %v1928_v24 = vpop.f32.mrf.mxu2  ;;  %v1948_v28 = vpop.f32.mrf.mxu3 }
 0x7b0   :  { %5113 = vtanh.f32 %v1968_v27  ;;  %v1957_v29 = vrot.slane %v1928_v24, 2  ;;  %v1958_v30 = vrot.slane %v1948_v28, 2 }
 0x7b2   :  { %v1965_v22 = vadd.f32 %v1957_v29, %v1865_v31  ;;  %v1966_v33 = vadd.f32 %v1958_v30, %v1866_v32 }
 0x7b4   :  { %5115 = vtanh.f32 %v1965_v22  ;;  %v1969_v34 = vmul.f32 0.5, %v1966_v33  ;;  %v2104_v22 = vld [vmem:[#allocation2 + $0x8] sm:$0xc] }
 0x7b5   :  { %v5112_v35 = vpop.eup %5111 }
 0x7b6   :  { %v5114_v36 = vpop.eup %5113  ;;  %v1973_v37 = vadd.f32 1.0, %v5112_v35  ;;  %5117 = vtanh.f32 %v1969_v34 }
 0x7b7   :  { %v1975_v42 = vadd.f32 1.0, %v5114_v36  ;;  %v2106_v36 = vld [vmem:[#allocation2 + $0x28] sm:$0xc] }
 0x7b8   :  { %v1974_v43 = vmul.f32 0.5, %v1973_v37 }
 0x7b9   :  { %v1976_v44 = vmul.f32 0.5, %v1975_v42 }
 0x7ba   :  { %v5116_v46 = vpop.eup %5115 }
 0x7bb   :  { %v1983_v48 = vmul.f32 %v1981_v45, %v1976_v44  ;;  %v1984_v49 = vmul.f32 %v5116_v46, %v1974_v43 }
 0x7bc   :  { %v5118_v53 = vpop.eup %5117 }
 0x7bd   :  { %v1985_v54 = vadd.f32 %v1984_v49, %v1983_v48  ;;  %v1977_v56 = vadd.f32 1.0, %v5118_v53 }
 0x7bf   :  { %5119 = vtanh.f32 %v1985_v54  ;;  %v1978_v57 = vmul.f32 0.5, %v1977_v56  ;;  %v2096_v19 = vrot.slane %v1985_v54, 6 }
 0x7c5   :  { %v5120_v58 = vpop.eup %5119 }
 0x7c6   :  { %v1987_v59 = vmul.f32 %v5120_v58, %v1978_v57 }
 0x7c8   :  { %1989 = vst.msk [vmem:[#allocation3] sm:$0xc0] %vm1988_vm11, %v1987_v59  ;;  %v1995_v60 = vrot.slane %v1987_v59, 6 }
 0x7ca   :  { %4915 = vmatmul.msk.f32.vlgmr.msrb.gmra.mxu0 %vm1503_vm8, %v1995_v60  ;;  %4916 = vmatmul.msk.f32.vlgmr.msrb.gmra.mxu1 %vm1503_vm8, %v1995_v60 }
 0x7cb   :  { %4917 = vmatmul.msk.f32.vlgmr.msrb.gmra.mxu2 %vm1503_vm8, %v1995_v60  ;;  %4918 = vmatmul.msk.f32.vlgmr.msrb.gmra.mxu3 %vm1503_vm8, %v1995_v60 }
 0x7cc   :  { %2251 = vmatpush.msrb.mxu0 %v5903_v38  ;;  %2271 = vmatpush.msrb.mxu1 %v5905_v39 }
 0x7cd   :  { %2291 = vmatpush.msrb.mxu2 %v5907_v40  ;;  %2311 = vmatpush.msrb.mxu3 %v5911_v47 }
 0x7ce   :  { %2252 = vmatpush.msrb.mxu0 %v5919_v50  ;;  %2272 = vmatpush.msrb.mxu1 %v5921_v51 }
 0x7cf   :  { %2292 = vmatpush.msrb.mxu2 %v5923_v52  ;;  %2312 = vmatpush.msrb.mxu3 %v5927_v55 }
 0x847   :  { %v2015_v62 = vpop.f32.mrf.mxu0  ;;  %v2035_v1 = vpop.f32.mrf.mxu1 }
 0x848   :  { %v2078_v2 = vadd.f32 %v2015_v62, %v1990_v61  ;;  %v2079_v6 = vadd.f32 %v2035_v1, %v1991_v63 }
 0x84a   :  { %v2082_v8 = vmul.f32 0.5, %v2078_v2  ;;  %v2083_v9 = vmul.f32 0.5, %v2079_v6  ;;  %v2543_v2 = vld [vmem:[#allocation9 + $0x1e0] sm:$0xff]  ;;  %v2544_v6 = vld [vmem:[#allocation9 + $0x1e8] sm:$0xff] }
 0x84c   :  { %5121 = vtanh.f32 %v2082_v8  ;;  %v2545_v8 = vld [vmem:[#allocation9 + $0x1f0] sm:$0xff] }
 0x84d   :  { %5123 = vtanh.f32 %v2083_v9  ;;  %v2546_v9 = vld [vmem:[#allocation9 + $0x1f8] sm:$0xff] }
 0x84e   :  { %v2055_v11 = vpop.f32.mrf.mxu2  ;;  %v2075_v25 = vpop.f32.mrf.mxu3 }
 0x84f   :  { %v2080_v26 = vadd.f32 %v2055_v11, %v1992_v10  ;;  %v2081_v3 = vadd.f32 %v2075_v25, %v1993_v17  ;;  %v2539_v10 = vld [vmem:[#allocation9 + $0x1c0] sm:$0xff]  ;;  %v2540_v11 = vld [vmem:[#allocation9 + $0x1c8] sm:$0xff]  ;;  %v2541_v17 = vld [vmem:[#allocation9 + $0x1d0] sm:$0xff] }
 0x850   :  { %v2542_v25 = vld [vmem:[#allocation9 + $0x1d8] sm:$0xff] }
 0x851   :  { %5125 = vtanh.f32 %v2080_v26  ;;  %v2084_v4 = vmul.f32 0.5, %v2081_v3  ;;  %v2535_v26 = vld [vmem:[#allocation9 + $0x1a0] sm:$0xff]  ;;  %v2536_v3 = vld [vmem:[#allocation9 + $0x1a8] sm:$0xff] }
 0x852   :  { %v5122_v12 = vpop.eup %5121 }
 0x853   :  { %v5124_v13 = vpop.eup %5123  ;;  %v2088_v14 = vadd.f32 1.0, %v5122_v12  ;;  %5127 = vtanh.f32 %v2084_v4  ;;  %v2537_v4 = vld [vmem:[#allocation9 + $0x1b0] sm:$0xff]  ;;  %v2538_v12 = vld [vmem:[#allocation9 + $0x1b8] sm:$0xff] }
 0x854   :  { %v2090_v15 = vadd.f32 1.0, %v5124_v13  ;;  %v2531_v13 = vld [vmem:[#allocation9 + $0x180] sm:$0xff] }
 0x855   :  { %v2089_v5 = vmul.f32 0.5, %v2088_v14  ;;  %v2532_v14 = vld [vmem:[#allocation9 + $0x188] sm:$0xff] }
 0x856   :  { %v2091_v16 = vmul.f32 0.5, %v2090_v15  ;;  %v2533_v15 = vld [vmem:[#allocation9 + $0x190] sm:$0xff] }
 0x857   :  { %v5126_v21 = vpop.eup %5125 }
 0x858   :  { %v2098_v20 = vmul.f32 %v2096_v19, %v2091_v16  ;;  %v2099_v41 = vmul.f32 %v5126_v21, %v2089_v5  ;;  %v2534_v5 = vld [vmem:[#allocation9 + $0x198] sm:$0xff]  ;;  %v2527_v16 = vld [vmem:[#allocation9 + $0x160] sm:$0xff]  ;;  %v2528_v19 = vld [vmem:[#allocation9 + $0x168] sm:$0xff] }
 0x859   :  { %v5128_v23 = vpop.eup %5127  ;;  %v2529_v21 = vld [vmem:[#allocation9 + $0x170] sm:$0xff] }
 0x85a   :  { %v2100_v7 = vadd.f32 %v2099_v41, %v2098_v20  ;;  %v2092_v18 = vadd.f32 1.0, %v5128_v23  ;;  %v2530_v20 = vld [vmem:[#allocation9 + $0x178] sm:$0xff]  ;;  %v2523_v41 = vld [vmem:[#allocation9 + $0x140] sm:$0xff]  ;;  %v2524_v23 = vld [vmem:[#allocation9 + $0x148] sm:$0xff] }
 0x85c   :  { %5129 = vtanh.f32 %v2100_v7  ;;  %v2093_v27 = vmul.f32 0.5, %v2092_v18  ;;  %v2221_v53 = vrot.slane %v2100_v7, 6  ;;  %v2525_v7 = vld [vmem:[#allocation9 + $0x150] sm:$0xff]  ;;  %v2526_v18 = vld [vmem:[#allocation9 + $0x158] sm:$0xff] }
 0x862   :  { %v5130_v24 = vpop.eup %5129 }
 0x863   :  { %v2102_v28 = vmul.f32 %v5130_v24, %v2093_v27  ;;  %v2519_v27 = vld [vmem:[#allocation9 + $0x120] sm:$0xff]  ;;  %v2520_v24 = vld [vmem:[#allocation9 + $0x128] sm:$0xff] }
 0x865   :  { %2103 = vst.msk [vmem:[#allocation3 + $0x8] sm:$0x3] %vm1608_vm7, %v2102_v28  ;;  %4919 = vmatmul.msk.f32.vlgmr.msra.gmra.mxu0 %vm1503_vm8, %v2102_v28  ;;  %4920 = vmatmul.msk.f32.vlgmr.msra.gmra.mxu1 %vm1503_vm8, %v2102_v28 }
 0x866   :  { %4921 = vmatmul.msk.f32.vlgmr.msra.gmra.mxu2 %vm1503_vm8, %v2102_v28  ;;  %4922 = vmatmul.msk.f32.vlgmr.msra.gmra.mxu3 %vm1503_vm8, %v2102_v28  ;;  %v2521_v28 = vld [vmem:[#allocation9 + $0x130] sm:$0xff] }
 0x867   :  { %2377 = vmatpush.msra.mxu0 %v5903_v38  ;;  %2397 = vmatpush.msra.mxu1 %v5905_v39  ;;  %v2105_v38 = vld [vmem:[#allocation2 + $0x20] sm:$0xc] }
 0x868   :  { %2417 = vmatpush.msra.mxu2 %v5907_v40  ;;  %2437 = vmatpush.msra.mxu3 %v5911_v47 }
 0x869   :  { %2378 = vmatpush.msra.mxu0 %v5919_v50  ;;  %2398 = vmatpush.msra.mxu1 %v5921_v51 }
 0x86a   :  { %2418 = vmatpush.msra.mxu2 %v5923_v52  ;;  %2438 = vmatpush.msra.mxu3 %v5927_v55  ;;  %v2107_v52 = vld [vmem:[#allocation2 + $0x38] sm:$0xc] }
 0x8e2   :  { %v2128_v29 = vpop.f32.mrf.mxu0  ;;  %v2148_v30 = vpop.f32.mrf.mxu1 }
 0x8e3   :  { %v2195_v31 = vrot.slane %v2128_v29, 6  ;;  %v2196_v32 = vrot.slane %v2148_v30, 6  ;;  %v2522_v29 = vld [vmem:[#allocation9 + $0x138] sm:$0xff]  ;;  %v2515_v30 = vld [vmem:[#allocation9 + $0x100] sm:$0xff] }
 0x8e5   :  { %v2203_v33 = vadd.f32 %v2195_v31, %v2104_v22  ;;  %v2204_v39 = vadd.f32 %v2196_v32, %v2105_v38  ;;  %v2516_v31 = vld [vmem:[#allocation9 + $0x108] sm:$0xff]  ;;  %v2517_v32 = vld [vmem:[#allocation9 + $0x110] sm:$0xff]  ;;  %v2518_v22 = vld [vmem:[#allocation9 + $0x118] sm:$0xff] }
 0x8e6   :  { %v2511_v38 = vld [vmem:[#allocation9 + $0xe0] sm:$0xff] }
 0x8e7   :  { %v2207_v34 = vmul.f32 0.5, %v2203_v33  ;;  %v2208_v40 = vmul.f32 0.5, %v2204_v39  ;;  %v2512_v33 = vld [vmem:[#allocation9 + $0xe8] sm:$0xff]  ;;  %v2513_v39 = vld [vmem:[#allocation9 + $0xf0] sm:$0xff] }
 0x8e9   :  { %5131 = vtanh.f32 %v2207_v34  ;;  %v2168_v47 = vpop.f32.mrf.mxu2  ;;  %v2188_v35 = vpop.f32.mrf.mxu3  ;;  %v2514_v34 = vld [vmem:[#allocation9 + $0xf8] sm:$0xff] }
 0x8ea   :  { %5133 = vtanh.f32 %v2208_v40  ;;  %v2197_v50 = vrot.slane %v2168_v47, 6  ;;  %v2198_v51 = vrot.slane %v2188_v35, 6  ;;  %v2507_v40 = vld [vmem:[#allocation9 + $0xc0] sm:$0xff]  ;;  %v2508_v47 = vld [vmem:[#allocation9 + $0xc8] sm:$0xff]  ;;  %v2509_v35 = vld [vmem:[#allocation9 + $0xd0] sm:$0xff] }
 0x8ec   :  { %v2205_v37 = vadd.f32 %v2197_v50, %v2106_v36  ;;  %v2206_v55 = vadd.f32 %v2198_v51, %v2107_v52  ;;  %v2510_v50 = vld [vmem:[#allocation9 + $0xd8] sm:$0xff]  ;;  %v2503_v51 = vld [vmem:[#allocation9 + $0xa0] sm:$0xff]  ;;  %v2504_v36 = vld [vmem:[#allocation9 + $0xa8] sm:$0xff] }
 0x8ed   :  { %v2505_v52 = vld [vmem:[#allocation9 + $0xb0] sm:$0xff] }
 0x8ee   :  { %5135 = vtanh.f32 %v2205_v37  ;;  %v2209_v42 = vmul.f32 0.5, %v2206_v55  ;;  %v2506_v37 = vld [vmem:[#allocation9 + $0xb8] sm:$0xff] }
 0x8ef   :  { %v5132_v43 = vpop.eup %5131 }
 0x8f0   :  { %v5134_v44 = vpop.eup %5133  ;;  %v2213_v45 = vadd.f32 1.0, %v5132_v43  ;;  %5137 = vtanh.f32 %v2209_v42  ;;  %v2499_v43 = vld [vmem:[#allocation9 + $0x80] sm:$0xff] }
 0x8f1   :  { %v2215_v46 = vadd.f32 1.0, %v5134_v44  ;;  %v2500_v44 = vld [vmem:[#allocation9 + $0x88] sm:$0xff] }
 0x8f2   :  { %v2214_v48 = vmul.f32 0.5, %v2213_v45  ;;  %v2501_v45 = vld [vmem:[#allocation9 + $0x90] sm:$0xff] }
 0x8f3   :  { %v2216_v49 = vmul.f32 0.5, %v2215_v46 }
 0x8f4   :  { %v5136_v54 = vpop.eup %5135 }
 0x8f5   :  { %v2223_v56 = vmul.f32 %v2221_v53, %v2216_v49  ;;  %v2224_v57 = vmul.f32 %v5136_v54, %v2214_v48  ;;  %v2502_v49 = vld [vmem:[#allocation9 + $0x98] sm:$0xff]  ;;  %v2230_v54 = vld [vmem:[#allocation2 + $0x20] sm:$0x30] }
 0x8f6   :  { %v5138_v58 = vpop.eup %5137  ;;  %v2229_v53 = vld [vmem:[#allocation2 + $0x8] sm:$0x30] }
 0x8f7   :  { %v6024_v59 = vadd.f32 %v2224_v57, %v2223_v56  ;;  %v2217_v60 = vadd.f32 1.0, %v5138_v58  ;;  %v2495_v58 = vld [vmem:[#allocation9 + $0x60] sm:$0xff] }
 0x8f9   :  { %5139 = vtanh.f32 %v6024_v59  ;;  %v2218_v61 = vmul.f32 0.5, %v2217_v60  ;;  %v2496_v60 = vld [vmem:[#allocation9 + $0x68] sm:$0xff] }
 0x8ff   :  { %v5140_v62 = vpop.eup %5139 }
 0x900   :  { %v2227_v63 = vmul.f32 %v5140_v62, %v2218_v61  ;;  %v2497_v61 = vld [vmem:[#allocation9 + $0x70] sm:$0xff]  ;;  %v2498_v62 = vld [vmem:[#allocation9 + $0x78] sm:$0xff] }
 0x902   :  { %2228 = vst.msk [vmem:[#allocation3 + $0x8] sm:$0xc] %vm1734_vm9, %v2227_v63  ;;  %v2234_v1 = vrot.slane %v2227_v63, 2  ;;  %v2491_v63 = vld [vmem:[#allocation9 + $0x40] sm:$0xff] }
 0x904   :  { %4923 = vmatmul.msk.f32.vlgmr.msrb.gmra.mxu0 %vm1503_vm8, %v2234_v1  ;;  %4924 = vmatmul.msk.f32.vlgmr.msrb.gmra.mxu1 %vm1503_vm8, %v2234_v1 }
 0x905   :  { %4925 = vmatmul.msk.f32.vlgmr.msrb.gmra.mxu2 %vm1503_vm8, %v2234_v1  ;;  %4926 = vmatmul.msk.f32.vlgmr.msrb.gmra.mxu3 %vm1503_vm8, %v2234_v1  ;;  %v2492_v1 = vld [vmem:[#allocation9 + $0x48] sm:$0xff] }
 0x906   :  { %2565 = vmatpush.msrb.mxu0 %v2543_v2  ;;  %2588 = vmatpush.msrb.mxu1 %v2544_v6 }
 0x907   :  { %2611 = vmatpush.msrb.mxu2 %v2545_v8  ;;  %2634 = vmatpush.msrb.mxu3 %v2546_v9  ;;  %v2493_v8 = vld [vmem:[#allocation9 + $0x50] sm:$0xff]  ;;  %v2494_v9 = vld [vmem:[#allocation9 + $0x58] sm:$0xff] }
 0x908   :  { %2566 = vmatpush.msrb.mxu0 %v2539_v10  ;;  %2589 = vmatpush.msrb.mxu1 %v2540_v11  ;;  %v2487_v10 = vld [vmem:[#allocation9 + $0x20] sm:$0xff]  ;;  %v2488_v11 = vld [vmem:[#allocation9 + $0x28] sm:$0xff] }
 0x909   :  { %2612 = vmatpush.msrb.mxu2 %v2541_v17  ;;  %2635 = vmatpush.msrb.mxu3 %v2542_v25  ;;  %v2489_v17 = vld [vmem:[#allocation9 + $0x30] sm:$0xff]  ;;  %v2490_v25 = vld [vmem:[#allocation9 + $0x38] sm:$0xff] }
 0x90a   :  { %2567 = vmatpush.msrb.mxu0 %v2535_v26  ;;  %2590 = vmatpush.msrb.mxu1 %v2536_v3 }
 0x90b   :  { %2613 = vmatpush.msrb.mxu2 %v2537_v4  ;;  %2636 = vmatpush.msrb.mxu3 %v2538_v12  ;;  %v2483_v4 = vld [vmem:[#allocation9] sm:$0xff]  ;;  %v2484_v12 = vld [vmem:[#allocation9 + $0x8] sm:$0xff] }
 0x90c   :  { %2568 = vmatpush.msrb.mxu0 %v2531_v13  ;;  %2591 = vmatpush.msrb.mxu1 %v2532_v14 }
 0x90d   :  { %2614 = vmatpush.msrb.mxu2 %v2533_v15  ;;  %2637 = vmatpush.msrb.mxu3 %v2534_v5  ;;  %v2485_v15 = vld [vmem:[#allocation9 + $0x10] sm:$0xff]  ;;  %v2486_v5 = vld [vmem:[#allocation9 + $0x18] sm:$0xff] }
 0x90e   :  { %2569 = vmatpush.msrb.mxu0 %v2527_v16  ;;  %2592 = vmatpush.msrb.mxu1 %v2528_v19  ;;  %v2231_v16 = vld [vmem:[#allocation2 + $0x28] sm:$0x30]  ;;  %v2232_v19 = vld [vmem:[#allocation2 + $0x38] sm:$0x30] }
 0x90f   :  { %2615 = vmatpush.msrb.mxu2 %v2529_v21  ;;  %2638 = vmatpush.msrb.mxu3 %v2530_v20 }
 0x910   :  { %2570 = vmatpush.msrb.mxu0 %v2523_v41  ;;  %2593 = vmatpush.msrb.mxu1 %v2524_v23 }
 0x911   :  { %2616 = vmatpush.msrb.mxu2 %v2525_v7  ;;  %2639 = vmatpush.msrb.mxu3 %v2526_v18 }
 0x912   :  { %2571 = vmatpush.msrb.mxu0 %v2519_v27  ;;  %2594 = vmatpush.msrb.mxu1 %v2520_v24 }
 0x913   :  { %2617 = vmatpush.msrb.mxu2 %v2521_v28  ;;  %2640 = vmatpush.msrb.mxu3 %v2522_v29  ;;  %v2347_v29 = vrot.slane %v6024_v59, 6  ;;  %v2481_v59 = vld [vmem:[#allocation3] sm:$0xff] }
 0x914   :  { %2572 = vmatpush.msrb.mxu0 %v2515_v30  ;;  %2595 = vmatpush.msrb.mxu1 %v2516_v31 }
 0x915   :  { %2618 = vmatpush.msrb.mxu2 %v2517_v32  ;;  %2641 = vmatpush.msrb.mxu3 %v2518_v22 }
 0x916   :  { %2573 = vmatpush.msrb.mxu0 %v2511_v38  ;;  %2596 = vmatpush.msrb.mxu1 %v2512_v33 }
 0x917   :  { %2619 = vmatpush.msrb.mxu2 %v2513_v39  ;;  %2642 = vmatpush.msrb.mxu3 %v2514_v34 }
 0x918   :  { %2574 = vmatpush.msrb.mxu0 %v2507_v40  ;;  %2597 = vmatpush.msrb.mxu1 %v2508_v47 }
 0x919   :  { %2620 = vmatpush.msrb.mxu2 %v2509_v35  ;;  %2643 = vmatpush.msrb.mxu3 %v2510_v50 }
 0x91a   :  { %2575 = vmatpush.msrb.mxu0 %v2503_v51  ;;  %2598 = vmatpush.msrb.mxu1 %v2504_v36  ;;  %v6041_v51 = vld [vmem:[#allocation11 + $0x20] sm:$0xff]  ;;  %v6043_v36 = vld [vmem:[#allocation11 + $0x28] sm:$0xff] }
 0x91b   :  { %2621 = vmatpush.msrb.mxu2 %v2505_v52  ;;  %2644 = vmatpush.msrb.mxu3 %v2506_v37  ;;  %v6045_v52 = vld [vmem:[#allocation11 + $0x30] sm:$0xff] }
 0x91c   :  { %2576 = vmatpush.msrb.mxu0 %v2499_v43  ;;  %2599 = vmatpush.msrb.mxu1 %v2500_v44  ;;  %v2355_v43 = vld [vmem:[#allocation2 + $0x8] sm:$0xc0]  ;;  %v2356_v44 = vld [vmem:[#allocation2 + $0x20] sm:$0xc0] }
 0x91d   :  { %2622 = vmatpush.msrb.mxu2 %v2501_v45  ;;  %2645 = vmatpush.msrb.mxu3 %v2502_v49  ;;  %v6054_v45 = vld [vmem:[%s6435_s9] sm:$0xf] }
 0x91e   :  { %2577 = vmatpush.msrb.mxu0 %v2495_v58  ;;  %2600 = vmatpush.msrb.mxu1 %v2496_v60  ;;  %v2357_v60 = vld [vmem:[#allocation2 + $0x28] sm:$0xc0] }
 0x91f   :  { %2623 = vmatpush.msrb.mxu2 %v2497_v61  ;;  %2646 = vmatpush.msrb.mxu3 %v2498_v62  ;;  %v2358_v62 = vld [vmem:[#allocation2 + $0x38] sm:$0xc0] }
 0x920   :  { %2578 = vmatpush.msrb.mxu0 %v2491_v63  ;;  %2601 = vmatpush.msrb.mxu1 %v2492_v1 }
 0x921   :  { %2624 = vmatpush.msrb.mxu2 %v2493_v8  ;;  %2647 = vmatpush.msrb.mxu3 %v2494_v9  ;;  %v6064_v9 = vld [vmem:[#allocation11] sm:$0xff] }
 0x922   :  { %2579 = vmatpush.msrb.mxu0 %v2487_v10  ;;  %2602 = vmatpush.msrb.mxu1 %v2488_v11  ;;  %v6066_v10 = vld [vmem:[#allocation11 + $0x8] sm:$0xff]  ;;  %v6068_v11 = vld [vmem:[#allocation11 + $0x10] sm:$0xff] }
 0x923   :  { %2625 = vmatpush.msrb.mxu2 %v2489_v17  ;;  %2648 = vmatpush.msrb.mxu3 %v2490_v25 }
 0x924   :  { %2580 = vmatpush.msrb.mxu0 %v2483_v4  ;;  %2603 = vmatpush.msrb.mxu1 %v2484_v12  ;;  %v2559_v4 = vperm.slane %v6054_v45, 2  ;;  %v2560_v12 = vperm.slane %v6054_v45, 3 }
 0x925   :  { %2626 = vmatpush.msrb.mxu2 %v2485_v15  ;;  %2649 = vmatpush.msrb.mxu3 %v2486_v5 }
 0x981   :  { %v2254_v55 = vpop.f32.mrf.mxu0  ;;  %v2274_v42 = vpop.f32.mrf.mxu1 }
 0x982   :  { %v2321_v46 = vrot.slane %v2254_v55, 4  ;;  %v2322_v48 = vrot.slane %v2274_v42, 4  ;;  %v6049_v42 = vld [vmem:[#allocation11 + $0x38] sm:$0xff] }
 0x984   :  { %v2329_v56 = vadd.f32 %v2321_v46, %v2229_v53  ;;  %v2330_v57 = vadd.f32 %v2322_v48, %v2230_v54  ;;  %v2557_v54 = vperm.slane %v6054_v45, 0 }
 0x986   :  { %v2333_v2 = vmul.f32 0.5, %v2329_v56  ;;  %v2334_v6 = vmul.f32 0.5, %v2330_v57  ;;  %v2558_v56 = vperm.slane %v6054_v45, 1 }
 0x988   :  { %5141 = vtanh.f32 %v2333_v2  ;;  %v2294_v26 = vpop.f32.mrf.mxu2  ;;  %v2314_v3 = vpop.f32.mrf.mxu3 }
 0x989   :  { %5143 = vtanh.f32 %v2334_v6  ;;  %v2323_v13 = vrot.slane %v2294_v26, 4  ;;  %v2324_v14 = vrot.slane %v2314_v3, 4  ;;  %v6072_v26 = vld [vmem:[#allocation11 + $0x18] sm:$0xff] }
 0x98b   :  { %v2331_v21 = vadd.f32 %v2323_v13, %v2231_v16  ;;  %v2332_v20 = vadd.f32 %v2324_v14, %v2232_v19 }
 0x98d   :  { %5145 = vtanh.f32 %v2331_v21  ;;  %v2335_v41 = vmul.f32 0.5, %v2332_v20 }
 0x98e   :  { %v5142_v23 = vpop.eup %5141 }
 0x98f   :  { %v5144_v7 = vpop.eup %5143  ;;  %v2339_v18 = vadd.f32 1.0, %v5142_v23  ;;  %5147 = vtanh.f32 %v2335_v41 }
 0x990   :  { %v2341_v27 = vadd.f32 1.0, %v5144_v7 }
 0x991   :  { %v2340_v24 = vmul.f32 0.5, %v2339_v18 }
 0x992   :  { %v2342_v28 = vmul.f32 0.5, %v2341_v27 }
 0x993   :  { %v5146_v30 = vpop.eup %5145 }
 0x994   :  { %v2349_v31 = vmul.f32 %v2347_v29, %v2342_v28  ;;  %v2350_v32 = vmul.f32 %v5146_v30, %v2340_v24 }
 0x995   :  { %v5148_v22 = vpop.eup %5147 }
 0x996   :  { %v6033_v38 = vadd.f32 %v2350_v32, %v2349_v31  ;;  %v2343_v33 = vadd.f32 1.0, %v5148_v22 }
 0x998   :  { %5149 = vtanh.f32 %v6033_v38  ;;  %v2344_v39 = vmul.f32 0.5, %v2343_v33  ;;  %v2473_v7 = vrot.slane %v6033_v38, 6 }
 0x99e   :  { %v5150_v34 = vpop.eup %5149 }
 0x99f   :  { %v2353_v40 = vmul.f32 %v5150_v34, %v2344_v39 }
 0x9a1   :  { %2354 = vst.msk [vmem:[#allocation3 + $0x8] sm:$0x30] %vm1861_vm10, %v2353_v40  ;;  %v2360_v47 = vrot.slane %v2353_v40, 4 }
 0x9a3   :  { %4927 = vmatmul.msk.f32.vlgmr.msra.gmra.mxu0 %vm1503_vm8, %v2360_v47  ;;  %4928 = vmatmul.msk.f32.vlgmr.msra.gmra.mxu1 %vm1503_vm8, %v2360_v47 }
 0x9a4   :  { %4929 = vmatmul.msk.f32.vlgmr.msra.gmra.mxu2 %vm1503_vm8, %v2360_v47  ;;  %4930 = vmatmul.msk.f32.vlgmr.msra.gmra.mxu3 %vm1503_vm8, %v2360_v47 }
 0x9a5   :  { %2683 = vmatpush.msra.mxu0 %v6041_v51  ;;  %2703 = vmatpush.msra.mxu1 %v6043_v36 }
 0x9a6   :  { %2723 = vmatpush.msra.mxu2 %v6045_v52  ;;  %2743 = vmatpush.msra.mxu3 %v6049_v42 }
 0x9a7   :  { %2684 = vmatpush.msra.mxu0 %v6064_v9  ;;  %2704 = vmatpush.msra.mxu1 %v6066_v10 }
 0x9a8   :  { %2724 = vmatpush.msra.mxu2 %v6068_v11  ;;  %2744 = vmatpush.msra.mxu3 %v6072_v26 }
 0x9ab   :  { %2581 = vmatmul.f32.vlgmr.msrb.gmra.mxu0 %v2481_v59  ;;  %2604 = vmatmul.f32.vlgmr.msrb.gmra.mxu1 %v2481_v59 }
 0x9ac   :  { %2627 = vmatmul.f32.vlgmr.msrb.gmra.mxu2 %v2481_v59  ;;  %2650 = vmatmul.f32.vlgmr.msrb.gmra.mxu3 %v2481_v59 }
 0x9ad   :  { %2793 = vmatpush.msrb.mxu0 %v6041_v51  ;;  %2813 = vmatpush.msrb.mxu1 %v6043_v36 }
 0x9ae   :  { %2833 = vmatpush.msrb.mxu2 %v6045_v52  ;;  %2853 = vmatpush.msrb.mxu3 %v6049_v42 }
 0x9af   :  { %2794 = vmatpush.msrb.mxu0 %v6064_v9  ;;  %2814 = vmatpush.msrb.mxu1 %v6066_v10 }
 0x9b0   :  { %2834 = vmatpush.msrb.mxu2 %v6068_v11  ;;  %2854 = vmatpush.msrb.mxu3 %v6072_v26 }
 0xa20   :  { %v2380_v35 = vpop.f32.mrf.mxu0  ;;  %v2400_v50 = vpop.f32.mrf.mxu1 }
 0xa21   :  { %v2447_v37 = vrot.slane %v2380_v35, 2  ;;  %v2448_v55 = vrot.slane %v2400_v50, 2 }
 0xa23   :  { %v2455_v46 = vadd.f32 %v2447_v37, %v2355_v43  ;;  %v2456_v48 = vadd.f32 %v2448_v55, %v2356_v44 }
 0xa25   :  { %v2459_v49 = vmul.f32 0.5, %v2455_v46  ;;  %v2460_v53 = vmul.f32 0.5, %v2456_v48 }
 0xa27   :  { %5151 = vtanh.f32 %v2459_v49  ;;  %v2420_v57 = vpop.f32.mrf.mxu2  ;;  %v2440_v58 = vpop.f32.mrf.mxu3 }
 0xa28   :  { %5153 = vtanh.f32 %v2460_v53  ;;  %v2449_v61 = vrot.slane %v2420_v57, 2  ;;  %v2450_v63 = vrot.slane %v2440_v58, 2  ;;  %v2582_v1 = vpop.f32.mrf.mxu0  ;;  %v2605_v2 = vpop.f32.mrf.mxu1 }
 0xa29   :  { %v2583_v6 = vadd.f32 %v2582_v1, %v2557_v54  ;;  %v2606_v8 = vadd.f32 %v2605_v2, %v2558_v56 }
 0xa2a   :  { %v2457_v17 = vadd.f32 %v2449_v61, %v2357_v60  ;;  %v2458_v25 = vadd.f32 %v2450_v63, %v2358_v62 }
 0xa2b   :  { %2657 = vst [vmem:[#allocation2 + $0x30] sm:$0xff] %v2583_v6 }
 0xa2c   :  { %5155 = vtanh.f32 %v2457_v17  ;;  %v2461_v3 = vmul.f32 0.5, %v2458_v25  ;;  %2658 = vst [vmem:[#allocation2] sm:$0xff] %v2606_v8 }
 0xa2d   :  { %v5152_v13 = vpop.eup %5151 }
 0xa2e   :  { %v5154_v14 = vpop.eup %5153  ;;  %v2465_v15 = vadd.f32 1.0, %v5152_v13  ;;  %5157 = vtanh.f32 %v2461_v3 }
 0xa2f   :  { %v2467_v5 = vadd.f32 1.0, %v5154_v14  ;;  %v2628_v16 = vpop.f32.mrf.mxu2  ;;  %v2651_v19 = vpop.f32.mrf.mxu3 }
 0xa30   :  { %v2466_v21 = vmul.f32 0.5, %v2465_v15  ;;  %v2629_v20 = vadd.f32 %v2628_v16, %v2559_v4  ;;  %v2652_v41 = vadd.f32 %v2651_v19, %v2560_v12 }
 0xa31   :  { %v2468_v23 = vmul.f32 0.5, %v2467_v5 }
 0xa32   :  { %v5156_v18 = vpop.eup %5155  ;;  %2659 = vst [vmem:[#allocation2 + $0x18] sm:$0xff] %v2629_v20  ;;  %v2665_v37 = vld [vmem:[#allocation2 + $0x30] sm:$0x3] }
 0xa33   :  { %v2475_v27 = vmul.f32 %v2473_v7, %v2468_v23  ;;  %v2476_v24 = vmul.f32 %v5156_v18, %v2466_v21  ;;  %2660 = vst [vmem:[#allocation2 + $0x10] sm:$0xff] %v2652_v41  ;;  %v2666_v43 = vld [vmem:[#allocation2] sm:$0x3]  ;;  %v2772_v41 = vld [vmem:[#allocation2 + $0x30] sm:$0xc] }
 0xa34   :  { %v5158_v28 = vpop.eup %5157  ;;  %v2773_v23 = vld [vmem:[#allocation2] sm:$0xc] }
 0xa35   :  { %v2477_v29 = vadd.f32 %v2476_v24, %v2475_v27  ;;  %v2469_v30 = vadd.f32 1.0, %v5158_v28 }
 0xa37   :  { %5159 = vtanh.f32 %v2477_v29  ;;  %v2470_v31 = vmul.f32 0.5, %v2469_v30 }
 0xa39   :  { %v2667_v45 = vld [vmem:[#allocation2 + $0x18] sm:$0x3] }
 0xa3d   :  { %v5160_v32 = vpop.eup %5159 }
 0xa3e   :  { %v2479_v22 = vmul.f32 %v5160_v32, %v2470_v31  ;;  %v2774_v32 = vld [vmem:[#allocation2 + $0x18] sm:$0xc] }
 0xa40   :  { %2480 = vst.msk [vmem:[#allocation3 + $0x8] sm:$0xc0] %vm1988_vm11, %v2479_v22  ;;  %v2775_v22 = vld [vmem:[#allocation2 + $0x10] sm:$0xc] }
 0xa47   :  { %v2482_v33 = vld [vmem:[#allocation3 + $0x8] sm:$0xff] }
 0xa48   :  { %2584 = vmatmul.f32.gmra.mxu0 %v2482_v33  ;;  %2607 = vmatmul.f32.gmra.mxu1 %v2482_v33 }
 0xa49   :  { %2630 = vmatmul.f32.gmra.mxu2 %v2482_v33  ;;  %2653 = vmatmul.f32.gmra.mxu3 %v2482_v33 }
 0xa50   :  { %2685 = vmatmul.f32.vlgmr.msra.gmra.mxu0 %v5535_v0  ;;  %2705 = vmatmul.f32.vlgmr.msra.gmra.mxu1 %v5535_v0 }
 0xa51   :  { %2725 = vmatmul.f32.vlgmr.msra.gmra.mxu2 %v5535_v0  ;;  %2745 = vmatmul.f32.vlgmr.msra.gmra.mxu3 %v5535_v0 }
 0xa52   :  { %2919 = vmatpush.msra.mxu0 %v6041_v51  ;;  %2939 = vmatpush.msra.mxu1 %v6043_v36 }
 0xa53   :  { %2959 = vmatpush.msra.mxu2 %v6045_v52  ;;  %2979 = vmatpush.msra.mxu3 %v6049_v42 }
 0xa54   :  { %2920 = vmatpush.msra.mxu0 %v6064_v9  ;;  %2940 = vmatpush.msra.mxu1 %v6066_v10 }
 0xa55   :  { %2960 = vmatpush.msra.mxu2 %v6068_v11  ;;  %2980 = vmatpush.msra.mxu3 %v6072_v26 }
 0xac5   :  { %v2585_v38 = vpop.f32.mrf.mxu0  ;;  %v2608_v39 = vpop.f32.mrf.mxu1 }
 0xac6   :  { %v2586_v34 = vadd.f32 %v2585_v38, %v2557_v54  ;;  %v2609_v40 = vadd.f32 %v2608_v39, %v2558_v56  ;;  %v2668_v56 = vld [vmem:[#allocation2 + $0x10] sm:$0x3] }
 0xac8   :  { %2661 = vst [vmem:[#allocation2 + $0x8] sm:$0xff] %v2586_v34 }
 0xac9   :  { %2662 = vst [vmem:[#allocation2 + $0x20] sm:$0xff] %v2609_v40 }
 0xacc   :  { %v2631_v47 = vpop.f32.mrf.mxu2  ;;  %v2654_v59 = vpop.f32.mrf.mxu3 }
 0xacd   :  { %v2632_v35 = vadd.f32 %v2631_v47, %v2559_v4  ;;  %v2655_v50 = vadd.f32 %v2654_v59, %v2560_v12  ;;  %v2686_v55 = vpop.f32.mrf.mxu0  ;;  %v2706_v44 = vpop.f32.mrf.mxu1 }
 0xace   :  { %v2749_v46 = vadd.f32 %v2686_v55, %v2665_v37  ;;  %v2750_v48 = vadd.f32 %v2706_v44, %v2666_v43 }
 0xacf   :  { %2663 = vst [vmem:[#allocation2 + $0x28] sm:$0xff] %v2632_v35 }
 0xad0   :  { %2664 = vst [vmem:[#allocation2 + $0x38] sm:$0xff] %v2655_v50  ;;  %v2753_v49 = vmul.f32 0.5, %v2749_v46  ;;  %v2754_v53 = vmul.f32 0.5, %v2750_v48 }
 0xad2   :  { %5161 = vtanh.f32 %v2753_v49 }
 0xad3   :  { %5163 = vtanh.f32 %v2754_v53 }
 0xad4   :  { %v2726_v54 = vpop.f32.mrf.mxu2  ;;  %v2746_v57 = vpop.f32.mrf.mxu3 }
 0xad5   :  { %v2751_v58 = vadd.f32 %v2726_v54, %v2667_v45  ;;  %v2752_v60 = vadd.f32 %v2746_v57, %v2668_v56 }
 0xad7   :  { %5165 = vtanh.f32 %v2751_v58  ;;  %v2755_v61 = vmul.f32 0.5, %v2752_v60 }
 0xad8   :  { %v5162_v62 = vpop.eup %5161 }
 0xad9   :  { %v5164_v63 = vpop.eup %5163  ;;  %v2759_v1 = vadd.f32 1.0, %v5162_v62  ;;  %5167 = vtanh.f32 %v2755_v61  ;;  %v2897_v62 = vld [vmem:[#allocation2 + $0x30] sm:$0x30] }
 0xada   :  { %v2761_v2 = vadd.f32 1.0, %v5164_v63  ;;  %v2898_v63 = vld [vmem:[#allocation2] sm:$0x30] }
 0xadb   :  { %v2760_v6 = vmul.f32 0.5, %v2759_v1 }
 0xadc   :  { %v2762_v8 = vmul.f32 0.5, %v2761_v2 }
 0xadd   :  { %v5166_v17 = vpop.eup %5165 }
 0xade   :  { %v2766_v25 = vmul.f32 0.0, %v2762_v8  ;;  %v2767_v3 = vmul.f32 %v5166_v17, %v2760_v6 }
 0xadf   :  { %v5168_v4 = vpop.eup %5167 }
 0xae0   :  { %v2768_v12 = vadd.f32 %v2767_v3, %v2766_v25  ;;  %v2763_v13 = vadd.f32 1.0, %v5168_v4 }
 0xae2   :  { %5169 = vtanh.f32 %v2768_v12  ;;  %v2764_v14 = vmul.f32 0.5, %v2763_v13  ;;  %v2889_v37 = vrot.slane %v2768_v12, 6  ;;  %v2899_v12 = vld [vmem:[#allocation2 + $0x18] sm:$0x30]  ;;  %v2900_v13 = vld [vmem:[#allocation2 + $0x10] sm:$0x30] }
 0xae8   :  { %v5170_v15 = vpop.eup %5169 }
 0xae9   :  { %v2770_v5 = vmul.f32 %v5170_v15, %v2764_v14 }
 0xaeb   :  { %2771 = vst.msk [vmem:[#allocation3] sm:$0x3] %vm1608_vm7, %v2770_v5  ;;  %4931 = vmatmul.msk.f32.vlgmr.msrb.gmra.mxu0 %vm1503_vm8, %v2770_v5  ;;  %4932 = vmatmul.msk.f32.vlgmr.msrb.gmra.mxu1 %vm1503_vm8, %v2770_v5 }
 0xaec   :  { %4933 = vmatmul.msk.f32.vlgmr.msrb.gmra.mxu2 %vm1503_vm8, %v2770_v5  ;;  %4934 = vmatmul.msk.f32.vlgmr.msrb.gmra.mxu3 %vm1503_vm8, %v2770_v5 }
 0xaed   :  { %3045 = vmatpush.msrb.mxu0 %v6041_v51  ;;  %3065 = vmatpush.msrb.mxu1 %v6043_v36 }
 0xaee   :  { %3085 = vmatpush.msrb.mxu2 %v6045_v52  ;;  %3105 = vmatpush.msrb.mxu3 %v6049_v42 }
 0xaef   :  { %3046 = vmatpush.msrb.mxu0 %v6064_v9  ;;  %3066 = vmatpush.msrb.mxu1 %v6066_v10 }
 0xaf0   :  { %3086 = vmatpush.msrb.mxu2 %v6068_v11  ;;  %3106 = vmatpush.msrb.mxu3 %v6072_v26 }
 0xb68   :  { %v2796_v16 = vpop.f32.mrf.mxu0  ;;  %v2816_v19 = vpop.f32.mrf.mxu1 }
 0xb69   :  { %v2863_v21 = vrot.slane %v2796_v16, 6  ;;  %v2864_v20 = vrot.slane %v2816_v19, 6 }
 0xb6b   :  { %v2871_v7 = vadd.f32 %v2863_v21, %v2772_v41  ;;  %v2872_v18 = vadd.f32 %v2864_v20, %v2773_v23 }
 0xb6d   :  { %v2875_v27 = vmul.f32 0.5, %v2871_v7  ;;  %v2876_v24 = vmul.f32 0.5, %v2872_v18 }
 0xb6f   :  { %5171 = vtanh.f32 %v2875_v27  ;;  %v2836_v28 = vpop.f32.mrf.mxu2  ;;  %v2856_v29 = vpop.f32.mrf.mxu3 }
 0xb70   :  { %5173 = vtanh.f32 %v2876_v24  ;;  %v2865_v30 = vrot.slane %v2836_v28, 6  ;;  %v2866_v31 = vrot.slane %v2856_v29, 6 }
 0xb72   :  { %v2873_v33 = vadd.f32 %v2865_v30, %v2774_v32  ;;  %v2874_v38 = vadd.f32 %v2866_v31, %v2775_v22 }
 0xb74   :  { %5175 = vtanh.f32 %v2873_v33  ;;  %v2877_v39 = vmul.f32 0.5, %v2874_v38 }
 0xb75   :  { %v5172_v34 = vpop.eup %5171 }
 0xb76   :  { %v5174_v40 = vpop.eup %5173  ;;  %v2881_v47 = vadd.f32 1.0, %v5172_v34  ;;  %5177 = vtanh.f32 %v2877_v39 }
 0xb77   :  { %v2883_v59 = vadd.f32 1.0, %v5174_v40 }
 0xb78   :  { %v2882_v35 = vmul.f32 0.5, %v2881_v47  ;;  %v3023_v47 = vld [vmem:[#allocation2 + $0x30] sm:$0xc0] }
 0xb79   :  { %v2884_v50 = vmul.f32 0.5, %v2883_v59  ;;  %v3024_v59 = vld [vmem:[#allocation2] sm:$0xc0] }
 0xb7a   :  { %v5176_v55 = vpop.eup %5175 }
 0xb7b   :  { %v2891_v43 = vmul.f32 %v2889_v37, %v2884_v50  ;;  %v2892_v44 = vmul.f32 %v5176_v55, %v2882_v35 }
 0xb7c   :  { %v5178_v46 = vpop.eup %5177 }
 0xb7d   :  { %v2893_v48 = vadd.f32 %v2892_v44, %v2891_v43  ;;  %v2885_v49 = vadd.f32 1.0, %v5178_v46 }
 0xb7f   :  { %5179 = vtanh.f32 %v2893_v48  ;;  %v2886_v53 = vmul.f32 0.5, %v2885_v49  ;;  %v3015_v7 = vrot.slane %v2893_v48, 6  ;;  %v3025_v49 = vld [vmem:[#allocation2 + $0x18] sm:$0xc0] }
 0xb85   :  { %v5180_v45 = vpop.eup %5179 }
 0xb86   :  { %v2895_v54 = vmul.f32 %v5180_v45, %v2886_v53  ;;  %v3026_v53 = vld [vmem:[#allocation2 + $0x10] sm:$0xc0] }
 0xb88   :  { %2896 = vst.msk [vmem:[#allocation3] sm:$0xc] %vm1734_vm9, %v2895_v54  ;;  %v2902_v56 = vrot.slane %v2895_v54, 2 }
 0xb8a   :  { %4935 = vmatmul.msk.f32.vlgmr.msra.gmra.mxu0 %vm1503_vm8, %v2902_v56  ;;  %4936 = vmatmul.msk.f32.vlgmr.msra.gmra.mxu1 %vm1503_vm8, %v2902_v56 }
 0xb8b   :  { %4937 = vmatmul.msk.f32.vlgmr.msra.gmra.mxu2 %vm1503_vm8, %v2902_v56  ;;  %4938 = vmatmul.msk.f32.vlgmr.msra.gmra.mxu3 %vm1503_vm8, %v2902_v56 }
 0xb8c   :  { %3171 = vmatpush.msra.mxu0 %v6041_v51  ;;  %3191 = vmatpush.msra.mxu1 %v6043_v36 }
 0xb8d   :  { %3211 = vmatpush.msra.mxu2 %v6045_v52  ;;  %3231 = vmatpush.msra.mxu3 %v6049_v42 }
 0xb8e   :  { %3172 = vmatpush.msra.mxu0 %v6064_v9  ;;  %3192 = vmatpush.msra.mxu1 %v6066_v10 }
 0xb8f   :  { %3212 = vmatpush.msra.mxu2 %v6068_v11  ;;  %3232 = vmatpush.msra.mxu3 %v6072_v26 }
 0xc07   :  { %v2922_v57 = vpop.f32.mrf.mxu0  ;;  %v2942_v58 = vpop.f32.mrf.mxu1 }
 0xc08   :  { %v2989_v60 = vrot.slane %v2922_v57, 4  ;;  %v2990_v61 = vrot.slane %v2942_v58, 4 }
 0xc0a   :  { %v2997_v1 = vadd.f32 %v2989_v60, %v2897_v62  ;;  %v2998_v2 = vadd.f32 %v2990_v61, %v2898_v63 }
 0xc0c   :  { %v3001_v6 = vmul.f32 0.5, %v2997_v1  ;;  %v3002_v8 = vmul.f32 0.5, %v2998_v2 }
 0xc0e   :  { %5181 = vtanh.f32 %v3001_v6  ;;  %v2962_v17 = vpop.f32.mrf.mxu2  ;;  %v2982_v25 = vpop.f32.mrf.mxu3 }
 0xc0f   :  { %5183 = vtanh.f32 %v3002_v8  ;;  %v2991_v3 = vrot.slane %v2962_v17, 4  ;;  %v2992_v4 = vrot.slane %v2982_v25, 4 }
 0xc11   :  { %v2999_v14 = vadd.f32 %v2991_v3, %v2899_v12  ;;  %v3000_v15 = vadd.f32 %v2992_v4, %v2900_v13 }
 0xc13   :  { %5185 = vtanh.f32 %v2999_v14  ;;  %v3003_v5 = vmul.f32 0.5, %v3000_v15  ;;  %v3149_v15 = vld [vmem:[#allocation2 + $0x8] sm:$0x3] }
 0xc14   :  { %v5182_v16 = vpop.eup %5181 }
 0xc15   :  { %v5184_v19 = vpop.eup %5183  ;;  %v3007_v21 = vadd.f32 1.0, %v5182_v16  ;;  %5187 = vtanh.f32 %v3003_v5  ;;  %v3150_v16 = vld [vmem:[#allocation2 + $0x20] sm:$0x3] }
 0xc16   :  { %v3009_v20 = vadd.f32 1.0, %v5184_v19 }
 0xc17   :  { %v3008_v41 = vmul.f32 0.5, %v3007_v21 }
 0xc18   :  { %v3010_v23 = vmul.f32 0.5, %v3009_v20 }
 0xc19   :  { %v5186_v18 = vpop.eup %5185 }
 0xc1a   :  { %v3017_v27 = vmul.f32 %v3015_v7, %v3010_v23  ;;  %v3018_v24 = vmul.f32 %v5186_v18, %v3008_v41  ;;  %v3151_v7 = vld [vmem:[#allocation2 + $0x28] sm:$0x3] }
 0xc1b   :  { %v5188_v28 = vpop.eup %5187 }
 0xc1c   :  { %v3019_v29 = vadd.f32 %v3018_v24, %v3017_v27  ;;  %v3011_v30 = vadd.f32 1.0, %v5188_v28  ;;  %v3152_v27 = vld [vmem:[#allocation2 + $0x38] sm:$0x3] }
 0xc1e   :  { %5189 = vtanh.f32 %v3019_v29  ;;  %v3012_v31 = vmul.f32 0.5, %v3011_v30  ;;  %v3141_v1 = vrot.slane %v3019_v29, 6 }
 0xc24   :  { %v5190_v32 = vpop.eup %5189 }
 0xc25   :  { %v3021_v22 = vmul.f32 %v5190_v32, %v3012_v31 }
 0xc27   :  { %3022 = vst.msk [vmem:[#allocation3] sm:$0x30] %vm1861_vm10, %v3021_v22  ;;  %v3028_v33 = vrot.slane %v3021_v22, 4 }
 0xc29   :  { %4939 = vmatmul.msk.f32.vlgmr.msrb.gmra.mxu0 %vm1503_vm8, %v3028_v33  ;;  %4940 = vmatmul.msk.f32.vlgmr.msrb.gmra.mxu1 %vm1503_vm8, %v3028_v33 }
 0xc2a   :  { %4941 = vmatmul.msk.f32.vlgmr.msrb.gmra.mxu2 %vm1503_vm8, %v3028_v33  ;;  %4942 = vmatmul.msk.f32.vlgmr.msrb.gmra.mxu3 %vm1503_vm8, %v3028_v33 }
 0xc2b   :  { %3284 = vmatpush.msrb.mxu0 %v6041_v51  ;;  %3304 = vmatpush.msrb.mxu1 %v6043_v36 }
 0xc2c   :  { %3324 = vmatpush.msrb.mxu2 %v6045_v52  ;;  %3344 = vmatpush.msrb.mxu3 %v6049_v42 }
 0xc2d   :  { %3285 = vmatpush.msrb.mxu0 %v6064_v9  ;;  %3305 = vmatpush.msrb.mxu1 %v6066_v10 }
 0xc2e   :  { %3325 = vmatpush.msrb.mxu2 %v6068_v11  ;;  %3345 = vmatpush.msrb.mxu3 %v6072_v26 }
 0xca6   :  { %v3048_v38 = vpop.f32.mrf.mxu0  ;;  %v3068_v39 = vpop.f32.mrf.mxu1 }
 0xca7   :  { %v3115_v34 = vrot.slane %v3048_v38, 2  ;;  %v3116_v40 = vrot.slane %v3068_v39, 2 }
 0xca9   :  { %v3123_v35 = vadd.f32 %v3115_v34, %v3023_v47  ;;  %v3124_v50 = vadd.f32 %v3116_v40, %v3024_v59 }
 0xcab   :  { %v3127_v37 = vmul.f32 0.5, %v3123_v35  ;;  %v3128_v55 = vmul.f32 0.5, %v3124_v50 }
 0xcad   :  { %5191 = vtanh.f32 %v3127_v37  ;;  %v3088_v43 = vpop.f32.mrf.mxu2  ;;  %v3108_v44 = vpop.f32.mrf.mxu3 }
 0xcae   :  { %5193 = vtanh.f32 %v3128_v55  ;;  %v3117_v46 = vrot.slane %v3088_v43, 2  ;;  %v3118_v48 = vrot.slane %v3108_v44, 2 }
 0xcb0   :  { %v3125_v45 = vadd.f32 %v3117_v46, %v3025_v49  ;;  %v3126_v54 = vadd.f32 %v3118_v48, %v3026_v53 }
 0xcb2   :  { %5195 = vtanh.f32 %v3125_v45  ;;  %v3129_v56 = vmul.f32 0.5, %v3126_v54  ;;  %v3263_v45 = vld [vmem:[#allocation2 + $0x8] sm:$0xc] }
 0xcb3   :  { %v5192_v57 = vpop.eup %5191 }
 0xcb4   :  { %v5194_v58 = vpop.eup %5193  ;;  %v3133_v60 = vadd.f32 1.0, %v5192_v57  ;;  %5197 = vtanh.f32 %v3129_v56 }
 0xcb5   :  { %v3135_v61 = vadd.f32 1.0, %v5194_v58  ;;  %v3265_v58 = vld [vmem:[#allocation2 + $0x28] sm:$0xc] }
 0xcb6   :  { %v3134_v62 = vmul.f32 0.5, %v3133_v60 }
 0xcb7   :  { %v3136_v63 = vmul.f32 0.5, %v3135_v61 }
 0xcb8   :  { %v5196_v2 = vpop.eup %5195 }
 0xcb9   :  { %v3143_v6 = vmul.f32 %v3141_v1, %v3136_v63  ;;  %v3144_v8 = vmul.f32 %v5196_v2, %v3134_v62 }
 0xcba   :  { %v5198_v17 = vpop.eup %5197 }
 0xcbb   :  { %v3145_v25 = vadd.f32 %v3144_v8, %v3143_v6  ;;  %v3137_v3 = vadd.f32 1.0, %v5198_v17 }
 0xcbd   :  { %5199 = vtanh.f32 %v3145_v25  ;;  %v3138_v4 = vmul.f32 0.5, %v3137_v3  ;;  %v3255_v34 = vrot.slane %v3145_v25, 6 }
 0xcc3   :  { %v5200_v12 = vpop.eup %5199 }
 0xcc4   :  { %v3147_v13 = vmul.f32 %v5200_v12, %v3138_v4 }
 0xcc6   :  { %3148 = vst.msk [vmem:[#allocation3] sm:$0xc0] %vm1988_vm11, %v3147_v13  ;;  %v3154_v14 = vrot.slane %v3147_v13, 6 }
 0xcc8   :  { %4943 = vmatmul.msk.f32.vlgmr.msra.gmra.mxu0 %vm1503_vm8, %v3154_v14  ;;  %4944 = vmatmul.msk.f32.vlgmr.msra.gmra.mxu1 %vm1503_vm8, %v3154_v14 }
 0xcc9   :  { %4945 = vmatmul.msk.f32.vlgmr.msra.gmra.mxu2 %vm1503_vm8, %v3154_v14  ;;  %4946 = vmatmul.msk.f32.vlgmr.msra.gmra.mxu3 %vm1503_vm8, %v3154_v14 }
 0xcca   :  { %3410 = vmatpush.msra.mxu0 %v6041_v51  ;;  %3430 = vmatpush.msra.mxu1 %v6043_v36 }
 0xccb   :  { %3450 = vmatpush.msra.mxu2 %v6045_v52  ;;  %3470 = vmatpush.msra.mxu3 %v6049_v42 }
 0xccc   :  { %3411 = vmatpush.msra.mxu0 %v6064_v9  ;;  %3431 = vmatpush.msra.mxu1 %v6066_v10 }
 0xccd   :  { %3451 = vmatpush.msra.mxu2 %v6068_v11  ;;  %3471 = vmatpush.msra.mxu3 %v6072_v26 }
 0xd45   :  { %v3174_v5 = vpop.f32.mrf.mxu0  ;;  %v3194_v19 = vpop.f32.mrf.mxu1 }
 0xd46   :  { %v3237_v21 = vadd.f32 %v3174_v5, %v3149_v15  ;;  %v3238_v20 = vadd.f32 %v3194_v19, %v3150_v16 }
 0xd48   :  { %v3241_v41 = vmul.f32 0.5, %v3237_v21  ;;  %v3242_v23 = vmul.f32 0.5, %v3238_v20  ;;  %v3702_v21 = vld [vmem:[#allocation12 + $0x1e0] sm:$0xff]  ;;  %v3703_v20 = vld [vmem:[#allocation12 + $0x1e8] sm:$0xff] }
 0xd4a   :  { %5201 = vtanh.f32 %v3241_v41  ;;  %v3704_v41 = vld [vmem:[#allocation12 + $0x1f0] sm:$0xff] }
 0xd4b   :  { %5203 = vtanh.f32 %v3242_v23  ;;  %v3705_v23 = vld [vmem:[#allocation12 + $0x1f8] sm:$0xff] }
 0xd4c   :  { %v3214_v18 = vpop.f32.mrf.mxu2  ;;  %v3234_v24 = vpop.f32.mrf.mxu3 }
 0xd4d   :  { %v3239_v28 = vadd.f32 %v3214_v18, %v3151_v7  ;;  %v3240_v29 = vadd.f32 %v3234_v24, %v3152_v27  ;;  %v3698_v7 = vld [vmem:[#allocation12 + $0x1c0] sm:$0xff]  ;;  %v3699_v18 = vld [vmem:[#allocation12 + $0x1c8] sm:$0xff]  ;;  %v3700_v27 = vld [vmem:[#allocation12 + $0x1d0] sm:$0xff] }
 0xd4e   :  { %v3701_v24 = vld [vmem:[#allocation12 + $0x1d8] sm:$0xff] }
 0xd4f   :  { %5205 = vtanh.f32 %v3239_v28  ;;  %v3243_v30 = vmul.f32 0.5, %v3240_v29  ;;  %v3694_v28 = vld [vmem:[#allocation12 + $0x1a0] sm:$0xff]  ;;  %v3695_v29 = vld [vmem:[#allocation12 + $0x1a8] sm:$0xff] }
 0xd50   :  { %v5202_v31 = vpop.eup %5201 }
 0xd51   :  { %v5204_v32 = vpop.eup %5203  ;;  %v3247_v22 = vadd.f32 1.0, %v5202_v31  ;;  %5207 = vtanh.f32 %v3243_v30  ;;  %v3696_v30 = vld [vmem:[#allocation12 + $0x1b0] sm:$0xff]  ;;  %v3697_v31 = vld [vmem:[#allocation12 + $0x1b8] sm:$0xff] }
 0xd52   :  { %v3249_v33 = vadd.f32 1.0, %v5204_v32  ;;  %v3690_v32 = vld [vmem:[#allocation12 + $0x180] sm:$0xff] }
 0xd53   :  { %v3248_v38 = vmul.f32 0.5, %v3247_v22  ;;  %v3691_v22 = vld [vmem:[#allocation12 + $0x188] sm:$0xff] }
 0xd54   :  { %v3250_v39 = vmul.f32 0.5, %v3249_v33  ;;  %v3692_v33 = vld [vmem:[#allocation12 + $0x190] sm:$0xff] }
 0xd55   :  { %v5206_v40 = vpop.eup %5205 }
 0xd56   :  { %v3257_v47 = vmul.f32 %v3255_v34, %v3250_v39  ;;  %v3258_v59 = vmul.f32 %v5206_v40, %v3248_v38  ;;  %v3693_v38 = vld [vmem:[#allocation12 + $0x198] sm:$0xff]  ;;  %v3686_v39 = vld [vmem:[#allocation12 + $0x160] sm:$0xff]  ;;  %v3687_v34 = vld [vmem:[#allocation12 + $0x168] sm:$0xff] }
 0xd57   :  { %v5208_v35 = vpop.eup %5207  ;;  %v3688_v40 = vld [vmem:[#allocation12 + $0x170] sm:$0xff] }
 0xd58   :  { %v3259_v50 = vadd.f32 %v3258_v59, %v3257_v47  ;;  %v3251_v37 = vadd.f32 1.0, %v5208_v35  ;;  %v3689_v47 = vld [vmem:[#allocation12 + $0x178] sm:$0xff]  ;;  %v3682_v59 = vld [vmem:[#allocation12 + $0x140] sm:$0xff]  ;;  %v3683_v35 = vld [vmem:[#allocation12 + $0x148] sm:$0xff] }
 0xd5a   :  { %5209 = vtanh.f32 %v3259_v50  ;;  %v3252_v55 = vmul.f32 0.5, %v3251_v37  ;;  %v3380_v17 = vrot.slane %v3259_v50, 6  ;;  %v3684_v50 = vld [vmem:[#allocation12 + $0x150] sm:$0xff]  ;;  %v3685_v37 = vld [vmem:[#allocation12 + $0x158] sm:$0xff] }
 0xd60   :  { %v5210_v43 = vpop.eup %5209 }
 0xd61   :  { %v3261_v44 = vmul.f32 %v5210_v43, %v3252_v55  ;;  %v3678_v55 = vld [vmem:[#allocation12 + $0x120] sm:$0xff]  ;;  %v3679_v43 = vld [vmem:[#allocation12 + $0x128] sm:$0xff] }
 0xd63   :  { %3262 = vst.msk [vmem:[#allocation3 + $0x8] sm:$0x3] %vm1608_vm7, %v3261_v44  ;;  %4947 = vmatmul.msk.f32.vlgmr.msrb.gmra.mxu0 %vm1503_vm8, %v3261_v44  ;;  %4948 = vmatmul.msk.f32.vlgmr.msrb.gmra.mxu1 %vm1503_vm8, %v3261_v44 }
 0xd64   :  { %4949 = vmatmul.msk.f32.vlgmr.msrb.gmra.mxu2 %vm1503_vm8, %v3261_v44  ;;  %4950 = vmatmul.msk.f32.vlgmr.msrb.gmra.mxu3 %vm1503_vm8, %v3261_v44  ;;  %v3680_v44 = vld [vmem:[#allocation12 + $0x130] sm:$0xff] }
 0xd65   :  { %3536 = vmatpush.msrb.mxu0 %v6041_v51  ;;  %3556 = vmatpush.msrb.mxu1 %v6043_v36  ;;  %v3264_v51 = vld [vmem:[#allocation2 + $0x20] sm:$0xc] }
 0xd66   :  { %3576 = vmatpush.msrb.mxu2 %v6045_v52  ;;  %3596 = vmatpush.msrb.mxu3 %v6049_v42 }
 0xd67   :  { %3537 = vmatpush.msrb.mxu0 %v6064_v9  ;;  %3557 = vmatpush.msrb.mxu1 %v6066_v10 }
 0xd68   :  { %3577 = vmatpush.msrb.mxu2 %v6068_v11  ;;  %3597 = vmatpush.msrb.mxu3 %v6072_v26  ;;  %v3266_v11 = vld [vmem:[#allocation2 + $0x38] sm:$0xc] }
 0xde0   :  { %v3287_v46 = vpop.f32.mrf.mxu0  ;;  %v3307_v48 = vpop.f32.mrf.mxu1 }
 0xde1   :  { %v3354_v49 = vrot.slane %v3287_v46, 6  ;;  %v3355_v53 = vrot.slane %v3307_v48, 6  ;;  %v3681_v46 = vld [vmem:[#allocation12 + $0x138] sm:$0xff]  ;;  %v3674_v48 = vld [vmem:[#allocation12 + $0x100] sm:$0xff] }
 0xde3   :  { %v3362_v54 = vadd.f32 %v3354_v49, %v3263_v45  ;;  %v3363_v36 = vadd.f32 %v3355_v53, %v3264_v51  ;;  %v3675_v49 = vld [vmem:[#allocation12 + $0x108] sm:$0xff]  ;;  %v3676_v53 = vld [vmem:[#allocation12 + $0x110] sm:$0xff]  ;;  %v3677_v45 = vld [vmem:[#allocation12 + $0x118] sm:$0xff] }
 0xde4   :  { %v3670_v51 = vld [vmem:[#allocation12 + $0xe0] sm:$0xff] }
 0xde5   :  { %v3366_v56 = vmul.f32 0.5, %v3362_v54  ;;  %v3367_v52 = vmul.f32 0.5, %v3363_v36  ;;  %v3671_v54 = vld [vmem:[#allocation12 + $0xe8] sm:$0xff]  ;;  %v3672_v36 = vld [vmem:[#allocation12 + $0xf0] sm:$0xff] }
 0xde7   :  { %5211 = vtanh.f32 %v3366_v56  ;;  %v3327_v42 = vpop.f32.mrf.mxu2  ;;  %v3347_v57 = vpop.f32.mrf.mxu3  ;;  %v3673_v56 = vld [vmem:[#allocation12 + $0xf8] sm:$0xff] }
 0xde8   :  { %5213 = vtanh.f32 %v3367_v52  ;;  %v3356_v9 = vrot.slane %v3327_v42, 6  ;;  %v3357_v10 = vrot.slane %v3347_v57, 6  ;;  %v3666_v52 = vld [vmem:[#allocation12 + $0xc0] sm:$0xff]  ;;  %v3667_v42 = vld [vmem:[#allocation12 + $0xc8] sm:$0xff]  ;;  %v3668_v57 = vld [vmem:[#allocation12 + $0xd0] sm:$0xff] }
 0xdea   :  { %v3364_v60 = vadd.f32 %v3356_v9, %v3265_v58  ;;  %v3365_v26 = vadd.f32 %v3357_v10, %v3266_v11  ;;  %v3669_v9 = vld [vmem:[#allocation12 + $0xd8] sm:$0xff]  ;;  %v3662_v10 = vld [vmem:[#allocation12 + $0xa0] sm:$0xff]  ;;  %v3663_v58 = vld [vmem:[#allocation12 + $0xa8] sm:$0xff] }
 0xdeb   :  { %v3664_v11 = vld [vmem:[#allocation12 + $0xb0] sm:$0xff] }
 0xdec   :  { %5215 = vtanh.f32 %v3364_v60  ;;  %v3368_v61 = vmul.f32 0.5, %v3365_v26  ;;  %v3665_v60 = vld [vmem:[#allocation12 + $0xb8] sm:$0xff] }
 0xded   :  { %v5212_v62 = vpop.eup %5211 }
 0xdee   :  { %v5214_v63 = vpop.eup %5213  ;;  %v3372_v1 = vadd.f32 1.0, %v5212_v62  ;;  %5217 = vtanh.f32 %v3368_v61  ;;  %v3658_v62 = vld [vmem:[#allocation12 + $0x80] sm:$0xff] }
 0xdef   :  { %v3374_v2 = vadd.f32 1.0, %v5214_v63  ;;  %v3659_v63 = vld [vmem:[#allocation12 + $0x88] sm:$0xff] }
 0xdf0   :  { %v3373_v6 = vmul.f32 0.5, %v3372_v1  ;;  %v3660_v1 = vld [vmem:[#allocation12 + $0x90] sm:$0xff] }
 0xdf1   :  { %v3375_v8 = vmul.f32 0.5, %v3374_v2 }
 0xdf2   :  { %v5216_v25 = vpop.eup %5215 }
 0xdf3   :  { %v3382_v3 = vmul.f32 %v3380_v17, %v3375_v8  ;;  %v3383_v4 = vmul.f32 %v5216_v25, %v3373_v6  ;;  %v3661_v8 = vld [vmem:[#allocation12 + $0x98] sm:$0xff]  ;;  %v3389_v25 = vld [vmem:[#allocation2 + $0x20] sm:$0x30] }
 0xdf4   :  { %v5218_v12 = vpop.eup %5217  ;;  %v3388_v17 = vld [vmem:[#allocation2 + $0x8] sm:$0x30] }
 0xdf5   :  { %v6169_v13 = vadd.f32 %v3383_v4, %v3382_v3  ;;  %v3376_v14 = vadd.f32 1.0, %v5218_v12  ;;  %v3654_v12 = vld [vmem:[#allocation12 + $0x60] sm:$0xff] }
 0xdf7   :  { %5219 = vtanh.f32 %v6169_v13  ;;  %v3377_v15 = vmul.f32 0.5, %v3376_v14  ;;  %v3655_v14 = vld [vmem:[#allocation12 + $0x68] sm:$0xff] }
 0xdfd   :  { %v5220_v5 = vpop.eup %5219 }
 0xdfe   :  { %v3386_v16 = vmul.f32 %v5220_v5, %v3377_v15  ;;  %v3656_v15 = vld [vmem:[#allocation12 + $0x70] sm:$0xff]  ;;  %v3657_v5 = vld [vmem:[#allocation12 + $0x78] sm:$0xff] }
 0xe00   :  { %3387 = vst.msk [vmem:[#allocation3 + $0x8] sm:$0xc] %vm1734_vm9, %v3386_v16  ;;  %v3393_v19 = vrot.slane %v3386_v16, 2  ;;  %v3650_v16 = vld [vmem:[#allocation12 + $0x40] sm:$0xff] }
 0xe02   :  { %4951 = vmatmul.msk.f32.vlgmr.msra.gmra.mxu0 %vm1503_vm8, %v3393_v19  ;;  %4952 = vmatmul.msk.f32.vlgmr.msra.gmra.mxu1 %vm1503_vm8, %v3393_v19 }
 0xe03   :  { %4953 = vmatmul.msk.f32.vlgmr.msra.gmra.mxu2 %vm1503_vm8, %v3393_v19  ;;  %4954 = vmatmul.msk.f32.vlgmr.msra.gmra.mxu3 %vm1503_vm8, %v3393_v19  ;;  %v3651_v19 = vld [vmem:[#allocation12 + $0x48] sm:$0xff] }
 0xe04   :  { %3732 = vmatpush.msra.mxu0 %v3702_v21  ;;  %3755 = vmatpush.msra.mxu1 %v3703_v20 }
 0xe05   :  { %3778 = vmatpush.msra.mxu2 %v3704_v41  ;;  %3801 = vmatpush.msra.mxu3 %v3705_v23  ;;  %v3652_v41 = vld [vmem:[#allocation12 + $0x50] sm:$0xff]  ;;  %v3653_v23 = vld [vmem:[#allocation12 + $0x58] sm:$0xff] }
 0xe06   :  { %3733 = vmatpush.msra.mxu0 %v3698_v7  ;;  %3756 = vmatpush.msra.mxu1 %v3699_v18  ;;  %v3646_v7 = vld [vmem:[#allocation12 + $0x20] sm:$0xff]  ;;  %v3647_v18 = vld [vmem:[#allocation12 + $0x28] sm:$0xff] }
 0xe07   :  { %3779 = vmatpush.msra.mxu2 %v3700_v27  ;;  %3802 = vmatpush.msra.mxu3 %v3701_v24  ;;  %v3648_v27 = vld [vmem:[#allocation12 + $0x30] sm:$0xff]  ;;  %v3649_v24 = vld [vmem:[#allocation12 + $0x38] sm:$0xff] }
 0xe08   :  { %3734 = vmatpush.msra.mxu0 %v3694_v28  ;;  %3757 = vmatpush.msra.mxu1 %v3695_v29 }
 0xe09   :  { %3780 = vmatpush.msra.mxu2 %v3696_v30  ;;  %3803 = vmatpush.msra.mxu3 %v3697_v31  ;;  %v3642_v30 = vld [vmem:[#allocation12] sm:$0xff]  ;;  %v3643_v31 = vld [vmem:[#allocation12 + $0x8] sm:$0xff] }
 0xe0a   :  { %3735 = vmatpush.msra.mxu0 %v3690_v32  ;;  %3758 = vmatpush.msra.mxu1 %v3691_v22 }
 0xe0b   :  { %3781 = vmatpush.msra.mxu2 %v3692_v33  ;;  %3804 = vmatpush.msra.mxu3 %v3693_v38  ;;  %v3644_v33 = vld [vmem:[#allocation12 + $0x10] sm:$0xff]  ;;  %v3645_v38 = vld [vmem:[#allocation12 + $0x18] sm:$0xff] }
 0xe0c   :  { %3736 = vmatpush.msra.mxu0 %v3686_v39  ;;  %3759 = vmatpush.msra.mxu1 %v3687_v34  ;;  %v3390_v39 = vld [vmem:[#allocation2 + $0x28] sm:$0x30]  ;;  %v3391_v34 = vld [vmem:[#allocation2 + $0x38] sm:$0x30] }
 0xe0d   :  { %3782 = vmatpush.msra.mxu2 %v3688_v40  ;;  %3805 = vmatpush.msra.mxu3 %v3689_v47 }
 0xe0e   :  { %3737 = vmatpush.msra.mxu0 %v3682_v59  ;;  %3760 = vmatpush.msra.mxu1 %v3683_v35 }
 0xe0f   :  { %3783 = vmatpush.msra.mxu2 %v3684_v50  ;;  %3806 = vmatpush.msra.mxu3 %v3685_v37 }
 0xe10   :  { %3738 = vmatpush.msra.mxu0 %v3678_v55  ;;  %3761 = vmatpush.msra.mxu1 %v3679_v43 }
 0xe11   :  { %3784 = vmatpush.msra.mxu2 %v3680_v44  ;;  %3807 = vmatpush.msra.mxu3 %v3681_v46  ;;  %v3506_v46 = vrot.slane %v6169_v13, 6  ;;  %v3640_v13 = vld [vmem:[#allocation3] sm:$0xff] }
 0xe12   :  { %3739 = vmatpush.msra.mxu0 %v3674_v48  ;;  %3762 = vmatpush.msra.mxu1 %v3675_v49 }
 0xe13   :  { %3785 = vmatpush.msra.mxu2 %v3676_v53  ;;  %3808 = vmatpush.msra.mxu3 %v3677_v45 }
 0xe14   :  { %3740 = vmatpush.msra.mxu0 %v3670_v51  ;;  %3763 = vmatpush.msra.mxu1 %v3671_v54 }
 0xe15   :  { %3786 = vmatpush.msra.mxu2 %v3672_v36  ;;  %3809 = vmatpush.msra.mxu3 %v3673_v56 }
 0xe16   :  { %3741 = vmatpush.msra.mxu0 %v3666_v52  ;;  %3764 = vmatpush.msra.mxu1 %v3667_v42 }
 0xe17   :  { %3787 = vmatpush.msra.mxu2 %v3668_v57  ;;  %3810 = vmatpush.msra.mxu3 %v3669_v9  ;;  %v3514_v57 = vld [vmem:[#allocation2 + $0x8] sm:$0xc0] }
 0xe18   :  { %3742 = vmatpush.msra.mxu0 %v3662_v10  ;;  %3765 = vmatpush.msra.mxu1 %v3663_v58  ;;  %v6186_v58 = vld [vmem:[#allocation14 + $0x60] sm:$0xff] }
 0xe19   :  { %3788 = vmatpush.msra.mxu2 %v3664_v11  ;;  %3811 = vmatpush.msra.mxu3 %v3665_v60  ;;  %v6188_v11 = vld [vmem:[#allocation14 + $0x68] sm:$0xff]  ;;  %v6190_v60 = vld [vmem:[#allocation14 + $0x70] sm:$0xff] }
 0xe1a   :  { %3743 = vmatpush.msra.mxu0 %v3658_v62  ;;  %3766 = vmatpush.msra.mxu1 %v3659_v63  ;;  %v6194_v62 = vld [vmem:[#allocation14 + $0x40] sm:$0xff]  ;;  %v6196_v63 = vld [vmem:[#allocation14 + $0x48] sm:$0xff] }
 0xe1b   :  { %3789 = vmatpush.msra.mxu2 %v3660_v1  ;;  %3812 = vmatpush.msra.mxu3 %v3661_v8  ;;  %v6198_v1 = vld [vmem:[#allocation14 + $0x50] sm:$0xff]  ;;  %v6206_v8 = vld [vmem:[#allocation14 + $0x78] sm:$0xff] }
 0xe1c   :  { %3744 = vmatpush.msra.mxu0 %v3654_v12  ;;  %3767 = vmatpush.msra.mxu1 %v3655_v14 }
 0xe1d   :  { %3790 = vmatpush.msra.mxu2 %v3656_v15  ;;  %3813 = vmatpush.msra.mxu3 %v3657_v5 }
 0xe1e   :  { %3745 = vmatpush.msra.mxu0 %v3650_v16  ;;  %3768 = vmatpush.msra.mxu1 %v3651_v19  ;;  %v3516_v16 = vld [vmem:[#allocation2 + $0x28] sm:$0xc0] }
 0xe1f   :  { %3791 = vmatpush.msra.mxu2 %v3652_v41  ;;  %3814 = vmatpush.msra.mxu3 %v3653_v23 }
 0xe20   :  { %3746 = vmatpush.msra.mxu0 %v3646_v7  ;;  %3769 = vmatpush.msra.mxu1 %v3647_v18 }
 0xe21   :  { %3792 = vmatpush.msra.mxu2 %v3648_v27  ;;  %3815 = vmatpush.msra.mxu3 %v3649_v24  ;;  %v6218_v27 = vld [vmem:[#allocation14 + $0x20] sm:$0xff]  ;;  %v6220_v24 = vld [vmem:[#allocation14 + $0x28] sm:$0xff] }
 0xe22   :  { %3747 = vmatpush.msra.mxu0 %v3642_v30  ;;  %3770 = vmatpush.msra.mxu1 %v3643_v31  ;;  %v6226_v31 = vld [vmem:[#allocation14 + $0x58] sm:$0xff] }
 0xe23   :  { %3793 = vmatpush.msra.mxu2 %v3644_v33  ;;  %3816 = vmatpush.msra.mxu3 %v3645_v38  ;;  %v6234_v33 = vld [vmem:[#allocation14 + $0x10] sm:$0xff]  ;;  %v6236_v38 = vld [vmem:[#allocation14 + $0x38] sm:$0xff] }
 0xe7f   :  { %v3413_v26 = vpop.f32.mrf.mxu0  ;;  %v3433_v61 = vpop.f32.mrf.mxu1 }
 0xe80   :  { %v3480_v2 = vrot.slane %v3413_v26, 4  ;;  %v3481_v6 = vrot.slane %v3433_v61, 4 }
 0xe82   :  { %v3488_v3 = vadd.f32 %v3480_v2, %v3388_v17  ;;  %v3489_v4 = vadd.f32 %v3481_v6, %v3389_v25  ;;  %v3515_v2 = vld [vmem:[#allocation2 + $0x20] sm:$0xc0]  ;;  %v6203_v6 = vld [vmem:[%s6438_s12] sm:$0xf] }
 0xe83   :  { %v3724_v12 = vperm.slane %v6203_v6, 0  ;;  %v3725_v14 = vperm.slane %v6203_v6, 1 }
 0xe84   :  { %v3492_v21 = vmul.f32 0.5, %v3488_v3  ;;  %v3493_v20 = vmul.f32 0.5, %v3489_v4 }
 0xe86   :  { %5221 = vtanh.f32 %v3492_v21  ;;  %v3453_v28 = vpop.f32.mrf.mxu2  ;;  %v3473_v29 = vpop.f32.mrf.mxu3  ;;  %v3517_v21 = vld [vmem:[#allocation2 + $0x38] sm:$0xc0] }
 0xe87   :  { %5223 = vtanh.f32 %v3493_v20  ;;  %v3482_v32 = vrot.slane %v3453_v28, 4  ;;  %v3483_v22 = vrot.slane %v3473_v29, 4  ;;  %v6222_v28 = vld [vmem:[#allocation14 + $0x30] sm:$0xff] }
 0xe89   :  { %v3490_v40 = vadd.f32 %v3482_v32, %v3390_v39  ;;  %v3491_v47 = vadd.f32 %v3483_v22, %v3391_v34  ;;  %v6228_v32 = vld [vmem:[#allocation14] sm:$0xff]  ;;  %v6230_v22 = vld [vmem:[#allocation14 + $0x8] sm:$0xff]  ;;  %v3726_v34 = vperm.slane %v6203_v6, 2 }
 0xe8b   :  { %5225 = vtanh.f32 %v3490_v40  ;;  %v3494_v59 = vmul.f32 0.5, %v3491_v47  ;;  %v3727_v40 = vperm.slane %v6203_v6, 3  ;;  %v6242_v47 = vld [vmem:[#allocation14 + $0x18] sm:$0xff] }
 0xe8c   :  { %v5222_v35 = vpop.eup %5221 }
 0xe8d   :  { %v5224_v50 = vpop.eup %5223  ;;  %v3498_v37 = vadd.f32 1.0, %v5222_v35  ;;  %5227 = vtanh.f32 %v3494_v59 }
 0xe8e   :  { %v3500_v55 = vadd.f32 1.0, %v5224_v50 }
 0xe8f   :  { %v3499_v43 = vmul.f32 0.5, %v3498_v37 }
 0xe90   :  { %v3501_v44 = vmul.f32 0.5, %v3500_v55 }
 0xe91   :  { %v5226_v48 = vpop.eup %5225 }
 0xe92   :  { %v3508_v49 = vmul.f32 %v3506_v46, %v3501_v44  ;;  %v3509_v53 = vmul.f32 %v5226_v48, %v3499_v43 }
 0xe93   :  { %v5228_v45 = vpop.eup %5227 }
 0xe94   :  { %v6178_v51 = vadd.f32 %v3509_v53, %v3508_v49  ;;  %v3502_v54 = vadd.f32 1.0, %v5228_v45 }
 0xe96   :  { %5229 = vtanh.f32 %v6178_v51  ;;  %v3503_v36 = vmul.f32 0.5, %v3502_v54  ;;  %v3632_v53 = vrot.slane %v6178_v51, 6 }
 0xe9c   :  { %v5230_v56 = vpop.eup %5229 }
 0xe9d   :  { %v3512_v52 = vmul.f32 %v5230_v56, %v3503_v36 }
 0xe9f   :  { %3513 = vst.msk [vmem:[#allocation3 + $0x8] sm:$0x30] %vm1861_vm10, %v3512_v52  ;;  %v3519_v42 = vrot.slane %v3512_v52, 4 }
 0xea1   :  { %4955 = vmatmul.msk.f32.vlgmr.msrb.gmra.mxu0 %vm1503_vm8, %v3519_v42  ;;  %4956 = vmatmul.msk.f32.vlgmr.msrb.gmra.mxu1 %vm1503_vm8, %v3519_v42 }
 0xea2   :  { %4957 = vmatmul.msk.f32.vlgmr.msrb.gmra.mxu2 %vm1503_vm8, %v3519_v42  ;;  %4958 = vmatmul.msk.f32.vlgmr.msrb.gmra.mxu3 %vm1503_vm8, %v3519_v42 }
 0xea3   :  { %3848 = vmatpush.msrb.mxu0 %v6186_v58  ;;  %3868 = vmatpush.msrb.mxu1 %v6188_v11 }
 0xea4   :  { %3888 = vmatpush.msrb.mxu2 %v6190_v60  ;;  %3908 = vmatpush.msrb.mxu3 %v6206_v8 }
 0xea5   :  { %3849 = vmatpush.msrb.mxu0 %v6194_v62  ;;  %3869 = vmatpush.msrb.mxu1 %v6196_v63 }
 0xea6   :  { %3889 = vmatpush.msrb.mxu2 %v6198_v1  ;;  %3909 = vmatpush.msrb.mxu3 %v6226_v31 }
 0xea7   :  { %3850 = vmatpush.msrb.mxu0 %v6218_v27  ;;  %3870 = vmatpush.msrb.mxu1 %v6220_v24 }
 0xea8   :  { %3890 = vmatpush.msrb.mxu2 %v6222_v28  ;;  %3910 = vmatpush.msrb.mxu3 %v6236_v38 }
 0xea9   :  { %3748 = vmatmul.f32.vlgmr.msra.gmra.mxu0 %v3640_v13  ;;  %3771 = vmatmul.f32.vlgmr.msra.gmra.mxu1 %v3640_v13 }
 0xeaa   :  { %3794 = vmatmul.f32.vlgmr.msra.gmra.mxu2 %v3640_v13  ;;  %3817 = vmatmul.f32.vlgmr.msra.gmra.mxu3 %v3640_v13 }
 0xeab   :  { %3851 = vmatpush.msrb.mxu0 %v6228_v32  ;;  %3871 = vmatpush.msrb.mxu1 %v6230_v22 }
 0xeac   :  { %3891 = vmatpush.msrb.mxu2 %v6234_v33  ;;  %3911 = vmatpush.msrb.mxu3 %v6242_v47 }
 0xead   :  { %3958 = vmatpush.msra.mxu0 %v6186_v58  ;;  %3978 = vmatpush.msra.mxu1 %v6188_v11 }
 0xeae   :  { %3998 = vmatpush.msra.mxu2 %v6190_v60  ;;  %4018 = vmatpush.msra.mxu3 %v6206_v8 }
 0xeaf   :  { %3959 = vmatpush.msra.mxu0 %v6194_v62  ;;  %3979 = vmatpush.msra.mxu1 %v6196_v63 }
 0xeb0   :  { %3999 = vmatpush.msra.mxu2 %v6198_v1  ;;  %4019 = vmatpush.msra.mxu3 %v6226_v31 }
 0xeb1   :  { %3960 = vmatpush.msra.mxu0 %v6218_v27  ;;  %3980 = vmatpush.msra.mxu1 %v6220_v24 }
 0xeb2   :  { %4000 = vmatpush.msra.mxu2 %v6222_v28  ;;  %4020 = vmatpush.msra.mxu3 %v6236_v38 }
 0xeb3   :  { %3961 = vmatpush.msra.mxu0 %v6228_v32  ;;  %3981 = vmatpush.msra.mxu1 %v6230_v22 }
 0xeb4   :  { %4001 = vmatpush.msra.mxu2 %v6234_v33  ;;  %4021 = vmatpush.msra.mxu3 %v6242_v47 }
 0xf1e   :  { %v3539_v9 = vpop.f32.mrf.mxu0  ;;  %v3559_v10 = vpop.f32.mrf.mxu1 }
 0xf1f   :  { %v3606_v26 = vrot.slane %v3539_v9, 2  ;;  %v3607_v61 = vrot.slane %v3559_v10, 2 }
 0xf21   :  { %v3614_v17 = vadd.f32 %v3606_v26, %v3514_v57  ;;  %v3615_v25 = vadd.f32 %v3607_v61, %v3515_v2 }
 0xf23   :  { %v3618_v3 = vmul.f32 0.5, %v3614_v17  ;;  %v3619_v4 = vmul.f32 0.5, %v3615_v25 }
 0xf25   :  { %5231 = vtanh.f32 %v3618_v3  ;;  %v3579_v15 = vpop.f32.mrf.mxu2  ;;  %v3599_v5 = vpop.f32.mrf.mxu3 }
 0xf26   :  { %5233 = vtanh.f32 %v3619_v4  ;;  %v3608_v19 = vrot.slane %v3579_v15, 2  ;;  %v3609_v20 = vrot.slane %v3599_v5, 2  ;;  %v3749_v41 = vpop.f32.mrf.mxu0  ;;  %v3772_v23 = vpop.f32.mrf.mxu1 }
 0xf27   :  { %v3750_v7 = vadd.f32 %v3749_v41, %v3724_v12  ;;  %v3773_v18 = vadd.f32 %v3772_v23, %v3725_v14 }
 0xf28   :  { %v3616_v29 = vadd.f32 %v3608_v19, %v3516_v16  ;;  %v3617_v30 = vadd.f32 %v3609_v20, %v3517_v21 }
 0xf29   :  { %3824 = vst [vmem:[#allocation2 + $0x30] sm:$0xff] %v3750_v7 }
 0xf2a   :  { %5235 = vtanh.f32 %v3616_v29  ;;  %v3620_v39 = vmul.f32 0.5, %v3617_v30  ;;  %3825 = vst [vmem:[#allocation2] sm:$0xff] %v3773_v18 }
 0xf2b   :  { %v5232_v59 = vpop.eup %5231 }
 0xf2c   :  { %v5234_v35 = vpop.eup %5233  ;;  %v3624_v50 = vadd.f32 1.0, %v5232_v59  ;;  %5237 = vtanh.f32 %v3620_v39 }
 0xf2d   :  { %v3626_v37 = vadd.f32 1.0, %v5234_v35  ;;  %v3795_v55 = vpop.f32.mrf.mxu2  ;;  %v3818_v43 = vpop.f32.mrf.mxu3 }
 0xf2e   :  { %v3625_v44 = vmul.f32 0.5, %v3624_v50  ;;  %v3796_v46 = vadd.f32 %v3795_v55, %v3726_v34  ;;  %v3819_v48 = vadd.f32 %v3818_v43, %v3727_v40 }
 0xf2f   :  { %v3627_v49 = vmul.f32 0.5, %v3626_v37 }
 0xf30   :  { %v5236_v45 = vpop.eup %5235  ;;  %3826 = vst [vmem:[#allocation2 + $0x18] sm:$0xff] %v3796_v46  ;;  %v3832_v4 = vld [vmem:[#allocation2 + $0x30] sm:$0x3] }
 0xf31   :  { %v3634_v54 = vmul.f32 %v3632_v53, %v3627_v49  ;;  %v3635_v36 = vmul.f32 %v5236_v45, %v3625_v44  ;;  %3827 = vst [vmem:[#allocation2 + $0x10] sm:$0xff] %v3819_v48  ;;  %v3833_v5 = vld [vmem:[#allocation2] sm:$0x3] }
 0xf32   :  { %v5238_v51 = vpop.eup %5237 }
 0xf33   :  { %v3636_v56 = vadd.f32 %v3635_v36, %v3634_v54  ;;  %v3628_v52 = vadd.f32 1.0, %v5238_v51 }
 0xf35   :  { %5239 = vtanh.f32 %v3636_v56  ;;  %v3629_v42 = vmul.f32 0.5, %v3628_v52  ;;  %v3939_v56 = vld [vmem:[#allocation2 + $0x30] sm:$0xc]  ;;  %v3940_v52 = vld [vmem:[#allocation2] sm:$0xc] }
 0xf37   :  { %v3834_v20 = vld [vmem:[#allocation2 + $0x18] sm:$0x3] }
 0xf38   :  { %v3835_v23 = vld [vmem:[#allocation2 + $0x10] sm:$0x3] }
 0xf3b   :  { %v5240_v13 = vpop.eup %5239 }
 0xf3c   :  { %v3638_v57 = vmul.f32 %v5240_v13, %v3629_v42 }
 0xf3e   :  { %3639 = vst.msk [vmem:[#allocation3 + $0x8] sm:$0xc0] %vm1988_vm11, %v3638_v57 }
 0xf45   :  { %v3641_v9 = vld [vmem:[#allocation3 + $0x8] sm:$0xff] }
 0xf46   :  { %3751 = vmatmul.f32.gmra.mxu0 %v3641_v9  ;;  %3774 = vmatmul.f32.gmra.mxu1 %v3641_v9 }
 0xf47   :  { %3797 = vmatmul.f32.gmra.mxu2 %v3641_v9  ;;  %3820 = vmatmul.f32.gmra.mxu3 %v3641_v9 }
 0xf4e   :  { %3852 = vmatmul.f32.vlgmr.msrb.gmra.mxu0 %v5535_v0  ;;  %3872 = vmatmul.f32.vlgmr.msrb.gmra.mxu1 %v5535_v0 }
 0xf4f   :  { %3892 = vmatmul.f32.vlgmr.msrb.gmra.mxu2 %v5535_v0  ;;  %3912 = vmatmul.f32.vlgmr.msrb.gmra.mxu3 %v5535_v0 }
 0xf50   :  { %4084 = vmatpush.msrb.mxu0 %v6186_v58  ;;  %4104 = vmatpush.msrb.mxu1 %v6188_v11 }
 0xf51   :  { %4124 = vmatpush.msrb.mxu2 %v6190_v60  ;;  %4144 = vmatpush.msrb.mxu3 %v6206_v8 }
 0xf52   :  { %4085 = vmatpush.msrb.mxu0 %v6194_v62  ;;  %4105 = vmatpush.msrb.mxu1 %v6196_v63 }
 0xf53   :  { %4125 = vmatpush.msrb.mxu2 %v6198_v1  ;;  %4145 = vmatpush.msrb.mxu3 %v6226_v31 }
 0xf54   :  { %4086 = vmatpush.msrb.mxu0 %v6218_v27  ;;  %4106 = vmatpush.msrb.mxu1 %v6220_v24 }
 0xf55   :  { %4126 = vmatpush.msrb.mxu2 %v6222_v28  ;;  %4146 = vmatpush.msrb.mxu3 %v6236_v38 }
 0xf56   :  { %4087 = vmatpush.msrb.mxu0 %v6228_v32  ;;  %4107 = vmatpush.msrb.mxu1 %v6230_v22 }
 0xf57   :  { %4127 = vmatpush.msrb.mxu2 %v6234_v33  ;;  %4147 = vmatpush.msrb.mxu3 %v6242_v47 }
 0xfc3   :  { %v3752_v0 = vpop.f32.mrf.mxu0  ;;  %v3775_v10 = vpop.f32.mrf.mxu1 }
 0xfc4   :  { %v3753_v26 = vadd.f32 %v3752_v0, %v3724_v12  ;;  %v3776_v61 = vadd.f32 %v3775_v10, %v3725_v14 }
 0xfc6   :  { %3828 = vst [vmem:[#allocation2 + $0x8] sm:$0xff] %v3753_v26 }
 0xfc7   :  { %3829 = vst [vmem:[#allocation2 + $0x20] sm:$0xff] %v3776_v61 }
 0xfca   :  { %v3798_v2 = vpop.f32.mrf.mxu2  ;;  %v3821_v17 = vpop.f32.mrf.mxu3 }
 0xfcb   :  { %v3799_v25 = vadd.f32 %v3798_v2, %v3726_v34  ;;  %v3822_v3 = vadd.f32 %v3821_v17, %v3727_v40  ;;  %v3853_v15 = vpop.f32.mrf.mxu0  ;;  %v3873_v16 = vpop.f32.mrf.mxu1  ;;  %v3941_v2 = vld [vmem:[#allocation2 + $0x18] sm:$0xc]  ;;  %v3942_v17 = vld [vmem:[#allocation2 + $0x10] sm:$0xc] }
 0xfcc   :  { %v3916_v19 = vadd.f32 %v3853_v15, %v3832_v4  ;;  %v3917_v21 = vadd.f32 %v3873_v16, %v3833_v5 }
 0xfcd   :  { %3830 = vst [vmem:[#allocation2 + $0x28] sm:$0xff] %v3799_v25 }
 0xfce   :  { %3831 = vst [vmem:[#allocation2 + $0x38] sm:$0xff] %v3822_v3  ;;  %v3920_v12 = vmul.f32 0.5, %v3916_v19  ;;  %v3921_v14 = vmul.f32 0.5, %v3917_v21 }
 0xfd0   :  { %5241 = vtanh.f32 %v3920_v12 }
 0xfd1   :  { %5243 = vtanh.f32 %v3921_v14 }
 0xfd2   :  { %v3893_v41 = vpop.f32.mrf.mxu2  ;;  %v3913_v7 = vpop.f32.mrf.mxu3 }
 0xfd3   :  { %v3918_v18 = vadd.f32 %v3893_v41, %v3834_v20  ;;  %v3919_v29 = vadd.f32 %v3913_v7, %v3835_v23 }
 0xfd5   :  { %5245 = vtanh.f32 %v3918_v18  ;;  %v3922_v6 = vmul.f32 0.5, %v3919_v29 }
 0xfd6   :  { %v5242_v30 = vpop.eup %5241 }
 0xfd7   :  { %v5244_v39 = vpop.eup %5243  ;;  %v3926_v34 = vadd.f32 1.0, %v5242_v30  ;;  %5247 = vtanh.f32 %v3922_v6 }
 0xfd8   :  { %v3928_v40 = vadd.f32 1.0, %v5244_v39 }
 0xfd9   :  { %v3927_v59 = vmul.f32 0.5, %v3926_v34 }
 0xfda   :  { %v3929_v35 = vmul.f32 0.5, %v3928_v40 }
 0xfdb   :  { %v5246_v50 = vpop.eup %5245 }
 0xfdc   :  { %v3933_v37 = vmul.f32 0.0, %v3929_v35  ;;  %v3934_v55 = vmul.f32 %v5246_v50, %v3927_v59 }
 0xfdd   :  { %v5248_v43 = vpop.eup %5247 }
 0xfde   :  { %v3935_v44 = vadd.f32 %v3934_v55, %v3933_v37  ;;  %v3930_v46 = vadd.f32 1.0, %v5248_v43  ;;  %v4064_v37 = vld [vmem:[#allocation2 + $0x30] sm:$0x30]  ;;  %v4065_v55 = vld [vmem:[#allocation2] sm:$0x30] }
 0xfe0   :  { %5249 = vtanh.f32 %v3935_v44  ;;  %v3931_v48 = vmul.f32 0.5, %v3930_v46  ;;  %v4056_v14 = vrot.slane %v3935_v44, 6 }
 0xfe6   :  { %v5250_v49 = vpop.eup %5249 }
 0xfe7   :  { %v3937_v53 = vmul.f32 %v5250_v49, %v3931_v48 }
 0xfe9   :  { %3938 = vst.msk [vmem:[#allocation3] sm:$0x3] %vm442_vm2, %v3937_v53  ;;  %4959 = vmatmul.msk.f32.vlgmr.msra.gmra.mxu0 %vm336_vm3, %v3937_v53  ;;  %4960 = vmatmul.msk.f32.vlgmr.msra.gmra.mxu1 %vm336_vm3, %v3937_v53 }
 0xfea   :  { %4961 = vmatmul.msk.f32.vlgmr.msra.gmra.mxu2 %vm336_vm3, %v3937_v53  ;;  %4962 = vmatmul.msk.f32.vlgmr.msra.gmra.mxu3 %vm336_vm3, %v3937_v53 }
 0xfeb   :  { %4210 = vmatpush.msra.mxu0 %v6186_v58  ;;  %4230 = vmatpush.msra.mxu1 %v6188_v11 }
 0xfec   :  { %4250 = vmatpush.msra.mxu2 %v6190_v60  ;;  %4270 = vmatpush.msra.mxu3 %v6206_v8 }
 0xfed   :  { %4211 = vmatpush.msra.mxu0 %v6194_v62  ;;  %4231 = vmatpush.msra.mxu1 %v6196_v63 }
 0xfee   :  { %4251 = vmatpush.msra.mxu2 %v6198_v1  ;;  %4271 = vmatpush.msra.mxu3 %v6226_v31 }
 0xfef   :  { %4212 = vmatpush.msra.mxu0 %v6218_v27  ;;  %4232 = vmatpush.msra.mxu1 %v6220_v24 }
 0xff0   :  { %4252 = vmatpush.msra.mxu2 %v6222_v28  ;;  %4272 = vmatpush.msra.mxu3 %v6236_v38 }
 0xff1   :  { %4213 = vmatpush.msra.mxu0 %v6228_v32  ;;  %4233 = vmatpush.msra.mxu1 %v6230_v22 }
 0xff2   :  { %4253 = vmatpush.msra.mxu2 %v6234_v33  ;;  %4273 = vmatpush.msra.mxu3 %v6242_v47 }
0x1066   :  { %v3963_v45 = vpop.f32.mrf.mxu0  ;;  %v3983_v54 = vpop.f32.mrf.mxu1 }
0x1067   :  { %v4030_v36 = vrot.slane %v3963_v45, 6  ;;  %v4031_v51 = vrot.slane %v3983_v54, 6 }
0x1069   :  { %v4038_v42 = vadd.f32 %v4030_v36, %v3939_v56  ;;  %v4039_v13 = vadd.f32 %v4031_v51, %v3940_v52  ;;  %v4066_v36 = vld [vmem:[#allocation2 + $0x18] sm:$0x30]  ;;  %v4067_v51 = vld [vmem:[#allocation2 + $0x10] sm:$0x30] }
0x106b   :  { %v4042_v57 = vmul.f32 0.5, %v4038_v42  ;;  %v4043_v9 = vmul.f32 0.5, %v4039_v13 }
0x106d   :  { %5251 = vtanh.f32 %v4042_v57  ;;  %v4003_v0 = vpop.f32.mrf.mxu2  ;;  %v4023_v10 = vpop.f32.mrf.mxu3 }
0x106e   :  { %5253 = vtanh.f32 %v4043_v9  ;;  %v4032_v26 = vrot.slane %v4003_v0, 6  ;;  %v4033_v61 = vrot.slane %v4023_v10, 6 }
0x1070   :  { %v4040_v25 = vadd.f32 %v4032_v26, %v3941_v2  ;;  %v4041_v3 = vadd.f32 %v4033_v61, %v3942_v17 }
0x1072   :  { %5255 = vtanh.f32 %v4040_v25  ;;  %v4044_v4 = vmul.f32 0.5, %v4041_v3 }
0x1073   :  { %v5252_v15 = vpop.eup %5251 }
0x1074   :  { %v5254_v5 = vpop.eup %5253  ;;  %v4048_v16 = vadd.f32 1.0, %v5252_v15  ;;  %5257 = vtanh.f32 %v4044_v4 }
0x1075   :  { %v4050_v19 = vadd.f32 1.0, %v5254_v5 }
0x1076   :  { %v4049_v21 = vmul.f32 0.5, %v4048_v16 }
0x1077   :  { %v4051_v12 = vmul.f32 0.5, %v4050_v19 }
0x1078   :  { %v5256_v20 = vpop.eup %5255 }
0x1079   :  { %v4058_v41 = vmul.f32 %v4056_v14, %v4051_v12  ;;  %v4059_v23 = vmul.f32 %v5256_v20, %v4049_v21 }
0x107a   :  { %v5258_v7 = vpop.eup %5257 }
0x107b   :  { %v4060_v18 = vadd.f32 %v4059_v23, %v4058_v41  ;;  %v4052_v29 = vadd.f32 1.0, %v5258_v7  ;;  %v4190_v23 = vld [vmem:[#allocation2 + $0x30] sm:$0xc0]  ;;  %v4191_v7 = vld [vmem:[#allocation2] sm:$0xc0] }
0x107d   :  { %5259 = vtanh.f32 %v4060_v18  ;;  %v4053_v6 = vmul.f32 0.5, %v4052_v29  ;;  %v4182_v61 = vrot.slane %v4060_v18, 6 }
0x1083   :  { %v5260_v30 = vpop.eup %5259 }
0x1084   :  { %v4062_v39 = vmul.f32 %v5260_v30, %v4053_v6 }
0x1086   :  { %4063 = vst.msk [vmem:[#allocation3] sm:$0xc] %vm568_vm4, %v4062_v39  ;;  %v4069_v34 = vrot.slane %v4062_v39, 2 }
0x1088   :  { %4963 = vmatmul.msk.f32.vlgmr.msrb.gmra.mxu0 %vm336_vm3, %v4069_v34  ;;  %4964 = vmatmul.msk.f32.vlgmr.msrb.gmra.mxu1 %vm336_vm3, %v4069_v34 }
0x1089   :  { %4965 = vmatmul.msk.f32.vlgmr.msrb.gmra.mxu2 %vm336_vm3, %v4069_v34  ;;  %4966 = vmatmul.msk.f32.vlgmr.msrb.gmra.mxu3 %vm336_vm3, %v4069_v34 }
0x108a   :  { %4336 = vmatpush.msrb.mxu0 %v6186_v58  ;;  %4356 = vmatpush.msrb.mxu1 %v6188_v11 }
0x108b   :  { %4376 = vmatpush.msrb.mxu2 %v6190_v60  ;;  %4396 = vmatpush.msrb.mxu3 %v6206_v8 }
0x108c   :  { %4337 = vmatpush.msrb.mxu0 %v6194_v62  ;;  %4357 = vmatpush.msrb.mxu1 %v6196_v63 }
0x108d   :  { %4377 = vmatpush.msrb.mxu2 %v6198_v1  ;;  %4397 = vmatpush.msrb.mxu3 %v6226_v31 }
0x108e   :  { %4338 = vmatpush.msrb.mxu0 %v6218_v27  ;;  %4358 = vmatpush.msrb.mxu1 %v6220_v24 }
0x108f   :  { %4378 = vmatpush.msrb.mxu2 %v6222_v28  ;;  %4398 = vmatpush.msrb.mxu3 %v6236_v38 }
0x1090   :  { %4339 = vmatpush.msrb.mxu0 %v6228_v32  ;;  %4359 = vmatpush.msrb.mxu1 %v6230_v22 }
0x1091   :  { %4379 = vmatpush.msrb.mxu2 %v6234_v33  ;;  %4399 = vmatpush.msrb.mxu3 %v6242_v47 }
0x1105   :  { %v4089_v40 = vpop.f32.mrf.mxu0  ;;  %v4109_v59 = vpop.f32.mrf.mxu1 }
0x1106   :  { %v4156_v35 = vrot.slane %v4089_v40, 4  ;;  %v4157_v50 = vrot.slane %v4109_v59, 4 }
0x1108   :  { %v4164_v43 = vadd.f32 %v4156_v35, %v4064_v37  ;;  %v4165_v44 = vadd.f32 %v4157_v50, %v4065_v55  ;;  %v4192_v35 = vld [vmem:[#allocation2 + $0x18] sm:$0xc0]  ;;  %v4193_v50 = vld [vmem:[#allocation2 + $0x10] sm:$0xc0] }
0x110a   :  { %v4168_v46 = vmul.f32 0.5, %v4164_v43  ;;  %v4169_v48 = vmul.f32 0.5, %v4165_v44 }
0x110c   :  { %5261 = vtanh.f32 %v4168_v46  ;;  %v4129_v49 = vpop.f32.mrf.mxu2  ;;  %v4149_v53 = vpop.f32.mrf.mxu3 }
0x110d   :  { %5263 = vtanh.f32 %v4169_v48  ;;  %v4158_v45 = vrot.slane %v4129_v49, 4  ;;  %v4159_v54 = vrot.slane %v4149_v53, 4 }
0x110f   :  { %v4166_v56 = vadd.f32 %v4158_v45, %v4066_v36  ;;  %v4167_v52 = vadd.f32 %v4159_v54, %v4067_v51 }
0x1111   :  { %5265 = vtanh.f32 %v4166_v56  ;;  %v4170_v42 = vmul.f32 0.5, %v4167_v52 }
0x1112   :  { %v5262_v13 = vpop.eup %5261 }
0x1113   :  { %v5264_v57 = vpop.eup %5263  ;;  %v4174_v9 = vadd.f32 1.0, %v5262_v13  ;;  %5267 = vtanh.f32 %v4170_v42 }
0x1114   :  { %v4176_v0 = vadd.f32 1.0, %v5264_v57 }
0x1115   :  { %v4175_v10 = vmul.f32 0.5, %v4174_v9 }
0x1116   :  { %v4177_v26 = vmul.f32 0.5, %v4176_v0 }
0x1117   :  { %v5266_v2 = vpop.eup %5265 }
0x1118   :  { %v4184_v17 = vmul.f32 %v4182_v61, %v4177_v26  ;;  %v4185_v25 = vmul.f32 %v5266_v2, %v4175_v10  ;;  %v4316_v26 = vld [vmem:[#allocation2 + $0x8] sm:$0x3]  ;;  %v4317_v2 = vld [vmem:[#allocation2 + $0x20] sm:$0x3] }
0x1119   :  { %v5268_v3 = vpop.eup %5267 }
0x111a   :  { %v4186_v4 = vadd.f32 %v4185_v25, %v4184_v17  ;;  %v4178_v15 = vadd.f32 1.0, %v5268_v3 }
0x111c   :  { %5269 = vtanh.f32 %v4186_v4  ;;  %v4179_v5 = vmul.f32 0.5, %v4178_v15  ;;  %v4308_v54 = vrot.slane %v4186_v4, 6 }
0x1122   :  { %v5270_v16 = vpop.eup %5269 }
0x1123   :  { %v4188_v19 = vmul.f32 %v5270_v16, %v4179_v5  ;;  %v4318_v5 = vld [vmem:[#allocation2 + $0x28] sm:$0x3] }
0x1125   :  { %4189 = vst.msk [vmem:[#allocation3] sm:$0x30] %vm695_vm5, %v4188_v19  ;;  %v4195_v21 = vrot.slane %v4188_v19, 4  ;;  %v4319_v19 = vld [vmem:[#allocation2 + $0x38] sm:$0x3] }
0x1127   :  { %4967 = vmatmul.msk.f32.vlgmr.msra.gmra.mxu0 %vm336_vm3, %v4195_v21  ;;  %4968 = vmatmul.msk.f32.vlgmr.msra.gmra.mxu1 %vm336_vm3, %v4195_v21 }
0x1128   :  { %4969 = vmatmul.msk.f32.vlgmr.msra.gmra.mxu2 %vm336_vm3, %v4195_v21  ;;  %4970 = vmatmul.msk.f32.vlgmr.msra.gmra.mxu3 %vm336_vm3, %v4195_v21 }
0x1129   :  { %4449 = vmatpush.msra.mxu0 %v6186_v58  ;;  %4469 = vmatpush.msra.mxu1 %v6188_v11 }
0x112a   :  { %4489 = vmatpush.msra.mxu2 %v6190_v60  ;;  %4509 = vmatpush.msra.mxu3 %v6206_v8 }
0x112b   :  { %4450 = vmatpush.msra.mxu0 %v6194_v62  ;;  %4470 = vmatpush.msra.mxu1 %v6196_v63 }
0x112c   :  { %4490 = vmatpush.msra.mxu2 %v6198_v1  ;;  %4510 = vmatpush.msra.mxu3 %v6226_v31 }
0x112d   :  { %4451 = vmatpush.msra.mxu0 %v6218_v27  ;;  %4471 = vmatpush.msra.mxu1 %v6220_v24 }
0x112e   :  { %4491 = vmatpush.msra.mxu2 %v6222_v28  ;;  %4511 = vmatpush.msra.mxu3 %v6236_v38 }
0x112f   :  { %4452 = vmatpush.msra.mxu0 %v6228_v32  ;;  %4472 = vmatpush.msra.mxu1 %v6230_v22 }
0x1130   :  { %4492 = vmatpush.msra.mxu2 %v6234_v33  ;;  %4512 = vmatpush.msra.mxu3 %v6242_v47 }
0x11a4   :  { %v4215_v12 = vpop.f32.mrf.mxu0  ;;  %v4235_v14 = vpop.f32.mrf.mxu1 }
0x11a5   :  { %v4282_v20 = vrot.slane %v4215_v12, 2  ;;  %v4283_v41 = vrot.slane %v4235_v14, 2 }
0x11a7   :  { %v4290_v18 = vadd.f32 %v4282_v20, %v4190_v23  ;;  %v4291_v29 = vadd.f32 %v4283_v41, %v4191_v7 }
0x11a9   :  { %v4294_v6 = vmul.f32 0.5, %v4290_v18  ;;  %v4295_v30 = vmul.f32 0.5, %v4291_v29 }
0x11ab   :  { %5271 = vtanh.f32 %v4294_v6  ;;  %v4255_v39 = vpop.f32.mrf.mxu2  ;;  %v4275_v34 = vpop.f32.mrf.mxu3 }
0x11ac   :  { %5273 = vtanh.f32 %v4295_v30  ;;  %v4284_v40 = vrot.slane %v4255_v39, 2  ;;  %v4285_v59 = vrot.slane %v4275_v34, 2 }
0x11ae   :  { %v4292_v37 = vadd.f32 %v4284_v40, %v4192_v35  ;;  %v4293_v55 = vadd.f32 %v4285_v59, %v4193_v50 }
0x11b0   :  { %5275 = vtanh.f32 %v4292_v37  ;;  %v4296_v43 = vmul.f32 0.5, %v4293_v55 }
0x11b1   :  { %v5272_v44 = vpop.eup %5271 }
0x11b2   :  { %v5274_v46 = vpop.eup %5273  ;;  %v4300_v48 = vadd.f32 1.0, %v5272_v44  ;;  %5277 = vtanh.f32 %v4296_v43  ;;  %v4432_v44 = vld [vmem:[#allocation2 + $0x28] sm:$0xc] }
0x11b3   :  { %v4302_v49 = vadd.f32 1.0, %v5274_v46 }
0x11b4   :  { %v4301_v53 = vmul.f32 0.5, %v4300_v48 }
0x11b5   :  { %v4303_v45 = vmul.f32 0.5, %v4302_v49 }
0x11b6   :  { %v5276_v36 = vpop.eup %5275 }
0x11b7   :  { %v4310_v51 = vmul.f32 %v4308_v54, %v4303_v45  ;;  %v4311_v56 = vmul.f32 %v5276_v36, %v4301_v53 }
0x11b8   :  { %v5278_v52 = vpop.eup %5277 }
0x11b9   :  { %v4312_v42 = vadd.f32 %v4311_v56, %v4310_v51  ;;  %v4304_v13 = vadd.f32 1.0, %v5278_v52 }
0x11bb   :  { %5279 = vtanh.f32 %v4312_v42  ;;  %v4305_v57 = vmul.f32 0.5, %v4304_v13  ;;  %v4422_v30 = vrot.slane %v4312_v42, 6 }
0x11c1   :  { %v5280_v9 = vpop.eup %5279 }
0x11c2   :  { %v4314_v0 = vmul.f32 %v5280_v9, %v4305_v57 }
0x11c4   :  { %4315 = vst.msk [vmem:[#allocation3] sm:$0xc0] %vm822_vm6, %v4314_v0  ;;  %v4321_v10 = vrot.slane %v4314_v0, 6 }
0x11c6   :  { %4971 = vmatmul.msk.f32.vlgmr.msrb.gmra.mxu0 %vm336_vm3, %v4321_v10  ;;  %4972 = vmatmul.msk.f32.vlgmr.msrb.gmra.mxu1 %vm336_vm3, %v4321_v10 }
0x11c7   :  { %4973 = vmatmul.msk.f32.vlgmr.msrb.gmra.mxu2 %vm336_vm3, %v4321_v10  ;;  %4974 = vmatmul.msk.f32.vlgmr.msrb.gmra.mxu3 %vm336_vm3, %v4321_v10 }
0x11c8   :  { %4575 = vmatpush.msrb.mxu0 %v6186_v58  ;;  %4595 = vmatpush.msrb.mxu1 %v6188_v11 }
0x11c9   :  { %4615 = vmatpush.msrb.mxu2 %v6190_v60  ;;  %4635 = vmatpush.msrb.mxu3 %v6206_v8 }
0x11ca   :  { %4576 = vmatpush.msrb.mxu0 %v6194_v62  ;;  %4596 = vmatpush.msrb.mxu1 %v6196_v63 }
0x11cb   :  { %4616 = vmatpush.msrb.mxu2 %v6198_v1  ;;  %4636 = vmatpush.msrb.mxu3 %v6226_v31 }
0x11cc   :  { %4577 = vmatpush.msrb.mxu0 %v6218_v27  ;;  %4597 = vmatpush.msrb.mxu1 %v6220_v24 }
0x11cd   :  { %4617 = vmatpush.msrb.mxu2 %v6222_v28  ;;  %4637 = vmatpush.msrb.mxu3 %v6236_v38 }
0x11ce   :  { %4578 = vmatpush.msrb.mxu0 %v6228_v32  ;;  %4598 = vmatpush.msrb.mxu1 %v6230_v22 }
0x11cf   :  { %4618 = vmatpush.msrb.mxu2 %v6234_v33  ;;  %4638 = vmatpush.msrb.mxu3 %v6242_v47 }
0x1243   :  { %v4341_v61 = vpop.f32.mrf.mxu0  ;;  %v4361_v17 = vpop.f32.mrf.mxu1 }
0x1244   :  { %v4404_v25 = vadd.f32 %v4341_v61, %v4316_v26  ;;  %v4405_v3 = vadd.f32 %v4361_v17, %v4317_v2  ;;  %v4824_v17 = vld [vmem:[#allocation15 + $0x78] sm:$0xff] }
0x1246   :  { %v4408_v4 = vmul.f32 0.5, %v4404_v25  ;;  %v4409_v15 = vmul.f32 0.5, %v4405_v3  ;;  %v4823_v25 = vld [vmem:[#allocation15 + $0x70] sm:$0xff]  ;;  %v4822_v3 = vld [vmem:[#allocation15 + $0x68] sm:$0xff] }
0x1248   :  { %5281 = vtanh.f32 %v4408_v4  ;;  %v4821_v4 = vld [vmem:[#allocation15 + $0x60] sm:$0xff] }
0x1249   :  { %5283 = vtanh.f32 %v4409_v15  ;;  %v4820_v15 = vld [vmem:[#allocation15 + $0x58] sm:$0xff] }
0x124a   :  { %v4381_v16 = vpop.f32.mrf.mxu2  ;;  %v4401_v21 = vpop.f32.mrf.mxu3 }
0x124b   :  { %v4406_v12 = vadd.f32 %v4381_v16, %v4318_v5  ;;  %v4407_v14 = vadd.f32 %v4401_v21, %v4319_v19  ;;  %v4819_v5 = vld [vmem:[#allocation15 + $0x50] sm:$0xff]  ;;  %v4818_v16 = vld [vmem:[#allocation15 + $0x48] sm:$0xff]  ;;  %v4817_v19 = vld [vmem:[#allocation15 + $0x40] sm:$0xff] }
0x124c   :  { %v4816_v21 = vld [vmem:[#allocation15 + $0x38] sm:$0xff] }
0x124d   :  { %5285 = vtanh.f32 %v4406_v12  ;;  %v4410_v20 = vmul.f32 0.5, %v4407_v14  ;;  %v4815_v12 = vld [vmem:[#allocation15 + $0x30] sm:$0xff]  ;;  %v4814_v14 = vld [vmem:[#allocation15 + $0x28] sm:$0xff] }
0x124e   :  { %v5282_v41 = vpop.eup %5281 }
0x124f   :  { %v5284_v23 = vpop.eup %5283  ;;  %v4414_v7 = vadd.f32 1.0, %v5282_v41  ;;  %5287 = vtanh.f32 %v4410_v20 }
0x1250   :  { %v4416_v18 = vadd.f32 1.0, %v5284_v23  ;;  %v4813_v23 = vld [vmem:[#allocation15 + $0x20] sm:$0xff] }
0x1251   :  { %v4415_v29 = vmul.f32 0.5, %v4414_v7 }
0x1252   :  { %v4417_v6 = vmul.f32 0.5, %v4416_v18 }
0x1253   :  { %v5286_v39 = vpop.eup %5285 }
0x1254   :  { %v4424_v34 = vmul.f32 %v4422_v30, %v4417_v6  ;;  %v4425_v40 = vmul.f32 %v5286_v39, %v4415_v29  ;;  %v4555_v29 = vld [vmem:[#allocation2 + $0x8] sm:$0x30]  ;;  %v4556_v6 = vld [vmem:[#allocation2 + $0x20] sm:$0x30] }
0x1255   :  { %v5288_v59 = vpop.eup %5287 }
0x1256   :  { %v4426_v35 = vadd.f32 %v4425_v40, %v4424_v34  ;;  %v4418_v50 = vadd.f32 1.0, %v5288_v59  ;;  %v4812_v34 = vld [vmem:[#allocation15 + $0x18] sm:$0xff]  ;;  %v4811_v40 = vld [vmem:[#allocation15 + $0x10] sm:$0xff] }
0x1258   :  { %5289 = vtanh.f32 %v4426_v35  ;;  %v4419_v37 = vmul.f32 0.5, %v4418_v50  ;;  %v4547_v56 = vrot.slane %v4426_v35, 6  ;;  %v4810_v50 = vld [vmem:[#allocation15 + $0x8] sm:$0xff] }
0x125e   :  { %v5290_v55 = vpop.eup %5289 }
0x125f   :  { %v4428_v43 = vmul.f32 %v5290_v55, %v4419_v37 }
0x1261   :  { %4429 = vst.msk [vmem:[#allocation3 + $0x8] sm:$0x3] %vm442_vm2, %v4428_v43  ;;  %4975 = vmatmul.msk.f32.vlgmr.msra.gmra.mxu0 %vm336_vm3, %v4428_v43  ;;  %4976 = vmatmul.msk.f32.vlgmr.msra.gmra.mxu1 %vm336_vm3, %v4428_v43 }
0x1262   :  { %4977 = vmatmul.msk.f32.vlgmr.msra.gmra.mxu2 %vm336_vm3, %v4428_v43  ;;  %4978 = vmatmul.msk.f32.vlgmr.msra.gmra.mxu3 %vm336_vm3, %v4428_v43  ;;  %v4809_v43 = vld [vmem:[#allocation15] sm:$0xff] }
0x1263   :  { %4701 = vmatpush.msra.mxu0 %v6186_v58  ;;  %4721 = vmatpush.msra.mxu1 %v6188_v11 }
0x1264   :  { %4741 = vmatpush.msra.mxu2 %v6190_v60  ;;  %4761 = vmatpush.msra.mxu3 %v6206_v8 }
0x1265   :  { %4702 = vmatpush.msra.mxu0 %v6194_v62  ;;  %4722 = vmatpush.msra.mxu1 %v6196_v63  ;;  %v4430_v63 = vld [vmem:[#allocation2 + $0x8] sm:$0xc] }
0x1266   :  { %4742 = vmatpush.msra.mxu2 %v6198_v1  ;;  %4762 = vmatpush.msra.mxu3 %v6226_v31  ;;  %v4431_v1 = vld [vmem:[#allocation2 + $0x20] sm:$0xc] }
0x1267   :  { %4703 = vmatpush.msra.mxu0 %v6218_v27  ;;  %4723 = vmatpush.msra.mxu1 %v6220_v24 }
0x1268   :  { %4743 = vmatpush.msra.mxu2 %v6222_v28  ;;  %4763 = vmatpush.msra.mxu3 %v6236_v38 }
0x1269   :  { %4704 = vmatpush.msra.mxu0 %v6228_v32  ;;  %4724 = vmatpush.msra.mxu1 %v6230_v22 }
0x126a   :  { %4744 = vmatpush.msra.mxu2 %v6234_v33  ;;  %4764 = vmatpush.msra.mxu3 %v6242_v47  ;;  %v4433_v33 = vld [vmem:[#allocation2 + $0x38] sm:$0xc] }
0x12de   :  { %v4454_v58 = vpop.f32.mrf.mxu0  ;;  %v4474_v11 = vpop.f32.mrf.mxu1 }
0x12df   :  { %v4521_v60 = vrot.slane %v4454_v58, 6  ;;  %v4522_v62 = vrot.slane %v4474_v11, 6 }
0x12e1   :  { %v4529_v8 = vadd.f32 %v4521_v60, %v4430_v63  ;;  %v4530_v27 = vadd.f32 %v4522_v62, %v4431_v1  ;;  %v4557_v60 = vld [vmem:[#allocation2 + $0x28] sm:$0x30]  ;;  %v4558_v62 = vld [vmem:[#allocation2 + $0x38] sm:$0x30] }
0x12e3   :  { %v4533_v24 = vmul.f32 0.5, %v4529_v8  ;;  %v4534_v28 = vmul.f32 0.5, %v4530_v27 }
0x12e5   :  { %5291 = vtanh.f32 %v4533_v24  ;;  %v4494_v31 = vpop.f32.mrf.mxu2  ;;  %v4514_v38 = vpop.f32.mrf.mxu3 }
0x12e6   :  { %5293 = vtanh.f32 %v4534_v28  ;;  %v4523_v32 = vrot.slane %v4494_v31, 6  ;;  %v4524_v22 = vrot.slane %v4514_v38, 6 }
0x12e8   :  { %v4531_v46 = vadd.f32 %v4523_v32, %v4432_v44  ;;  %v4532_v47 = vadd.f32 %v4524_v22, %v4433_v33 }
0x12ea   :  { %5295 = vtanh.f32 %v4531_v46  ;;  %v4535_v48 = vmul.f32 0.5, %v4532_v47 }
0x12eb   :  { %v5292_v49 = vpop.eup %5291 }
0x12ec   :  { %v5294_v53 = vpop.eup %5293  ;;  %v4539_v45 = vadd.f32 1.0, %v5292_v49  ;;  %5297 = vtanh.f32 %v4535_v48 }
0x12ed   :  { %v4541_v54 = vadd.f32 1.0, %v5294_v53 }
0x12ee   :  { %v4540_v36 = vmul.f32 0.5, %v4539_v45 }
0x12ef   :  { %v4542_v51 = vmul.f32 0.5, %v4541_v54 }
0x12f0   :  { %v5296_v52 = vpop.eup %5295 }
0x12f1   :  { %v4549_v42 = vmul.f32 %v4547_v56, %v4542_v51  ;;  %v4550_v13 = vmul.f32 %v5296_v52, %v4540_v36  ;;  %v4807_v51 = vld [vmem:[#allocation3] sm:$0xff] }
0x12f2   :  { %v5298_v57 = vpop.eup %5297 }
0x12f3   :  { %v6402_v9 = vadd.f32 %v4550_v13, %v4549_v42  ;;  %v4543_v0 = vadd.f32 1.0, %v5298_v57  ;;  %v4681_v57 = vld [vmem:[#allocation2 + $0x8] sm:$0xc0] }
0x12f5   :  { %5299 = vtanh.f32 %v6402_v9  ;;  %v4544_v10 = vmul.f32 0.5, %v4543_v0  ;;  %v4673_v22 = vrot.slane %v6402_v9, 6  ;;  %v4682_v9 = vld [vmem:[#allocation2 + $0x20] sm:$0xc0] }
0x12fb   :  { %v5300_v26 = vpop.eup %5299 }
0x12fc   :  { %v4553_v61 = vmul.f32 %v5300_v26, %v4544_v10 }
0x12fe   :  { %4554 = vst.msk [vmem:[#allocation3 + $0x8] sm:$0xc] %vm568_vm4, %v4553_v61  ;;  %v4560_v2 = vrot.slane %v4553_v61, 2 }
0x1300   :  { %4979 = vmatmul.msk.f32.vlgmr.msrb.gmra.mxu0 %vm336_vm3, %v4560_v2  ;;  %4980 = vmatmul.msk.f32.vlgmr.msrb.gmra.mxu1 %vm336_vm3, %v4560_v2 }
0x1301   :  { %4981 = vmatmul.msk.f32.vlgmr.msrb.gmra.mxu2 %vm336_vm3, %v4560_v2  ;;  %4982 = vmatmul.msk.f32.vlgmr.msrb.gmra.mxu3 %vm336_vm3, %v4560_v2  ;;  %v5000_v2 = vld [vmem:[%s6440_s14] ss:$0 sm:$0xff] }
0x1302   :  { %4829 = vmatpush.msrb.mxu0 %v4824_v17 }
0x1304   :  { %4830 = vmatpush.msrb.mxu0 %v4823_v25 }
0x1306   :  { %4831 = vmatpush.msrb.mxu0 %v4822_v3 }
0x1308   :  { %4832 = vmatpush.msrb.mxu0 %v4821_v4 }
0x130a   :  { %4833 = vmatpush.msrb.mxu0 %v4820_v15 }
0x130c   :  { %4834 = vmatpush.msrb.mxu0 %v4819_v5  ;;  %v4683_v5 = vld [vmem:[#allocation2 + $0x28] sm:$0xc0] }
0x130e   :  { %4835 = vmatpush.msrb.mxu0 %v4818_v16  ;;  %v4684_v16 = vld [vmem:[#allocation2 + $0x38] sm:$0xc0] }
0x1310   :  { %4836 = vmatpush.msrb.mxu0 %v4817_v19 }
0x1312   :  { %4837 = vmatpush.msrb.mxu0 %v4816_v21 }
0x1314   :  { %4838 = vmatpush.msrb.mxu0 %v4815_v12 }
0x1316   :  { %4839 = vmatpush.msrb.mxu0 %v4814_v14 }
0x1318   :  { %4840 = vmatpush.msrb.mxu0 %v4813_v23 }
0x131a   :  { %4841 = vmatpush.msrb.mxu0 %v4812_v34 }
0x131c   :  { %4842 = vmatpush.msrb.mxu0 %v4811_v40 }
0x131e   :  { %4843 = vmatpush.msrb.mxu0 %v4810_v50 }
0x1320   :  { %4844 = vmatpush.msrb.mxu0 %v4809_v43 }
0x137d   :  { %v4580_v20 = vpop.f32.mrf.mxu0  ;;  %v4600_v41 = vpop.f32.mrf.mxu1 }
0x137e   :  { %v4647_v7 = vrot.slane %v4580_v20, 4  ;;  %v4648_v18 = vrot.slane %v4600_v41, 4 }
0x1380   :  { %v4655_v30 = vadd.f32 %v4647_v7, %v4555_v29  ;;  %v4656_v39 = vadd.f32 %v4648_v18, %v4556_v6 }
0x1382   :  { %v4659_v59 = vmul.f32 0.5, %v4655_v30  ;;  %v4660_v35 = vmul.f32 0.5, %v4656_v39 }
0x1384   :  { %5301 = vtanh.f32 %v4659_v59  ;;  %v4620_v37 = vpop.f32.mrf.mxu2  ;;  %v4640_v55 = vpop.f32.mrf.mxu3 }
0x1385   :  { %5303 = vtanh.f32 %v4660_v35  ;;  %v4649_v58 = vrot.slane %v4620_v37, 4  ;;  %v4650_v11 = vrot.slane %v4640_v55, 4 }
0x1387   :  { %v4657_v63 = vadd.f32 %v4649_v58, %v4557_v60  ;;  %v4658_v1 = vadd.f32 %v4650_v11, %v4558_v62 }
0x1389   :  { %5305 = vtanh.f32 %v4657_v63  ;;  %v4661_v8 = vmul.f32 0.5, %v4658_v1 }
0x138a   :  { %v5302_v27 = vpop.eup %5301 }
0x138b   :  { %v5304_v24 = vpop.eup %5303  ;;  %v4665_v28 = vadd.f32 1.0, %v5302_v27  ;;  %5307 = vtanh.f32 %v4661_v8 }
0x138c   :  { %v4667_v31 = vadd.f32 1.0, %v5304_v24 }
0x138d   :  { %v4666_v38 = vmul.f32 0.5, %v4665_v28 }
0x138e   :  { %v4668_v32 = vmul.f32 0.5, %v4667_v31 }
0x138f   :  { %v5306_v44 = vpop.eup %5305 }
0x1390   :  { %v4675_v33 = vmul.f32 %v4673_v22, %v4668_v32  ;;  %v4676_v46 = vmul.f32 %v5306_v44, %v4666_v38 }
0x1391   :  { %v5308_v47 = vpop.eup %5307 }
0x1392   :  { %v4677_v48 = vadd.f32 %v4676_v46, %v4675_v33  ;;  %v4669_v49 = vadd.f32 1.0, %v5308_v47 }
0x1394   :  { %5309 = vtanh.f32 %v4677_v48  ;;  %v4670_v53 = vmul.f32 0.5, %v4669_v49  ;;  %v4799_v6 = vrot.slane %v4677_v48, 6 }
0x139a   :  { %v5310_v45 = vpop.eup %5309 }
0x139b   :  { %v4679_v54 = vmul.f32 %v5310_v45, %v4670_v53 }
0x139d   :  { %4680 = vst.msk [vmem:[#allocation3 + $0x8] sm:$0x30] %vm695_vm5, %v4679_v54  ;;  %v4686_v36 = vrot.slane %v4679_v54, 4 }
0x139f   :  { %4983 = vmatmul.msk.f32.vlgmr.msra.gmra.mxu0 %vm336_vm3, %v4686_v36  ;;  %4984 = vmatmul.msk.f32.vlgmr.msra.gmra.mxu1 %vm336_vm3, %v4686_v36 }
0x13a0   :  { %4985 = vmatmul.msk.f32.vlgmr.msra.gmra.mxu2 %vm336_vm3, %v4686_v36  ;;  %4986 = vmatmul.msk.f32.vlgmr.msra.gmra.mxu3 %vm336_vm3, %v4686_v36 }
0x13a7   :  { %4845 = vmatmul.f32.vlgmr.msrb.gmra.mxu0 %v4807_v51 }
0x141c   :  { %v4706_v56 = vpop.f32.mrf.mxu0  ;;  %v4726_v52 = vpop.f32.mrf.mxu1 }
0x141d   :  { %v4773_v42 = vrot.slane %v4706_v56, 2  ;;  %v4774_v13 = vrot.slane %v4726_v52, 2 }
0x141f   :  { %v4781_v0 = vadd.f32 %v4773_v42, %v4681_v57  ;;  %v4782_v10 = vadd.f32 %v4774_v13, %v4682_v9 }
0x1421   :  { %v4785_v26 = vmul.f32 0.5, %v4781_v0  ;;  %v4786_v61 = vmul.f32 0.5, %v4782_v10 }
0x1423   :  { %5311 = vtanh.f32 %v4785_v26  ;;  %v4746_v17 = vpop.f32.mrf.mxu2  ;;  %v4766_v25 = vpop.f32.mrf.mxu3 }
0x1424   :  { %5313 = vtanh.f32 %v4786_v61  ;;  %v4775_v3 = vrot.slane %v4746_v17, 2  ;;  %v4776_v4 = vrot.slane %v4766_v25, 2  ;;  %v4846_v15 = vpop.f32.mrf.mxu0 }
0x1425   :  { %v4847_v19 = vadd.f32 %v5000_v2, %v4846_v15 }
0x1426   :  { %v4783_v21 = vadd.f32 %v4775_v3, %v4683_v5  ;;  %v4784_v12 = vadd.f32 %v4776_v4, %v4684_v16 }
0x1427   :  { %4852 = vst [vmem:[%s6441_s15] sm:$0xff] %v4847_v19 }
0x1428   :  { %5315 = vtanh.f32 %v4783_v21  ;;  %v4787_v14 = vmul.f32 0.5, %v4784_v12 }
0x1429   :  { %v5312_v20 = vpop.eup %5311 }
0x142a   :  { %v5314_v41 = vpop.eup %5313  ;;  %v4791_v23 = vadd.f32 1.0, %v5312_v20  ;;  %5317 = vtanh.f32 %v4787_v14 }
0x142b   :  { %v4793_v7 = vadd.f32 1.0, %v5314_v41 }
0x142c   :  { %v4792_v18 = vmul.f32 0.5, %v4791_v23 }
0x142d   :  { %v4794_v29 = vmul.f32 0.5, %v4793_v7 }
0x142e   :  { %v5316_v30 = vpop.eup %5315 }
0x142f   :  { %v4801_v39 = vmul.f32 %v4799_v6, %v4794_v29  ;;  %v4802_v34 = vmul.f32 %v5316_v30, %v4792_v18 }
0x1430   :  { %v5318_v40 = vpop.eup %5317 }
0x1431   :  { %v4803_v59 = vadd.f32 %v4802_v34, %v4801_v39  ;;  %v4795_v35 = vadd.f32 1.0, %v5318_v40 }
0x1433   :  { %5319 = vtanh.f32 %v4803_v59  ;;  %v4796_v50 = vmul.f32 0.5, %v4795_v35 }
0x1439   :  { %v5320_v37 = vpop.eup %5319 }
0x143a   :  { %v4805_v55 = vmul.f32 %v5320_v37, %v4796_v50 }
0x143c   :  { %4806 = vst.msk [vmem:[#allocation3 + $0x8] sm:$0xc0] %vm822_vm6, %v4805_v55 }
0x1443   :  { %v4808_v43 = vld [vmem:[#allocation3 + $0x8] sm:$0xff] }
0x1444   :  { %4848 = vmatmul.f32.gmra.mxu0 %v4808_v43 }
0x14c1   :  { %v4849_v58 = vpop.f32.mrf.mxu0 }
0x14c2   :  { %v4850_v11 = vadd.f32 %v5000_v2, %v4849_v58 }
0x14c4   :  { %4853 = vst [vmem:[%s6441_s15 + $0x8] sm:$0xff] %v4850_v11 }
0x14c5   :  { %4858 = vsyncpa [#allocation5], 1 }
0x14c6   :  { %4859 = vsyncpa [#allocation7], 1 }
0x14c7   :  { %4860 = vsyncpa [#allocation10], 1 }
0x14c8   :  { %4861 = vsyncpa [#allocation13], 1 }
0x14c9   :  { %4862 = vsyncpa [#allocation16], 1 }

</bundles_post_ra>
